<compile_context>
chip_gen: v7x
topology: tpu7x:2x2x1
jax: 0.10.0
libtpu: 0.0.40
codegen_flags: <defaults>
</compile_context>

<pallas_src>
import functools
import math

import jax
import jax.numpy as jnp
import numpy as np
from jax import lax
from jax.experimental import pallas as pl
from jax.experimental.pallas import tpu as pltpu


class Config:
    n_features = 4
    d_model = 32
    kernel_size_list = [3, 3]
    stride_size_list = [2, 2]
    padding_size_list = [1, 1]
    raw_input_len = 16
    down_sampling = 4          # raw_input_len // down_sampling = final seq len (4)
    num_heads = 4
    d_ff = 64
    num_layers = 2


# --------------------------- in-kernel math helpers ---------------------------


def _channel_norm(y, g, b, eps=1e-5):
    """Reference ChannelNorm: mean/var over channels, unbiased var (torch.var default)."""
    c = y.shape[-1]
    mean = jnp.mean(y, axis=-1, keepdims=True)
    diff = y - mean
    var = jnp.sum(diff * diff, axis=-1, keepdims=True) / (c - 1)
    return diff * lax.rsqrt(var + eps) * g + b


def _layer_norm(y, g, b, eps=1e-12):
    # TODO(synk): BertModel source was not provided; BERT convention eps=1e-12 is used
    # (torch.nn.LayerNorm default would be 1e-5).
    mean = jnp.mean(y, axis=-1, keepdims=True)
    diff = y - mean
    var = jnp.mean(diff * diff, axis=-1, keepdims=True)
    return diff * lax.rsqrt(var + eps) * g + b


def _softmax_rows(s):
    s = s - jnp.max(s, axis=-1, keepdims=True)
    p = jnp.exp(s)
    return p * pl.reciprocal(jnp.sum(p, axis=-1, keepdims=True), approx=True)


_NT_DIMS = (((1,), (1,)), ((), ()))   # contract last dims of both operands (q @ k^T)


# ------------------------------- fused kernel ----------------------------------


def _fused_encoder_kernel(*refs, n_conv, n_layers, n_heads):
    it = iter(refs)
    x_ref = next(it)                                           # (1, L, C_in)
    conv_layers = [tuple(next(it) for _ in range(5)) for _ in range(n_conv)]
    pos_ref = next(it)                                         # (S, D)
    (wqkv_ref, bqkv_ref, wo_ref, bo_ref,
     w1_ref, b1_ref, w2_ref, b2_ref,
     ln1g_ref, ln1b_ref, ln2g_ref, ln2b_ref) = (next(it) for _ in range(12))
    out_ref = next(it)                                         # (1, 1, D)

    # ---- Conv1d -> ChannelNorm -> ReLU stack (channel-last rows, VMEM-resident) ----
    act = x_ref[0]                                             # (L, C_in)
    for s_ref, w_ref, cb_ref, g_ref, be_ref in conv_layers:
        ktaps = s_ref.shape[0]
        y = None
        for dk in range(ktaps):
            gathered = jnp.dot(s_ref[dk], act, preferred_element_type=jnp.float32)
            contrib = jnp.dot(gathered, w_ref[dk], preferred_element_type=jnp.float32)
            y = contrib if y is None else y + contrib
        y = y + cb_ref[...]
        act = jnp.maximum(_channel_norm(y, g_ref[...], be_ref[...]), 0.0)

    # ---- BERT-style transformer encoder on (S, D), then sequence mean -------------
    D = act.shape[-1]
    dh = D // n_heads
    scale = 1.0 / math.sqrt(dh)

    x = act + pos_ref[...]                                     # (S, D)
    for l in range(n_layers):
        # fused QKV projection -> (S, 3D)
        qkv = jnp.dot(x, wqkv_ref[l], preferred_element_type=jnp.float32) + bqkv_ref[l]
        wo_l = wo_ref[l]                                       # (D, D)
        attn_out = bo_ref[l]                                   # (1, D), broadcasts
        for hh in range(n_heads):
            q = qkv[:, hh * dh:(hh + 1) * dh] * scale
            k = qkv[:, D + hh * dh:D + (hh + 1) * dh]
            v = qkv[:, 2 * D + hh * dh:2 * D + (hh + 1) * dh]
            s = lax.dot_general(q, k, _NT_DIMS, preferred_element_type=jnp.float32)
            p = _softmax_rows(s)
            ctx = jnp.dot(p, v, preferred_element_type=jnp.float32)        # (S, dh)
            # output projection folded in: rows hh*dh:(hh+1)*dh of W_o
            attn_out = attn_out + jnp.dot(
                ctx, wo_l[hh * dh:(hh + 1) * dh, :],
                preferred_element_type=jnp.float32)
        x = _layer_norm(x + attn_out, ln1g_ref[l], ln1b_ref[l])

        # TODO(synk): torch.nn.GELU default is exact erf; tanh-approx GELU used here.
        ff = jax.nn.gelu(jnp.dot(x, w1_ref[l], preferred_element_type=jnp.float32)
                         + b1_ref[l])
        ff = jnp.dot(ff, w2_ref[l], preferred_element_type=jnp.float32) + b2_ref[l]
        x = _layer_norm(x + ff, ln2g_ref[l], ln2b_ref[l])

    out_ref[0] = jnp.mean(x, axis=0, keepdims=True)            # context_r.mean(dim=1)


# ------------------------------- wrapper / glue ---------------------------------


def _conv_selection(l_in, k, stride, pad):
    """0/1 matrices S[dk] (L_out, L_in) s.t. conv(x) = sum_dk S[dk] @ x @ W[dk]."""
    l_out = (l_in + 2 * pad - k) // stride + 1
    sel = np.zeros((k, l_out, l_in), np.float32)
    for dk in range(k):
        for t in range(l_out):
            src = t * stride - pad + dk
            if 0 <= src < l_in:
                sel[dk, t, src] = 1.0
    return jnp.asarray(sel), l_out


def init_params(key, cfg):
    params = {}
    keys = iter(jax.random.split(key, 256))

    def nrm(shape, scale=0.05):
        return scale * jax.random.normal(next(keys), shape, dtype=jnp.float32)

    in_ch = [cfg.n_features] + [cfg.d_model] * (len(cfg.kernel_size_list) - 1)
    conv = []
    for cin, ksz in zip(in_ch, cfg.kernel_size_list):
        conv.append(dict(
            w=nrm((ksz, cin, cfg.d_model)),                    # tap-major conv weight
            b=jnp.zeros((1, cfg.d_model), jnp.float32),
            g=jnp.ones((1, cfg.d_model), jnp.float32),         # ChannelNorm weight = 1
            beta=jnp.zeros((1, cfg.d_model), jnp.float32),     # ChannelNorm bias = 0
        ))
    params["conv"] = conv

    seq = cfg.raw_input_len // cfg.down_sampling
    D, F, NL = cfg.d_model, cfg.d_ff, cfg.num_layers
    params["pos_emb"] = nrm((seq, D), 0.02)
    params["wqkv"] = nrm((NL, D, 3 * D))                       # fused Q|K|V weight
    params["bqkv"] = jnp.zeros((NL, 1, 3 * D), jnp.float32)
    params["wo"] = nrm((NL, D, D))
    params["bo"] = jnp.zeros((NL, 1, D), jnp.float32)
    params["w1"] = nrm((NL, D, F))
    params["b1"] = jnp.zeros((NL, 1, F), jnp.float32)
    params["w2"] = nrm((NL, F, D))
    params["b2"] = jnp.zeros((NL, 1, D), jnp.float32)
    params["ln1_g"] = jnp.ones((NL, 1, D), jnp.float32)
    params["ln1_b"] = jnp.zeros((NL, 1, D), jnp.float32)
    params["ln2_g"] = jnp.ones((NL, 1, D), jnp.float32)
    params["ln2_b"] = jnp.zeros((NL, 1, D), jnp.float32)
    return params


def cl_encoder_forward(params, x, cfg):
    """x: (B, n_features, L) -- same NCW layout as the PyTorch module input."""
    B, c_in, L = x.shape
    D = cfg.d_model
    n_conv = len(cfg.kernel_size_list)

    # single cheap relayout: channel-last rows for the whole fused kernel
    x_rows = jnp.transpose(x, (0, 2, 1)).astype(jnp.float32)   # (B, L, C_in)

    # host-side constant selection matrices encoding each conv's stride / padding
    sels = []
    l_cur = L
    for ksz, st, pad in zip(cfg.kernel_size_list, cfg.stride_size_list,
                            cfg.padding_size_list):
        sel, l_cur = _conv_selection(l_cur, ksz, st, pad)
        sels.append(sel)
    assert l_cur == cfg.raw_input_len // cfg.down_sampling

    def bcast_spec(arr):
        return pl.BlockSpec(arr.shape, lambda b, nd=arr.ndim: (0,) * nd)

    operands = [x_rows]
    in_specs = [pl.BlockSpec((1, L, c_in), lambda b: (b, 0, 0))]
    for sel, cp in zip(sels, params["conv"]):
        for arr in (sel, cp["w"], cp["b"], cp["g"], cp["beta"]):
            operands.append(arr)
            in_specs.append(bcast_spec(arr))
    for name in ("pos_emb", "wqkv", "bqkv", "wo", "bo", "w1", "b1", "w2", "b2",
                 "ln1_g", "ln1_b", "ln2_g", "ln2_b"):
        operands.append(params[name])
        in_specs.append(bcast_spec(params[name]))

    kern = functools.partial(_fused_encoder_kernel, n_conv=n_conv,
                             n_layers=cfg.num_layers, n_heads=cfg.num_heads)

    out = pl.pallas_call(
        kern,
        grid=(B,),
        in_specs=in_specs,
        out_specs=pl.BlockSpec((1, 1, D), lambda b: (b, 0, 0)),
        out_shape=jax.ShapeDtypeStruct((B, 1, D), jnp.float32),
        compiler_params=pltpu.CompilerParams(dimension_semantics=("parallel",)),
    )(*operands)
    return out.reshape(B, D)


if __name__ == "__main__":
    cfg = Config()
    key = jax.random.PRNGKey(0)
    pkey, xkey = jax.random.split(key)
    params = init_params(pkey, cfg)
    x = jax.random.normal(xkey, (2, cfg.n_features, cfg.raw_input_len),
                          dtype=jnp.float32)

    seg_r = cl_encoder_forward(params, x, cfg)
    seg_r = jax.block_until_ready(seg_r)
    assert seg_r.shape == (2, cfg.d_model), seg_r.shape
    assert bool(jnp.all(jnp.isfinite(seg_r)))
    print("KERNEL_OK")
</pallas_src>

<mosaic_0001>
module attributes {stable_mosaic.version = 11 : i64} {
  func.func @_fused_encoder_kernel(%arg0: i32, %arg1: memref<1x16x4xf32, #tpu.memory_space<vmem>>, %arg2: memref<3x8x16xf32, #tpu.memory_space<vmem>>, %arg3: memref<3x4x32xf32, #tpu.memory_space<vmem>>, %arg4: memref<1x32xf32, #tpu.memory_space<vmem>>, %arg5: memref<1x32xf32, #tpu.memory_space<vmem>>, %arg6: memref<1x32xf32, #tpu.memory_space<vmem>>, %arg7: memref<3x4x8xf32, #tpu.memory_space<vmem>>, %arg8: memref<3x32x32xf32, #tpu.memory_space<vmem>>, %arg9: memref<1x32xf32, #tpu.memory_space<vmem>>, %arg10: memref<1x32xf32, #tpu.memory_space<vmem>>, %arg11: memref<1x32xf32, #tpu.memory_space<vmem>>, %arg12: memref<4x32xf32, #tpu.memory_space<vmem>>, %arg13: memref<2x32x96xf32, #tpu.memory_space<vmem>>, %arg14: memref<2x1x96xf32, #tpu.memory_space<vmem>>, %arg15: memref<2x32x32xf32, #tpu.memory_space<vmem>>, %arg16: memref<2x1x32xf32, #tpu.memory_space<vmem>>, %arg17: memref<2x32x64xf32, #tpu.memory_space<vmem>>, %arg18: memref<2x1x64xf32, #tpu.memory_space<vmem>>, %arg19: memref<2x64x32xf32, #tpu.memory_space<vmem>>, %arg20: memref<2x1x32xf32, #tpu.memory_space<vmem>>, %arg21: memref<2x1x32xf32, #tpu.memory_space<vmem>>, %arg22: memref<2x1x32xf32, #tpu.memory_space<vmem>>, %arg23: memref<2x1x32xf32, #tpu.memory_space<vmem>>, %arg24: memref<2x1x32xf32, #tpu.memory_space<vmem>>, %arg25: memref<1x1x32xf32, #tpu.memory_space<vmem>>) attributes {dimension_semantics = [#tpu.dimension_semantics<parallel>], iteration_bounds = array<i64: 2>, scalar_prefetch = 0 : i64, scratch_operands = 0 : i64, tpu.core_type = #tpu.core_type<tc>, window_params = [{transform_indices = @transform_0, window_bounds = array<i64: 1, 16, 4>}, {pipeline_mode = #tpu.pipeline_mode<synchronous>, transform_indices = @transform_1, window_bounds = array<i64: 3, 8, 16>}, {pipeline_mode = #tpu.pipeline_mode<synchronous>, transform_indices = @transform_2, window_bounds = array<i64: 3, 4, 32>}, {pipeline_mode = #tpu.pipeline_mode<synchronous>, transform_indices = @transform_3, window_bounds = array<i64: 1, 32>}, {pipeline_mode = #tpu.pipeline_mode<synchronous>, transform_indices = @transform_4, window_bounds = array<i64: 1, 32>}, {pipeline_mode = #tpu.pipeline_mode<synchronous>, transform_indices = @transform_5, window_bounds = array<i64: 1, 32>}, {pipeline_mode = #tpu.pipeline_mode<synchronous>, transform_indices = @transform_6, window_bounds = array<i64: 3, 4, 8>}, {pipeline_mode = #tpu.pipeline_mode<synchronous>, transform_indices = @transform_7, window_bounds = array<i64: 3, 32, 32>}, {pipeline_mode = #tpu.pipeline_mode<synchronous>, transform_indices = @transform_8, window_bounds = array<i64: 1, 32>}, {pipeline_mode = #tpu.pipeline_mode<synchronous>, transform_indices = @transform_9, window_bounds = array<i64: 1, 32>}, {pipeline_mode = #tpu.pipeline_mode<synchronous>, transform_indices = @transform_10, window_bounds = array<i64: 1, 32>}, {pipeline_mode = #tpu.pipeline_mode<synchronous>, transform_indices = @transform_11, window_bounds = array<i64: 4, 32>}, {pipeline_mode = #tpu.pipeline_mode<synchronous>, transform_indices = @transform_12, window_bounds = array<i64: 2, 32, 96>}, {pipeline_mode = #tpu.pipeline_mode<synchronous>, transform_indices = @transform_13, window_bounds = array<i64: 2, 1, 96>}, {pipeline_mode = #tpu.pipeline_mode<synchronous>, transform_indices = @transform_14, window_bounds = array<i64: 2, 32, 32>}, {pipeline_mode = #tpu.pipeline_mode<synchronous>, transform_indices = @transform_15, window_bounds = array<i64: 2, 1, 32>}, {pipeline_mode = #tpu.pipeline_mode<synchronous>, transform_indices = @transform_16, window_bounds = array<i64: 2, 32, 64>}, {pipeline_mode = #tpu.pipeline_mode<synchronous>, transform_indices = @transform_17, window_bounds = array<i64: 2, 1, 64>}, {pipeline_mode = #tpu.pipeline_mode<synchronous>, transform_indices = @transform_18, window_bounds = array<i64: 2, 64, 32>}, {pipeline_mode = #tpu.pipeline_mode<synchronous>, transform_indices = @transform_19, window_bounds = array<i64: 2, 1, 32>}, {pipeline_mode = #tpu.pipeline_mode<synchronous>, transform_indices = @transform_20, window_bounds = array<i64: 2, 1, 32>}, {pipeline_mode = #tpu.pipeline_mode<synchronous>, transform_indices = @transform_21, window_bounds = array<i64: 2, 1, 32>}, {pipeline_mode = #tpu.pipeline_mode<synchronous>, transform_indices = @transform_22, window_bounds = array<i64: 2, 1, 32>}, {pipeline_mode = #tpu.pipeline_mode<synchronous>, transform_indices = @transform_23, window_bounds = array<i64: 2, 1, 32>}, {transform_indices = @transform_24, window_bounds = array<i64: 1, 1, 32>}]} {
    %c0 = arith.constant 0 : index
    %c0_0 = arith.constant 0 : index
    %c0_1 = arith.constant 0 : index
    %0 = vector.load %arg1[%c0, %c0_0, %c0_1] : memref<1x16x4xf32, #tpu.memory_space<vmem>>, vector<1x16x4xf32>
    %1 = vector.shape_cast %0 : vector<1x16x4xf32> to vector<16x4xf32>
    %c0_2 = arith.constant 0 : index
    %c0_3 = arith.constant 0 : index
    %c0_4 = arith.constant 0 : index
    %2 = vector.load %arg2[%c0_2, %c0_3, %c0_4] : memref<3x8x16xf32, #tpu.memory_space<vmem>>, vector<1x8x16xf32>
    %3 = vector.shape_cast %2 : vector<1x8x16xf32> to vector<8x16xf32>
    %cst = arith.constant dense<0.000000e+00> : vector<8x4xf32>
    %4 = tpu.matmul %3, %1, %cst {dimension_numbers = #tpu.dot_dimension_numbers<[1], [0], [0], [1], [0, 0, 1, 1], [], []>} : vector<8x16xf32>, vector<16x4xf32>, vector<8x4xf32> -> vector<8x4xf32>
    %c0_5 = arith.constant 0 : index
    %c0_6 = arith.constant 0 : index
    %c0_7 = arith.constant 0 : index
    %5 = vector.load %arg3[%c0_5, %c0_6, %c0_7] : memref<3x4x32xf32, #tpu.memory_space<vmem>>, vector<1x4x32xf32>
    %6 = vector.shape_cast %5 : vector<1x4x32xf32> to vector<4x32xf32>
    %cst_8 = arith.constant dense<0.000000e+00> : vector<8x32xf32>
    %7 = tpu.matmul %4, %6, %cst_8 {dimension_numbers = #tpu.dot_dimension_numbers<[1], [0], [0], [1], [0, 0, 1, 1], [], []>} : vector<8x4xf32>, vector<4x32xf32>, vector<8x32xf32> -> vector<8x32xf32>
    %c1 = arith.constant 1 : index
    %c0_9 = arith.constant 0 : index
    %c0_10 = arith.constant 0 : index
    %8 = vector.load %arg2[%c1, %c0_9, %c0_10] : memref<3x8x16xf32, #tpu.memory_space<vmem>>, vector<1x8x16xf32>
    %9 = vector.shape_cast %8 : vector<1x8x16xf32> to vector<8x16xf32>
    %cst_11 = arith.constant dense<0.000000e+00> : vector<8x4xf32>
    %10 = tpu.matmul %9, %1, %cst_11 {dimension_numbers = #tpu.dot_dimension_numbers<[1], [0], [0], [1], [0, 0, 1, 1], [], []>} : vector<8x16xf32>, vector<16x4xf32>, vector<8x4xf32> -> vector<8x4xf32>
    %c1_12 = arith.constant 1 : index
    %c0_13 = arith.constant 0 : index
    %c0_14 = arith.constant 0 : index
    %11 = vector.load %arg3[%c1_12, %c0_13, %c0_14] : memref<3x4x32xf32, #tpu.memory_space<vmem>>, vector<1x4x32xf32>
    %12 = vector.shape_cast %11 : vector<1x4x32xf32> to vector<4x32xf32>
    %cst_15 = arith.constant dense<0.000000e+00> : vector<8x32xf32>
    %13 = tpu.matmul %10, %12, %cst_15 {dimension_numbers = #tpu.dot_dimension_numbers<[1], [0], [0], [1], [0, 0, 1, 1], [], []>} : vector<8x4xf32>, vector<4x32xf32>, vector<8x32xf32> -> vector<8x32xf32>
    %14 = arith.addf %7, %13 : vector<8x32xf32>
    %c2 = arith.constant 2 : index
    %c0_16 = arith.constant 0 : index
    %c0_17 = arith.constant 0 : index
    %15 = vector.load %arg2[%c2, %c0_16, %c0_17] : memref<3x8x16xf32, #tpu.memory_space<vmem>>, vector<1x8x16xf32>
    %16 = vector.shape_cast %15 : vector<1x8x16xf32> to vector<8x16xf32>
    %cst_18 = arith.constant dense<0.000000e+00> : vector<8x4xf32>
    %17 = tpu.matmul %16, %1, %cst_18 {dimension_numbers = #tpu.dot_dimension_numbers<[1], [0], [0], [1], [0, 0, 1, 1], [], []>} : vector<8x16xf32>, vector<16x4xf32>, vector<8x4xf32> -> vector<8x4xf32>
    %c2_19 = arith.constant 2 : index
    %c0_20 = arith.constant 0 : index
    %c0_21 = arith.constant 0 : index
    %18 = vector.load %arg3[%c2_19, %c0_20, %c0_21] : memref<3x4x32xf32, #tpu.memory_space<vmem>>, vector<1x4x32xf32>
    %19 = vector.shape_cast %18 : vector<1x4x32xf32> to vector<4x32xf32>
    %cst_22 = arith.constant dense<0.000000e+00> : vector<8x32xf32>
    %20 = tpu.matmul %17, %19, %cst_22 {dimension_numbers = #tpu.dot_dimension_numbers<[1], [0], [0], [1], [0, 0, 1, 1], [], []>} : vector<8x4xf32>, vector<4x32xf32>, vector<8x32xf32> -> vector<8x32xf32>
    %21 = arith.addf %14, %20 : vector<8x32xf32>
    %c0_23 = arith.constant 0 : index
    %c0_24 = arith.constant 0 : index
    %22 = vector.load %arg4[%c0_23, %c0_24] : memref<1x32xf32, #tpu.memory_space<vmem>>, vector<1x32xf32>
    %23 = vector.broadcast %22 : vector<1x32xf32> to vector<8x32xf32>
    %24 = arith.addf %21, %23 : vector<8x32xf32>
    %c0_25 = arith.constant 0 : index
    %c0_26 = arith.constant 0 : index
    %25 = vector.load %arg5[%c0_25, %c0_26] : memref<1x32xf32, #tpu.memory_space<vmem>>, vector<1x32xf32>
    %c0_27 = arith.constant 0 : index
    %c0_28 = arith.constant 0 : index
    %26 = vector.load %arg6[%c0_27, %c0_28] : memref<1x32xf32, #tpu.memory_space<vmem>>, vector<1x32xf32>
    %cst_29 = arith.constant dense<0.000000e+00> : vector<8xf32>
    %27 = vector.multi_reduction <add>, %24, %cst_29 [1] : vector<8x32xf32> to vector<8xf32>
    %28 = vector.shape_cast %27 : vector<8xf32> to vector<8x1xf32>
    %cst_30 = arith.constant 3.200000e+01 : f32
    %29 = vector.broadcast %cst_30 : f32 to vector<8x1xf32>
    %30 = arith.divf %28, %29 : vector<8x1xf32>
    %31 = vector.broadcast %30 : vector<8x1xf32> to vector<8x32xf32>
    %32 = arith.subf %24, %31 : vector<8x32xf32>
    %33 = arith.mulf %32, %32 : vector<8x32xf32>
    %cst_31 = arith.constant dense<0.000000e+00> : vector<8xf32>
    %34 = vector.multi_reduction <add>, %33, %cst_31 [1] : vector<8x32xf32> to vector<8xf32>
    %35 = vector.shape_cast %34 : vector<8xf32> to vector<8x1xf32>
    %cst_32 = arith.constant 3.100000e+01 : f32
    %36 = vector.broadcast %cst_32 : f32 to vector<8x1xf32>
    %37 = arith.divf %35, %36 : vector<8x1xf32>
    %cst_33 = arith.constant 9.99999974E-6 : f32
    %38 = vector.broadcast %cst_33 : f32 to vector<8x1xf32>
    %39 = arith.addf %37, %38 : vector<8x1xf32>
    %40 = math.rsqrt %39 : vector<8x1xf32>
    %41 = vector.broadcast %40 : vector<8x1xf32> to vector<8x32xf32>
    %42 = arith.mulf %32, %41 : vector<8x32xf32>
    %43 = vector.broadcast %25 : vector<1x32xf32> to vector<8x32xf32>
    %44 = arith.mulf %42, %43 : vector<8x32xf32>
    %45 = vector.broadcast %26 : vector<1x32xf32> to vector<8x32xf32>
    %46 = arith.addf %44, %45 : vector<8x32xf32>
    %cst_34 = arith.constant 0.000000e+00 : f32
    %47 = vector.broadcast %cst_34 : f32 to vector<8x32xf32>
    %48 = arith.maximumf %46, %47 : vector<8x32xf32>
    %c0_35 = arith.constant 0 : index
    %c0_36 = arith.constant 0 : index
    %c0_37 = arith.constant 0 : index
    %49 = vector.load %arg7[%c0_35, %c0_36, %c0_37] : memref<3x4x8xf32, #tpu.memory_space<vmem>>, vector<1x4x8xf32>
    %50 = vector.shape_cast %49 : vector<1x4x8xf32> to vector<4x8xf32>
    %cst_38 = arith.constant dense<0.000000e+00> : vector<4x32xf32>
    %51 = tpu.matmul %50, %48, %cst_38 {dimension_numbers = #tpu.dot_dimension_numbers<[1], [0], [0], [1], [0, 0, 1, 1], [], []>} : vector<4x8xf32>, vector<8x32xf32>, vector<4x32xf32> -> vector<4x32xf32>
    %c0_39 = arith.constant 0 : index
    %c0_40 = arith.constant 0 : index
    %c0_41 = arith.constant 0 : index
    %52 = vector.load %arg8[%c0_39, %c0_40, %c0_41] : memref<3x32x32xf32, #tpu.memory_space<vmem>>, vector<1x32x32xf32>
    %53 = vector.shape_cast %52 : vector<1x32x32xf32> to vector<32x32xf32>
    %cst_42 = arith.constant dense<0.000000e+00> : vector<4x32xf32>
    %54 = tpu.matmul %51, %53, %cst_42 {dimension_numbers = #tpu.dot_dimension_numbers<[1], [0], [0], [1], [0, 0, 1, 1], [], []>} : vector<4x32xf32>, vector<32x32xf32>, vector<4x32xf32> -> vector<4x32xf32>
    %c1_43 = arith.constant 1 : index
    %c0_44 = arith.constant 0 : index
    %c0_45 = arith.constant 0 : index
    %55 = vector.load %arg7[%c1_43, %c0_44, %c0_45] : memref<3x4x8xf32, #tpu.memory_space<vmem>>, vector<1x4x8xf32>
    %56 = vector.shape_cast %55 : vector<1x4x8xf32> to vector<4x8xf32>
    %cst_46 = arith.constant dense<0.000000e+00> : vector<4x32xf32>
    %57 = tpu.matmul %56, %48, %cst_46 {dimension_numbers = #tpu.dot_dimension_numbers<[1], [0], [0], [1], [0, 0, 1, 1], [], []>} : vector<4x8xf32>, vector<8x32xf32>, vector<4x32xf32> -> vector<4x32xf32>
    %c1_47 = arith.constant 1 : index
    %c0_48 = arith.constant 0 : index
    %c0_49 = arith.constant 0 : index
    %58 = vector.load %arg8[%c1_47, %c0_48, %c0_49] : memref<3x32x32xf32, #tpu.memory_space<vmem>>, vector<1x32x32xf32>
    %59 = vector.shape_cast %58 : vector<1x32x32xf32> to vector<32x32xf32>
    %cst_50 = arith.constant dense<0.000000e+00> : vector<4x32xf32>
    %60 = tpu.matmul %57, %59, %cst_50 {dimension_numbers = #tpu.dot_dimension_numbers<[1], [0], [0], [1], [0, 0, 1, 1], [], []>} : vector<4x32xf32>, vector<32x32xf32>, vector<4x32xf32> -> vector<4x32xf32>
    %61 = arith.addf %54, %60 : vector<4x32xf32>
    %c2_51 = arith.constant 2 : index
    %c0_52 = arith.constant 0 : index
    %c0_53 = arith.constant 0 : index
    %62 = vector.load %arg7[%c2_51, %c0_52, %c0_53] : memref<3x4x8xf32, #tpu.memory_space<vmem>>, vector<1x4x8xf32>
    %63 = vector.shape_cast %62 : vector<1x4x8xf32> to vector<4x8xf32>
    %cst_54 = arith.constant dense<0.000000e+00> : vector<4x32xf32>
    %64 = tpu.matmul %63, %48, %cst_54 {dimension_numbers = #tpu.dot_dimension_numbers<[1], [0], [0], [1], [0, 0, 1, 1], [], []>} : vector<4x8xf32>, vector<8x32xf32>, vector<4x32xf32> -> vector<4x32xf32>
    %c2_55 = arith.constant 2 : index
    %c0_56 = arith.constant 0 : index
    %c0_57 = arith.constant 0 : index
    %65 = vector.load %arg8[%c2_55, %c0_56, %c0_57] : memref<3x32x32xf32, #tpu.memory_space<vmem>>, vector<1x32x32xf32>
    %66 = vector.shape_cast %65 : vector<1x32x32xf32> to vector<32x32xf32>
    %cst_58 = arith.constant dense<0.000000e+00> : vector<4x32xf32>
    %67 = tpu.matmul %64, %66, %cst_58 {dimension_numbers = #tpu.dot_dimension_numbers<[1], [0], [0], [1], [0, 0, 1, 1], [], []>} : vector<4x32xf32>, vector<32x32xf32>, vector<4x32xf32> -> vector<4x32xf32>
    %68 = arith.addf %61, %67 : vector<4x32xf32>
    %c0_59 = arith.constant 0 : index
    %c0_60 = arith.constant 0 : index
    %69 = vector.load %arg9[%c0_59, %c0_60] : memref<1x32xf32, #tpu.memory_space<vmem>>, vector<1x32xf32>
    %70 = vector.broadcast %69 : vector<1x32xf32> to vector<4x32xf32>
    %71 = arith.addf %68, %70 : vector<4x32xf32>
    %c0_61 = arith.constant 0 : index
    %c0_62 = arith.constant 0 : index
    %72 = vector.load %arg10[%c0_61, %c0_62] : memref<1x32xf32, #tpu.memory_space<vmem>>, vector<1x32xf32>
    %c0_63 = arith.constant 0 : index
    %c0_64 = arith.constant 0 : index
    %73 = vector.load %arg11[%c0_63, %c0_64] : memref<1x32xf32, #tpu.memory_space<vmem>>, vector<1x32xf32>
    %cst_65 = arith.constant dense<0.000000e+00> : vector<4xf32>
    %74 = vector.multi_reduction <add>, %71, %cst_65 [1] : vector<4x32xf32> to vector<4xf32>
    %75 = vector.shape_cast %74 : vector<4xf32> to vector<4x1xf32>
    %cst_66 = arith.constant 3.200000e+01 : f32
    %76 = vector.broadcast %cst_66 : f32 to vector<4x1xf32>
    %77 = arith.divf %75, %76 : vector<4x1xf32>
    %78 = vector.broadcast %77 : vector<4x1xf32> to vector<4x32xf32>
    %79 = arith.subf %71, %78 : vector<4x32xf32>
    %80 = arith.mulf %79, %79 : vector<4x32xf32>
    %cst_67 = arith.constant dense<0.000000e+00> : vector<4xf32>
    %81 = vector.multi_reduction <add>, %80, %cst_67 [1] : vector<4x32xf32> to vector<4xf32>
    %82 = vector.shape_cast %81 : vector<4xf32> to vector<4x1xf32>
    %cst_68 = arith.constant 3.100000e+01 : f32
    %83 = vector.broadcast %cst_68 : f32 to vector<4x1xf32>
    %84 = arith.divf %82, %83 : vector<4x1xf32>
    %cst_69 = arith.constant 9.99999974E-6 : f32
    %85 = vector.broadcast %cst_69 : f32 to vector<4x1xf32>
    %86 = arith.addf %84, %85 : vector<4x1xf32>
    %87 = math.rsqrt %86 : vector<4x1xf32>
    %88 = vector.broadcast %87 : vector<4x1xf32> to vector<4x32xf32>
    %89 = arith.mulf %79, %88 : vector<4x32xf32>
    %90 = vector.broadcast %72 : vector<1x32xf32> to vector<4x32xf32>
    %91 = arith.mulf %89, %90 : vector<4x32xf32>
    %92 = vector.broadcast %73 : vector<1x32xf32> to vector<4x32xf32>
    %93 = arith.addf %91, %92 : vector<4x32xf32>
    %cst_70 = arith.constant 0.000000e+00 : f32
    %94 = vector.broadcast %cst_70 : f32 to vector<4x32xf32>
    %95 = arith.maximumf %93, %94 : vector<4x32xf32>
    %c0_71 = arith.constant 0 : index
    %c0_72 = arith.constant 0 : index
    %96 = vector.load %arg12[%c0_71, %c0_72] : memref<4x32xf32, #tpu.memory_space<vmem>>, vector<4x32xf32>
    %97 = arith.addf %95, %96 : vector<4x32xf32>
    %c0_73 = arith.constant 0 : index
    %c0_74 = arith.constant 0 : index
    %c0_75 = arith.constant 0 : index
    %98 = vector.load %arg13[%c0_73, %c0_74, %c0_75] : memref<2x32x96xf32, #tpu.memory_space<vmem>>, vector<1x32x96xf32>
    %99 = vector.shape_cast %98 : vector<1x32x96xf32> to vector<32x96xf32>
    %cst_76 = arith.constant dense<0.000000e+00> : vector<4x96xf32>
    %100 = tpu.matmul %97, %99, %cst_76 {dimension_numbers = #tpu.dot_dimension_numbers<[1], [0], [0], [1], [0, 0, 1, 1], [], []>} : vector<4x32xf32>, vector<32x96xf32>, vector<4x96xf32> -> vector<4x96xf32>
    %c0_77 = arith.constant 0 : index
    %c0_78 = arith.constant 0 : index
    %c0_79 = arith.constant 0 : index
    %101 = vector.load %arg14[%c0_77, %c0_78, %c0_79] : memref<2x1x96xf32, #tpu.memory_space<vmem>>, vector<1x1x96xf32>
    %102 = vector.shape_cast %101 : vector<1x1x96xf32> to vector<1x96xf32>
    %103 = vector.broadcast %102 : vector<1x96xf32> to vector<4x96xf32>
    %104 = arith.addf %100, %103 : vector<4x96xf32>
    %c0_80 = arith.constant 0 : index
    %c0_81 = arith.constant 0 : index
    %c0_82 = arith.constant 0 : index
    %105 = vector.load %arg15[%c0_80, %c0_81, %c0_82] : memref<2x32x32xf32, #tpu.memory_space<vmem>>, vector<1x32x32xf32>
    %106 = vector.shape_cast %105 : vector<1x32x32xf32> to vector<32x32xf32>
    %c0_83 = arith.constant 0 : index
    %c0_84 = arith.constant 0 : index
    %c0_85 = arith.constant 0 : index
    %107 = vector.load %arg16[%c0_83, %c0_84, %c0_85] : memref<2x1x32xf32, #tpu.memory_space<vmem>>, vector<1x1x32xf32>
    %108 = vector.shape_cast %107 : vector<1x1x32xf32> to vector<1x32xf32>
    %109 = vector.extract_strided_slice %104 {offsets = [0, 0], sizes = [4, 8], strides = [1, 1]} : vector<4x96xf32> to vector<4x8xf32>
    %cst_86 = arith.constant 0.353553385 : f32
    %110 = vector.broadcast %cst_86 : f32 to vector<4x8xf32>
    %111 = arith.mulf %109, %110 : vector<4x8xf32>
    %112 = vector.extract_strided_slice %104 {offsets = [0, 32], sizes = [4, 8], strides = [1, 1]} : vector<4x96xf32> to vector<4x8xf32>
    %113 = vector.extract_strided_slice %104 {offsets = [0, 64], sizes = [4, 8], strides = [1, 1]} : vector<4x96xf32> to vector<4x8xf32>
    %cst_87 = arith.constant dense<0.000000e+00> : vector<4x4xf32>
    %114 = tpu.matmul %111, %112, %cst_87 {dimension_numbers = #tpu.dot_dimension_numbers<[1], [1], [0], [0], [0, 0, 1, 0], [], []>} : vector<4x8xf32>, vector<4x8xf32>, vector<4x4xf32> -> vector<4x4xf32>
    %cst_88 = arith.constant dense<0xFF800000> : vector<4xf32>
    %115 = vector.multi_reduction <maximumf>, %114, %cst_88 [1] : vector<4x4xf32> to vector<4xf32>
    %116 = vector.shape_cast %115 : vector<4xf32> to vector<4x1xf32>
    %117 = vector.broadcast %116 : vector<4x1xf32> to vector<4x4xf32>
    %118 = arith.subf %114, %117 : vector<4x4xf32>
    %119 = math.exp %118 : vector<4x4xf32>
    %cst_89 = arith.constant dense<0.000000e+00> : vector<4xf32>
    %120 = vector.multi_reduction <add>, %119, %cst_89 [1] : vector<4x4xf32> to vector<4xf32>
    %121 = vector.shape_cast %120 : vector<4xf32> to vector<4x1xf32>
    %122 = tpu.reciprocal %121 {approx = true} : vector<4x1xf32> -> vector<4x1xf32>
    %123 = vector.broadcast %122 : vector<4x1xf32> to vector<4x4xf32>
    %124 = arith.mulf %119, %123 : vector<4x4xf32>
    %cst_90 = arith.constant dense<0.000000e+00> : vector<4x8xf32>
    %125 = tpu.matmul %124, %113, %cst_90 {dimension_numbers = #tpu.dot_dimension_numbers<[1], [0], [0], [1], [0, 0, 1, 1], [], []>} : vector<4x4xf32>, vector<4x8xf32>, vector<4x8xf32> -> vector<4x8xf32>
    %126 = vector.extract_strided_slice %106 {offsets = [0, 0], sizes = [8, 32], strides = [1, 1]} : vector<32x32xf32> to vector<8x32xf32>
    %cst_91 = arith.constant dense<0.000000e+00> : vector<4x32xf32>
    %127 = tpu.matmul %125, %126, %cst_91 {dimension_numbers = #tpu.dot_dimension_numbers<[1], [0], [0], [1], [0, 0, 1, 1], [], []>} : vector<4x8xf32>, vector<8x32xf32>, vector<4x32xf32> -> vector<4x32xf32>
    %128 = vector.broadcast %108 : vector<1x32xf32> to vector<4x32xf32>
    %129 = arith.addf %128, %127 : vector<4x32xf32>
    %130 = vector.extract_strided_slice %104 {offsets = [0, 8], sizes = [4, 8], strides = [1, 1]} : vector<4x96xf32> to vector<4x8xf32>
    %cst_92 = arith.constant 0.353553385 : f32
    %131 = vector.broadcast %cst_92 : f32 to vector<4x8xf32>
    %132 = arith.mulf %130, %131 : vector<4x8xf32>
    %133 = vector.extract_strided_slice %104 {offsets = [0, 40], sizes = [4, 8], strides = [1, 1]} : vector<4x96xf32> to vector<4x8xf32>
    %134 = vector.extract_strided_slice %104 {offsets = [0, 72], sizes = [4, 8], strides = [1, 1]} : vector<4x96xf32> to vector<4x8xf32>
    %cst_93 = arith.constant dense<0.000000e+00> : vector<4x4xf32>
    %135 = tpu.matmul %132, %133, %cst_93 {dimension_numbers = #tpu.dot_dimension_numbers<[1], [1], [0], [0], [0, 0, 1, 0], [], []>} : vector<4x8xf32>, vector<4x8xf32>, vector<4x4xf32> -> vector<4x4xf32>
    %cst_94 = arith.constant dense<0xFF800000> : vector<4xf32>
    %136 = vector.multi_reduction <maximumf>, %135, %cst_94 [1] : vector<4x4xf32> to vector<4xf32>
    %137 = vector.shape_cast %136 : vector<4xf32> to vector<4x1xf32>
    %138 = vector.broadcast %137 : vector<4x1xf32> to vector<4x4xf32>
    %139 = arith.subf %135, %138 : vector<4x4xf32>
    %140 = math.exp %139 : vector<4x4xf32>
    %cst_95 = arith.constant dense<0.000000e+00> : vector<4xf32>
    %141 = vector.multi_reduction <add>, %140, %cst_95 [1] : vector<4x4xf32> to vector<4xf32>
    %142 = vector.shape_cast %141 : vector<4xf32> to vector<4x1xf32>
    %143 = tpu.reciprocal %142 {approx = true} : vector<4x1xf32> -> vector<4x1xf32>
    %144 = vector.broadcast %143 : vector<4x1xf32> to vector<4x4xf32>
    %145 = arith.mulf %140, %144 : vector<4x4xf32>
    %cst_96 = arith.constant dense<0.000000e+00> : vector<4x8xf32>
    %146 = tpu.matmul %145, %134, %cst_96 {dimension_numbers = #tpu.dot_dimension_numbers<[1], [0], [0], [1], [0, 0, 1, 1], [], []>} : vector<4x4xf32>, vector<4x8xf32>, vector<4x8xf32> -> vector<4x8xf32>
    %147 = vector.extract_strided_slice %106 {offsets = [8, 0], sizes = [8, 32], strides = [1, 1]} : vector<32x32xf32> to vector<8x32xf32>
    %cst_97 = arith.constant dense<0.000000e+00> : vector<4x32xf32>
    %148 = tpu.matmul %146, %147, %cst_97 {dimension_numbers = #tpu.dot_dimension_numbers<[1], [0], [0], [1], [0, 0, 1, 1], [], []>} : vector<4x8xf32>, vector<8x32xf32>, vector<4x32xf32> -> vector<4x32xf32>
    %149 = arith.addf %129, %148 : vector<4x32xf32>
    %150 = vector.extract_strided_slice %104 {offsets = [0, 16], sizes = [4, 8], strides = [1, 1]} : vector<4x96xf32> to vector<4x8xf32>
    %cst_98 = arith.constant 0.353553385 : f32
    %151 = vector.broadcast %cst_98 : f32 to vector<4x8xf32>
    %152 = arith.mulf %150, %151 : vector<4x8xf32>
    %153 = vector.extract_strided_slice %104 {offsets = [0, 48], sizes = [4, 8], strides = [1, 1]} : vector<4x96xf32> to vector<4x8xf32>
    %154 = vector.extract_strided_slice %104 {offsets = [0, 80], sizes = [4, 8], strides = [1, 1]} : vector<4x96xf32> to vector<4x8xf32>
    %cst_99 = arith.constant dense<0.000000e+00> : vector<4x4xf32>
    %155 = tpu.matmul %152, %153, %cst_99 {dimension_numbers = #tpu.dot_dimension_numbers<[1], [1], [0], [0], [0, 0, 1, 0], [], []>} : vector<4x8xf32>, vector<4x8xf32>, vector<4x4xf32> -> vector<4x4xf32>
    %cst_100 = arith.constant dense<0xFF800000> : vector<4xf32>
    %156 = vector.multi_reduction <maximumf>, %155, %cst_100 [1] : vector<4x4xf32> to vector<4xf32>
    %157 = vector.shape_cast %156 : vector<4xf32> to vector<4x1xf32>
    %158 = vector.broadcast %157 : vector<4x1xf32> to vector<4x4xf32>
    %159 = arith.subf %155, %158 : vector<4x4xf32>
    %160 = math.exp %159 : vector<4x4xf32>
    %cst_101 = arith.constant dense<0.000000e+00> : vector<4xf32>
    %161 = vector.multi_reduction <add>, %160, %cst_101 [1] : vector<4x4xf32> to vector<4xf32>
    %162 = vector.shape_cast %161 : vector<4xf32> to vector<4x1xf32>
    %163 = tpu.reciprocal %162 {approx = true} : vector<4x1xf32> -> vector<4x1xf32>
    %164 = vector.broadcast %163 : vector<4x1xf32> to vector<4x4xf32>
    %165 = arith.mulf %160, %164 : vector<4x4xf32>
    %cst_102 = arith.constant dense<0.000000e+00> : vector<4x8xf32>
    %166 = tpu.matmul %165, %154, %cst_102 {dimension_numbers = #tpu.dot_dimension_numbers<[1], [0], [0], [1], [0, 0, 1, 1], [], []>} : vector<4x4xf32>, vector<4x8xf32>, vector<4x8xf32> -> vector<4x8xf32>
    %167 = vector.extract_strided_slice %106 {offsets = [16, 0], sizes = [8, 32], strides = [1, 1]} : vector<32x32xf32> to vector<8x32xf32>
    %cst_103 = arith.constant dense<0.000000e+00> : vector<4x32xf32>
    %168 = tpu.matmul %166, %167, %cst_103 {dimension_numbers = #tpu.dot_dimension_numbers<[1], [0], [0], [1], [0, 0, 1, 1], [], []>} : vector<4x8xf32>, vector<8x32xf32>, vector<4x32xf32> -> vector<4x32xf32>
    %169 = arith.addf %149, %168 : vector<4x32xf32>
    %170 = vector.extract_strided_slice %104 {offsets = [0, 24], sizes = [4, 8], strides = [1, 1]} : vector<4x96xf32> to vector<4x8xf32>
    %cst_104 = arith.constant 0.353553385 : f32
    %171 = vector.broadcast %cst_104 : f32 to vector<4x8xf32>
    %172 = arith.mulf %170, %171 : vector<4x8xf32>
    %173 = vector.extract_strided_slice %104 {offsets = [0, 56], sizes = [4, 8], strides = [1, 1]} : vector<4x96xf32> to vector<4x8xf32>
    %174 = vector.extract_strided_slice %104 {offsets = [0, 88], sizes = [4, 8], strides = [1, 1]} : vector<4x96xf32> to vector<4x8xf32>
    %cst_105 = arith.constant dense<0.000000e+00> : vector<4x4xf32>
    %175 = tpu.matmul %172, %173, %cst_105 {dimension_numbers = #tpu.dot_dimension_numbers<[1], [1], [0], [0], [0, 0, 1, 0], [], []>} : vector<4x8xf32>, vector<4x8xf32>, vector<4x4xf32> -> vector<4x4xf32>
    %cst_106 = arith.constant dense<0xFF800000> : vector<4xf32>
    %176 = vector.multi_reduction <maximumf>, %175, %cst_106 [1] : vector<4x4xf32> to vector<4xf32>
    %177 = vector.shape_cast %176 : vector<4xf32> to vector<4x1xf32>
    %178 = vector.broadcast %177 : vector<4x1xf32> to vector<4x4xf32>
    %179 = arith.subf %175, %178 : vector<4x4xf32>
    %180 = math.exp %179 : vector<4x4xf32>
    %cst_107 = arith.constant dense<0.000000e+00> : vector<4xf32>
    %181 = vector.multi_reduction <add>, %180, %cst_107 [1] : vector<4x4xf32> to vector<4xf32>
    %182 = vector.shape_cast %181 : vector<4xf32> to vector<4x1xf32>
    %183 = tpu.reciprocal %182 {approx = true} : vector<4x1xf32> -> vector<4x1xf32>
    %184 = vector.broadcast %183 : vector<4x1xf32> to vector<4x4xf32>
    %185 = arith.mulf %180, %184 : vector<4x4xf32>
    %cst_108 = arith.constant dense<0.000000e+00> : vector<4x8xf32>
    %186 = tpu.matmul %185, %174, %cst_108 {dimension_numbers = #tpu.dot_dimension_numbers<[1], [0], [0], [1], [0, 0, 1, 1], [], []>} : vector<4x4xf32>, vector<4x8xf32>, vector<4x8xf32> -> vector<4x8xf32>
    %187 = vector.extract_strided_slice %106 {offsets = [24, 0], sizes = [8, 32], strides = [1, 1]} : vector<32x32xf32> to vector<8x32xf32>
    %cst_109 = arith.constant dense<0.000000e+00> : vector<4x32xf32>
    %188 = tpu.matmul %186, %187, %cst_109 {dimension_numbers = #tpu.dot_dimension_numbers<[1], [0], [0], [1], [0, 0, 1, 1], [], []>} : vector<4x8xf32>, vector<8x32xf32>, vector<4x32xf32> -> vector<4x32xf32>
    %189 = arith.addf %169, %188 : vector<4x32xf32>
    %190 = arith.addf %97, %189 : vector<4x32xf32>
    %c0_110 = arith.constant 0 : index
    %c0_111 = arith.constant 0 : index
    %c0_112 = arith.constant 0 : index
    %191 = vector.load %arg21[%c0_110, %c0_111, %c0_112] : memref<2x1x32xf32, #tpu.memory_space<vmem>>, vector<1x1x32xf32>
    %192 = vector.shape_cast %191 : vector<1x1x32xf32> to vector<1x32xf32>
    %c0_113 = arith.constant 0 : index
    %c0_114 = arith.constant 0 : index
    %c0_115 = arith.constant 0 : index
    %193 = vector.load %arg22[%c0_113, %c0_114, %c0_115] : memref<2x1x32xf32, #tpu.memory_space<vmem>>, vector<1x1x32xf32>
    %194 = vector.shape_cast %193 : vector<1x1x32xf32> to vector<1x32xf32>
    %cst_116 = arith.constant dense<0.000000e+00> : vector<4xf32>
    %195 = vector.multi_reduction <add>, %190, %cst_116 [1] : vector<4x32xf32> to vector<4xf32>
    %196 = vector.shape_cast %195 : vector<4xf32> to vector<4x1xf32>
    %cst_117 = arith.constant 3.200000e+01 : f32
    %197 = vector.broadcast %cst_117 : f32 to vector<4x1xf32>
    %198 = arith.divf %196, %197 : vector<4x1xf32>
    %199 = vector.broadcast %198 : vector<4x1xf32> to vector<4x32xf32>
    %200 = arith.subf %190, %199 : vector<4x32xf32>
    %201 = arith.mulf %200, %200 : vector<4x32xf32>
    %cst_118 = arith.constant dense<0.000000e+00> : vector<4xf32>
    %202 = vector.multi_reduction <add>, %201, %cst_118 [1] : vector<4x32xf32> to vector<4xf32>
    %203 = vector.shape_cast %202 : vector<4xf32> to vector<4x1xf32>
    %cst_119 = arith.constant 3.200000e+01 : f32
    %204 = vector.broadcast %cst_119 : f32 to vector<4x1xf32>
    %205 = arith.divf %203, %204 : vector<4x1xf32>
    %cst_120 = arith.constant 9.99999996E-13 : f32
    %206 = vector.broadcast %cst_120 : f32 to vector<4x1xf32>
    %207 = arith.addf %205, %206 : vector<4x1xf32>
    %208 = math.rsqrt %207 : vector<4x1xf32>
    %209 = vector.broadcast %208 : vector<4x1xf32> to vector<4x32xf32>
    %210 = arith.mulf %200, %209 : vector<4x32xf32>
    %211 = vector.broadcast %192 : vector<1x32xf32> to vector<4x32xf32>
    %212 = arith.mulf %210, %211 : vector<4x32xf32>
    %213 = vector.broadcast %194 : vector<1x32xf32> to vector<4x32xf32>
    %214 = arith.addf %212, %213 : vector<4x32xf32>
    %c0_121 = arith.constant 0 : index
    %c0_122 = arith.constant 0 : index
    %c0_123 = arith.constant 0 : index
    %215 = vector.load %arg17[%c0_121, %c0_122, %c0_123] : memref<2x32x64xf32, #tpu.memory_space<vmem>>, vector<1x32x64xf32>
    %216 = vector.shape_cast %215 : vector<1x32x64xf32> to vector<32x64xf32>
    %cst_124 = arith.constant dense<0.000000e+00> : vector<4x64xf32>
    %217 = tpu.matmul %214, %216, %cst_124 {dimension_numbers = #tpu.dot_dimension_numbers<[1], [0], [0], [1], [0, 0, 1, 1], [], []>} : vector<4x32xf32>, vector<32x64xf32>, vector<4x64xf32> -> vector<4x64xf32>
    %c0_125 = arith.constant 0 : index
    %c0_126 = arith.constant 0 : index
    %c0_127 = arith.constant 0 : index
    %218 = vector.load %arg18[%c0_125, %c0_126, %c0_127] : memref<2x1x64xf32, #tpu.memory_space<vmem>>, vector<1x1x64xf32>
    %219 = vector.shape_cast %218 : vector<1x1x64xf32> to vector<1x64xf32>
    %220 = vector.broadcast %219 : vector<1x64xf32> to vector<4x64xf32>
    %221 = arith.addf %217, %220 : vector<4x64xf32>
    %222 = arith.mulf %221, %221 : vector<4x64xf32>
    %223 = arith.mulf %221, %222 : vector<4x64xf32>
    %cst_128 = arith.constant 4.471500e-02 : f32
    %224 = vector.broadcast %cst_128 : f32 to vector<4x64xf32>
    %225 = arith.mulf %224, %223 : vector<4x64xf32>
    %226 = arith.addf %221, %225 : vector<4x64xf32>
    %cst_129 = arith.constant 0.797884583 : f32
    %227 = vector.broadcast %cst_129 : f32 to vector<4x64xf32>
    %228 = arith.mulf %227, %226 : vector<4x64xf32>
    %229 = math.tanh %228 : vector<4x64xf32>
    %cst_130 = arith.constant 1.000000e+00 : f32
    %230 = vector.broadcast %cst_130 : f32 to vector<4x64xf32>
    %231 = arith.addf %230, %229 : vector<4x64xf32>
    %cst_131 = arith.constant 5.000000e-01 : f32
    %232 = vector.broadcast %cst_131 : f32 to vector<4x64xf32>
    %233 = arith.mulf %232, %231 : vector<4x64xf32>
    %234 = arith.mulf %221, %233 : vector<4x64xf32>
    %c0_132 = arith.constant 0 : index
    %c0_133 = arith.constant 0 : index
    %c0_134 = arith.constant 0 : index
    %235 = vector.load %arg19[%c0_132, %c0_133, %c0_134] : memref<2x64x32xf32, #tpu.memory_space<vmem>>, vector<1x64x32xf32>
    %236 = vector.shape_cast %235 : vector<1x64x32xf32> to vector<64x32xf32>
    %cst_135 = arith.constant dense<0.000000e+00> : vector<4x32xf32>
    %237 = tpu.matmul %234, %236, %cst_135 {dimension_numbers = #tpu.dot_dimension_numbers<[1], [0], [0], [1], [0, 0, 1, 1], [], []>} : vector<4x64xf32>, vector<64x32xf32>, vector<4x32xf32> -> vector<4x32xf32>
    %c0_136 = arith.constant 0 : index
    %c0_137 = arith.constant 0 : index
    %c0_138 = arith.constant 0 : index
    %238 = vector.load %arg20[%c0_136, %c0_137, %c0_138] : memref<2x1x32xf32, #tpu.memory_space<vmem>>, vector<1x1x32xf32>
    %239 = vector.shape_cast %238 : vector<1x1x32xf32> to vector<1x32xf32>
    %240 = vector.broadcast %239 : vector<1x32xf32> to vector<4x32xf32>
    %241 = arith.addf %237, %240 : vector<4x32xf32>
    %242 = arith.addf %214, %241 : vector<4x32xf32>
    %c0_139 = arith.constant 0 : index
    %c0_140 = arith.constant 0 : index
    %c0_141 = arith.constant 0 : index
    %243 = vector.load %arg23[%c0_139, %c0_140, %c0_141] : memref<2x1x32xf32, #tpu.memory_space<vmem>>, vector<1x1x32xf32>
    %244 = vector.shape_cast %243 : vector<1x1x32xf32> to vector<1x32xf32>
    %c0_142 = arith.constant 0 : index
    %c0_143 = arith.constant 0 : index
    %c0_144 = arith.constant 0 : index
    %245 = vector.load %arg24[%c0_142, %c0_143, %c0_144] : memref<2x1x32xf32, #tpu.memory_space<vmem>>, vector<1x1x32xf32>
    %246 = vector.shape_cast %245 : vector<1x1x32xf32> to vector<1x32xf32>
    %cst_145 = arith.constant dense<0.000000e+00> : vector<4xf32>
    %247 = vector.multi_reduction <add>, %242, %cst_145 [1] : vector<4x32xf32> to vector<4xf32>
    %248 = vector.shape_cast %247 : vector<4xf32> to vector<4x1xf32>
    %cst_146 = arith.constant 3.200000e+01 : f32
    %249 = vector.broadcast %cst_146 : f32 to vector<4x1xf32>
    %250 = arith.divf %248, %249 : vector<4x1xf32>
    %251 = vector.broadcast %250 : vector<4x1xf32> to vector<4x32xf32>
    %252 = arith.subf %242, %251 : vector<4x32xf32>
    %253 = arith.mulf %252, %252 : vector<4x32xf32>
    %cst_147 = arith.constant dense<0.000000e+00> : vector<4xf32>
    %254 = vector.multi_reduction <add>, %253, %cst_147 [1] : vector<4x32xf32> to vector<4xf32>
    %255 = vector.shape_cast %254 : vector<4xf32> to vector<4x1xf32>
    %cst_148 = arith.constant 3.200000e+01 : f32
    %256 = vector.broadcast %cst_148 : f32 to vector<4x1xf32>
    %257 = arith.divf %255, %256 : vector<4x1xf32>
    %cst_149 = arith.constant 9.99999996E-13 : f32
    %258 = vector.broadcast %cst_149 : f32 to vector<4x1xf32>
    %259 = arith.addf %257, %258 : vector<4x1xf32>
    %260 = math.rsqrt %259 : vector<4x1xf32>
    %261 = vector.broadcast %260 : vector<4x1xf32> to vector<4x32xf32>
    %262 = arith.mulf %252, %261 : vector<4x32xf32>
    %263 = vector.broadcast %244 : vector<1x32xf32> to vector<4x32xf32>
    %264 = arith.mulf %262, %263 : vector<4x32xf32>
    %265 = vector.broadcast %246 : vector<1x32xf32> to vector<4x32xf32>
    %266 = arith.addf %264, %265 : vector<4x32xf32>
    %c1_150 = arith.constant 1 : index
    %c0_151 = arith.constant 0 : index
    %c0_152 = arith.constant 0 : index
    %267 = vector.load %arg13[%c1_150, %c0_151, %c0_152] : memref<2x32x96xf32, #tpu.memory_space<vmem>>, vector<1x32x96xf32>
    %268 = vector.shape_cast %267 : vector<1x32x96xf32> to vector<32x96xf32>
    %cst_153 = arith.constant dense<0.000000e+00> : vector<4x96xf32>
    %269 = tpu.matmul %266, %268, %cst_153 {dimension_numbers = #tpu.dot_dimension_numbers<[1], [0], [0], [1], [0, 0, 1, 1], [], []>} : vector<4x32xf32>, vector<32x96xf32>, vector<4x96xf32> -> vector<4x96xf32>
    %c1_154 = arith.constant 1 : index
    %c0_155 = arith.constant 0 : index
    %c0_156 = arith.constant 0 : index
    %270 = vector.load %arg14[%c1_154, %c0_155, %c0_156] : memref<2x1x96xf32, #tpu.memory_space<vmem>>, vector<1x1x96xf32>
    %271 = vector.shape_cast %270 : vector<1x1x96xf32> to vector<1x96xf32>
    %272 = vector.broadcast %271 : vector<1x96xf32> to vector<4x96xf32>
    %273 = arith.addf %269, %272 : vector<4x96xf32>
    %c1_157 = arith.constant 1 : index
    %c0_158 = arith.constant 0 : index
    %c0_159 = arith.constant 0 : index
    %274 = vector.load %arg15[%c1_157, %c0_158, %c0_159] : memref<2x32x32xf32, #tpu.memory_space<vmem>>, vector<1x32x32xf32>
    %275 = vector.shape_cast %274 : vector<1x32x32xf32> to vector<32x32xf32>
    %c1_160 = arith.constant 1 : index
    %c0_161 = arith.constant 0 : index
    %c0_162 = arith.constant 0 : index
    %276 = vector.load %arg16[%c1_160, %c0_161, %c0_162] : memref<2x1x32xf32, #tpu.memory_space<vmem>>, vector<1x1x32xf32>
    %277 = vector.shape_cast %276 : vector<1x1x32xf32> to vector<1x32xf32>
    %278 = vector.extract_strided_slice %273 {offsets = [0, 0], sizes = [4, 8], strides = [1, 1]} : vector<4x96xf32> to vector<4x8xf32>
    %cst_163 = arith.constant 0.353553385 : f32
    %279 = vector.broadcast %cst_163 : f32 to vector<4x8xf32>
    %280 = arith.mulf %278, %279 : vector<4x8xf32>
    %281 = vector.extract_strided_slice %273 {offsets = [0, 32], sizes = [4, 8], strides = [1, 1]} : vector<4x96xf32> to vector<4x8xf32>
    %282 = vector.extract_strided_slice %273 {offsets = [0, 64], sizes = [4, 8], strides = [1, 1]} : vector<4x96xf32> to vector<4x8xf32>
    %cst_164 = arith.constant dense<0.000000e+00> : vector<4x4xf32>
    %283 = tpu.matmul %280, %281, %cst_164 {dimension_numbers = #tpu.dot_dimension_numbers<[1], [1], [0], [0], [0, 0, 1, 0], [], []>} : vector<4x8xf32>, vector<4x8xf32>, vector<4x4xf32> -> vector<4x4xf32>
    %cst_165 = arith.constant dense<0xFF800000> : vector<4xf32>
    %284 = vector.multi_reduction <maximumf>, %283, %cst_165 [1] : vector<4x4xf32> to vector<4xf32>
    %285 = vector.shape_cast %284 : vector<4xf32> to vector<4x1xf32>
    %286 = vector.broadcast %285 : vector<4x1xf32> to vector<4x4xf32>
    %287 = arith.subf %283, %286 : vector<4x4xf32>
    %288 = math.exp %287 : vector<4x4xf32>
    %cst_166 = arith.constant dense<0.000000e+00> : vector<4xf32>
    %289 = vector.multi_reduction <add>, %288, %cst_166 [1] : vector<4x4xf32> to vector<4xf32>
    %290 = vector.shape_cast %289 : vector<4xf32> to vector<4x1xf32>
    %291 = tpu.reciprocal %290 {approx = true} : vector<4x1xf32> -> vector<4x1xf32>
    %292 = vector.broadcast %291 : vector<4x1xf32> to vector<4x4xf32>
    %293 = arith.mulf %288, %292 : vector<4x4xf32>
    %cst_167 = arith.constant dense<0.000000e+00> : vector<4x8xf32>
    %294 = tpu.matmul %293, %282, %cst_167 {dimension_numbers = #tpu.dot_dimension_numbers<[1], [0], [0], [1], [0, 0, 1, 1], [], []>} : vector<4x4xf32>, vector<4x8xf32>, vector<4x8xf32> -> vector<4x8xf32>
    %295 = vector.extract_strided_slice %275 {offsets = [0, 0], sizes = [8, 32], strides = [1, 1]} : vector<32x32xf32> to vector<8x32xf32>
    %cst_168 = arith.constant dense<0.000000e+00> : vector<4x32xf32>
    %296 = tpu.matmul %294, %295, %cst_168 {dimension_numbers = #tpu.dot_dimension_numbers<[1], [0], [0], [1], [0, 0, 1, 1], [], []>} : vector<4x8xf32>, vector<8x32xf32>, vector<4x32xf32> -> vector<4x32xf32>
    %297 = vector.broadcast %277 : vector<1x32xf32> to vector<4x32xf32>
    %298 = arith.addf %297, %296 : vector<4x32xf32>
    %299 = vector.extract_strided_slice %273 {offsets = [0, 8], sizes = [4, 8], strides = [1, 1]} : vector<4x96xf32> to vector<4x8xf32>
    %cst_169 = arith.constant 0.353553385 : f32
    %300 = vector.broadcast %cst_169 : f32 to vector<4x8xf32>
    %301 = arith.mulf %299, %300 : vector<4x8xf32>
    %302 = vector.extract_strided_slice %273 {offsets = [0, 40], sizes = [4, 8], strides = [1, 1]} : vector<4x96xf32> to vector<4x8xf32>
    %303 = vector.extract_strided_slice %273 {offsets = [0, 72], sizes = [4, 8], strides = [1, 1]} : vector<4x96xf32> to vector<4x8xf32>
    %cst_170 = arith.constant dense<0.000000e+00> : vector<4x4xf32>
    %304 = tpu.matmul %301, %302, %cst_170 {dimension_numbers = #tpu.dot_dimension_numbers<[1], [1], [0], [0], [0, 0, 1, 0], [], []>} : vector<4x8xf32>, vector<4x8xf32>, vector<4x4xf32> -> vector<4x4xf32>
    %cst_171 = arith.constant dense<0xFF800000> : vector<4xf32>
    %305 = vector.multi_reduction <maximumf>, %304, %cst_171 [1] : vector<4x4xf32> to vector<4xf32>
    %306 = vector.shape_cast %305 : vector<4xf32> to vector<4x1xf32>
    %307 = vector.broadcast %306 : vector<4x1xf32> to vector<4x4xf32>
    %308 = arith.subf %304, %307 : vector<4x4xf32>
    %309 = math.exp %308 : vector<4x4xf32>
    %cst_172 = arith.constant dense<0.000000e+00> : vector<4xf32>
    %310 = vector.multi_reduction <add>, %309, %cst_172 [1] : vector<4x4xf32> to vector<4xf32>
    %311 = vector.shape_cast %310 : vector<4xf32> to vector<4x1xf32>
    %312 = tpu.reciprocal %311 {approx = true} : vector<4x1xf32> -> vector<4x1xf32>
    %313 = vector.broadcast %312 : vector<4x1xf32> to vector<4x4xf32>
    %314 = arith.mulf %309, %313 : vector<4x4xf32>
    %cst_173 = arith.constant dense<0.000000e+00> : vector<4x8xf32>
    %315 = tpu.matmul %314, %303, %cst_173 {dimension_numbers = #tpu.dot_dimension_numbers<[1], [0], [0], [1], [0, 0, 1, 1], [], []>} : vector<4x4xf32>, vector<4x8xf32>, vector<4x8xf32> -> vector<4x8xf32>
    %316 = vector.extract_strided_slice %275 {offsets = [8, 0], sizes = [8, 32], strides = [1, 1]} : vector<32x32xf32> to vector<8x32xf32>
    %cst_174 = arith.constant dense<0.000000e+00> : vector<4x32xf32>
    %317 = tpu.matmul %315, %316, %cst_174 {dimension_numbers = #tpu.dot_dimension_numbers<[1], [0], [0], [1], [0, 0, 1, 1], [], []>} : vector<4x8xf32>, vector<8x32xf32>, vector<4x32xf32> -> vector<4x32xf32>
    %318 = arith.addf %298, %317 : vector<4x32xf32>
    %319 = vector.extract_strided_slice %273 {offsets = [0, 16], sizes = [4, 8], strides = [1, 1]} : vector<4x96xf32> to vector<4x8xf32>
    %cst_175 = arith.constant 0.353553385 : f32
    %320 = vector.broadcast %cst_175 : f32 to vector<4x8xf32>
    %321 = arith.mulf %319, %320 : vector<4x8xf32>
    %322 = vector.extract_strided_slice %273 {offsets = [0, 48], sizes = [4, 8], strides = [1, 1]} : vector<4x96xf32> to vector<4x8xf32>
    %323 = vector.extract_strided_slice %273 {offsets = [0, 80], sizes = [4, 8], strides = [1, 1]} : vector<4x96xf32> to vector<4x8xf32>
    %cst_176 = arith.constant dense<0.000000e+00> : vector<4x4xf32>
    %324 = tpu.matmul %321, %322, %cst_176 {dimension_numbers = #tpu.dot_dimension_numbers<[1], [1], [0], [0], [0, 0, 1, 0], [], []>} : vector<4x8xf32>, vector<4x8xf32>, vector<4x4xf32> -> vector<4x4xf32>
    %cst_177 = arith.constant dense<0xFF800000> : vector<4xf32>
    %325 = vector.multi_reduction <maximumf>, %324, %cst_177 [1] : vector<4x4xf32> to vector<4xf32>
    %326 = vector.shape_cast %325 : vector<4xf32> to vector<4x1xf32>
    %327 = vector.broadcast %326 : vector<4x1xf32> to vector<4x4xf32>
    %328 = arith.subf %324, %327 : vector<4x4xf32>
    %329 = math.exp %328 : vector<4x4xf32>
    %cst_178 = arith.constant dense<0.000000e+00> : vector<4xf32>
    %330 = vector.multi_reduction <add>, %329, %cst_178 [1] : vector<4x4xf32> to vector<4xf32>
    %331 = vector.shape_cast %330 : vector<4xf32> to vector<4x1xf32>
    %332 = tpu.reciprocal %331 {approx = true} : vector<4x1xf32> -> vector<4x1xf32>
    %333 = vector.broadcast %332 : vector<4x1xf32> to vector<4x4xf32>
    %334 = arith.mulf %329, %333 : vector<4x4xf32>
    %cst_179 = arith.constant dense<0.000000e+00> : vector<4x8xf32>
    %335 = tpu.matmul %334, %323, %cst_179 {dimension_numbers = #tpu.dot_dimension_numbers<[1], [0], [0], [1], [0, 0, 1, 1], [], []>} : vector<4x4xf32>, vector<4x8xf32>, vector<4x8xf32> -> vector<4x8xf32>
    %336 = vector.extract_strided_slice %275 {offsets = [16, 0], sizes = [8, 32], strides = [1, 1]} : vector<32x32xf32> to vector<8x32xf32>
    %cst_180 = arith.constant dense<0.000000e+00> : vector<4x32xf32>
    %337 = tpu.matmul %335, %336, %cst_180 {dimension_numbers = #tpu.dot_dimension_numbers<[1], [0], [0], [1], [0, 0, 1, 1], [], []>} : vector<4x8xf32>, vector<8x32xf32>, vector<4x32xf32> -> vector<4x32xf32>
    %338 = arith.addf %318, %337 : vector<4x32xf32>
    %339 = vector.extract_strided_slice %273 {offsets = [0, 24], sizes = [4, 8], strides = [1, 1]} : vector<4x96xf32> to vector<4x8xf32>
    %cst_181 = arith.constant 0.353553385 : f32
    %340 = vector.broadcast %cst_181 : f32 to vector<4x8xf32>
    %341 = arith.mulf %339, %340 : vector<4x8xf32>
    %342 = vector.extract_strided_slice %273 {offsets = [0, 56], sizes = [4, 8], strides = [1, 1]} : vector<4x96xf32> to vector<4x8xf32>
    %343 = vector.extract_strided_slice %273 {offsets = [0, 88], sizes = [4, 8], strides = [1, 1]} : vector<4x96xf32> to vector<4x8xf32>
    %cst_182 = arith.constant dense<0.000000e+00> : vector<4x4xf32>
    %344 = tpu.matmul %341, %342, %cst_182 {dimension_numbers = #tpu.dot_dimension_numbers<[1], [1], [0], [0], [0, 0, 1, 0], [], []>} : vector<4x8xf32>, vector<4x8xf32>, vector<4x4xf32> -> vector<4x4xf32>
    %cst_183 = arith.constant dense<0xFF800000> : vector<4xf32>
    %345 = vector.multi_reduction <maximumf>, %344, %cst_183 [1] : vector<4x4xf32> to vector<4xf32>
    %346 = vector.shape_cast %345 : vector<4xf32> to vector<4x1xf32>
    %347 = vector.broadcast %346 : vector<4x1xf32> to vector<4x4xf32>
    %348 = arith.subf %344, %347 : vector<4x4xf32>
    %349 = math.exp %348 : vector<4x4xf32>
    %cst_184 = arith.constant dense<0.000000e+00> : vector<4xf32>
    %350 = vector.multi_reduction <add>, %349, %cst_184 [1] : vector<4x4xf32> to vector<4xf32>
    %351 = vector.shape_cast %350 : vector<4xf32> to vector<4x1xf32>
    %352 = tpu.reciprocal %351 {approx = true} : vector<4x1xf32> -> vector<4x1xf32>
    %353 = vector.broadcast %352 : vector<4x1xf32> to vector<4x4xf32>
    %354 = arith.mulf %349, %353 : vector<4x4xf32>
    %cst_185 = arith.constant dense<0.000000e+00> : vector<4x8xf32>
    %355 = tpu.matmul %354, %343, %cst_185 {dimension_numbers = #tpu.dot_dimension_numbers<[1], [0], [0], [1], [0, 0, 1, 1], [], []>} : vector<4x4xf32>, vector<4x8xf32>, vector<4x8xf32> -> vector<4x8xf32>
    %356 = vector.extract_strided_slice %275 {offsets = [24, 0], sizes = [8, 32], strides = [1, 1]} : vector<32x32xf32> to vector<8x32xf32>
    %cst_186 = arith.constant dense<0.000000e+00> : vector<4x32xf32>
    %357 = tpu.matmul %355, %356, %cst_186 {dimension_numbers = #tpu.dot_dimension_numbers<[1], [0], [0], [1], [0, 0, 1, 1], [], []>} : vector<4x8xf32>, vector<8x32xf32>, vector<4x32xf32> -> vector<4x32xf32>
    %358 = arith.addf %338, %357 : vector<4x32xf32>
    %359 = arith.addf %266, %358 : vector<4x32xf32>
    %c1_187 = arith.constant 1 : index
    %c0_188 = arith.constant 0 : index
    %c0_189 = arith.constant 0 : index
    %360 = vector.load %arg21[%c1_187, %c0_188, %c0_189] : memref<2x1x32xf32, #tpu.memory_space<vmem>>, vector<1x1x32xf32>
    %361 = vector.shape_cast %360 : vector<1x1x32xf32> to vector<1x32xf32>
    %c1_190 = arith.constant 1 : index
    %c0_191 = arith.constant 0 : index
    %c0_192 = arith.constant 0 : index
    %362 = vector.load %arg22[%c1_190, %c0_191, %c0_192] : memref<2x1x32xf32, #tpu.memory_space<vmem>>, vector<1x1x32xf32>
    %363 = vector.shape_cast %362 : vector<1x1x32xf32> to vector<1x32xf32>
    %cst_193 = arith.constant dense<0.000000e+00> : vector<4xf32>
    %364 = vector.multi_reduction <add>, %359, %cst_193 [1] : vector<4x32xf32> to vector<4xf32>
    %365 = vector.shape_cast %364 : vector<4xf32> to vector<4x1xf32>
    %cst_194 = arith.constant 3.200000e+01 : f32
    %366 = vector.broadcast %cst_194 : f32 to vector<4x1xf32>
    %367 = arith.divf %365, %366 : vector<4x1xf32>
    %368 = vector.broadcast %367 : vector<4x1xf32> to vector<4x32xf32>
    %369 = arith.subf %359, %368 : vector<4x32xf32>
    %370 = arith.mulf %369, %369 : vector<4x32xf32>
    %cst_195 = arith.constant dense<0.000000e+00> : vector<4xf32>
    %371 = vector.multi_reduction <add>, %370, %cst_195 [1] : vector<4x32xf32> to vector<4xf32>
    %372 = vector.shape_cast %371 : vector<4xf32> to vector<4x1xf32>
    %cst_196 = arith.constant 3.200000e+01 : f32
    %373 = vector.broadcast %cst_196 : f32 to vector<4x1xf32>
    %374 = arith.divf %372, %373 : vector<4x1xf32>
    %cst_197 = arith.constant 9.99999996E-13 : f32
    %375 = vector.broadcast %cst_197 : f32 to vector<4x1xf32>
    %376 = arith.addf %374, %375 : vector<4x1xf32>
    %377 = math.rsqrt %376 : vector<4x1xf32>
    %378 = vector.broadcast %377 : vector<4x1xf32> to vector<4x32xf32>
    %379 = arith.mulf %369, %378 : vector<4x32xf32>
    %380 = vector.broadcast %361 : vector<1x32xf32> to vector<4x32xf32>
    %381 = arith.mulf %379, %380 : vector<4x32xf32>
    %382 = vector.broadcast %363 : vector<1x32xf32> to vector<4x32xf32>
    %383 = arith.addf %381, %382 : vector<4x32xf32>
    %c1_198 = arith.constant 1 : index
    %c0_199 = arith.constant 0 : index
    %c0_200 = arith.constant 0 : index
    %384 = vector.load %arg17[%c1_198, %c0_199, %c0_200] : memref<2x32x64xf32, #tpu.memory_space<vmem>>, vector<1x32x64xf32>
    %385 = vector.shape_cast %384 : vector<1x32x64xf32> to vector<32x64xf32>
    %cst_201 = arith.constant dense<0.000000e+00> : vector<4x64xf32>
    %386 = tpu.matmul %383, %385, %cst_201 {dimension_numbers = #tpu.dot_dimension_numbers<[1], [0], [0], [1], [0, 0, 1, 1], [], []>} : vector<4x32xf32>, vector<32x64xf32>, vector<4x64xf32> -> vector<4x64xf32>
    %c1_202 = arith.constant 1 : index
    %c0_203 = arith.constant 0 : index
    %c0_204 = arith.constant 0 : index
    %387 = vector.load %arg18[%c1_202, %c0_203, %c0_204] : memref<2x1x64xf32, #tpu.memory_space<vmem>>, vector<1x1x64xf32>
    %388 = vector.shape_cast %387 : vector<1x1x64xf32> to vector<1x64xf32>
    %389 = vector.broadcast %388 : vector<1x64xf32> to vector<4x64xf32>
    %390 = arith.addf %386, %389 : vector<4x64xf32>
    %391 = arith.mulf %390, %390 : vector<4x64xf32>
    %392 = arith.mulf %390, %391 : vector<4x64xf32>
    %cst_205 = arith.constant 4.471500e-02 : f32
    %393 = vector.broadcast %cst_205 : f32 to vector<4x64xf32>
    %394 = arith.mulf %393, %392 : vector<4x64xf32>
    %395 = arith.addf %390, %394 : vector<4x64xf32>
    %cst_206 = arith.constant 0.797884583 : f32
    %396 = vector.broadcast %cst_206 : f32 to vector<4x64xf32>
    %397 = arith.mulf %396, %395 : vector<4x64xf32>
    %398 = math.tanh %397 : vector<4x64xf32>
    %cst_207 = arith.constant 1.000000e+00 : f32
    %399 = vector.broadcast %cst_207 : f32 to vector<4x64xf32>
    %400 = arith.addf %399, %398 : vector<4x64xf32>
    %cst_208 = arith.constant 5.000000e-01 : f32
    %401 = vector.broadcast %cst_208 : f32 to vector<4x64xf32>
    %402 = arith.mulf %401, %400 : vector<4x64xf32>
    %403 = arith.mulf %390, %402 : vector<4x64xf32>
    %c1_209 = arith.constant 1 : index
    %c0_210 = arith.constant 0 : index
    %c0_211 = arith.constant 0 : index
    %404 = vector.load %arg19[%c1_209, %c0_210, %c0_211] : memref<2x64x32xf32, #tpu.memory_space<vmem>>, vector<1x64x32xf32>
    %405 = vector.shape_cast %404 : vector<1x64x32xf32> to vector<64x32xf32>
    %cst_212 = arith.constant dense<0.000000e+00> : vector<4x32xf32>
    %406 = tpu.matmul %403, %405, %cst_212 {dimension_numbers = #tpu.dot_dimension_numbers<[1], [0], [0], [1], [0, 0, 1, 1], [], []>} : vector<4x64xf32>, vector<64x32xf32>, vector<4x32xf32> -> vector<4x32xf32>
    %c1_213 = arith.constant 1 : index
    %c0_214 = arith.constant 0 : index
    %c0_215 = arith.constant 0 : index
    %407 = vector.load %arg20[%c1_213, %c0_214, %c0_215] : memref<2x1x32xf32, #tpu.memory_space<vmem>>, vector<1x1x32xf32>
    %408 = vector.shape_cast %407 : vector<1x1x32xf32> to vector<1x32xf32>
    %409 = vector.broadcast %408 : vector<1x32xf32> to vector<4x32xf32>
    %410 = arith.addf %406, %409 : vector<4x32xf32>
    %411 = arith.addf %383, %410 : vector<4x32xf32>
    %c1_216 = arith.constant 1 : index
    %c0_217 = arith.constant 0 : index
    %c0_218 = arith.constant 0 : index
    %412 = vector.load %arg23[%c1_216, %c0_217, %c0_218] : memref<2x1x32xf32, #tpu.memory_space<vmem>>, vector<1x1x32xf32>
    %413 = vector.shape_cast %412 : vector<1x1x32xf32> to vector<1x32xf32>
    %c1_219 = arith.constant 1 : index
    %c0_220 = arith.constant 0 : index
    %c0_221 = arith.constant 0 : index
    %414 = vector.load %arg24[%c1_219, %c0_220, %c0_221] : memref<2x1x32xf32, #tpu.memory_space<vmem>>, vector<1x1x32xf32>
    %415 = vector.shape_cast %414 : vector<1x1x32xf32> to vector<1x32xf32>
    %cst_222 = arith.constant dense<0.000000e+00> : vector<4xf32>
    %416 = vector.multi_reduction <add>, %411, %cst_222 [1] : vector<4x32xf32> to vector<4xf32>
    %417 = vector.shape_cast %416 : vector<4xf32> to vector<4x1xf32>
    %cst_223 = arith.constant 3.200000e+01 : f32
    %418 = vector.broadcast %cst_223 : f32 to vector<4x1xf32>
    %419 = arith.divf %417, %418 : vector<4x1xf32>
    %420 = vector.broadcast %419 : vector<4x1xf32> to vector<4x32xf32>
    %421 = arith.subf %411, %420 : vector<4x32xf32>
    %422 = arith.mulf %421, %421 : vector<4x32xf32>
    %cst_224 = arith.constant dense<0.000000e+00> : vector<4xf32>
    %423 = vector.multi_reduction <add>, %422, %cst_224 [1] : vector<4x32xf32> to vector<4xf32>
    %424 = vector.shape_cast %423 : vector<4xf32> to vector<4x1xf32>
    %cst_225 = arith.constant 3.200000e+01 : f32
    %425 = vector.broadcast %cst_225 : f32 to vector<4x1xf32>
    %426 = arith.divf %424, %425 : vector<4x1xf32>
    %cst_226 = arith.constant 9.99999996E-13 : f32
    %427 = vector.broadcast %cst_226 : f32 to vector<4x1xf32>
    %428 = arith.addf %426, %427 : vector<4x1xf32>
    %429 = math.rsqrt %428 : vector<4x1xf32>
    %430 = vector.broadcast %429 : vector<4x1xf32> to vector<4x32xf32>
    %431 = arith.mulf %421, %430 : vector<4x32xf32>
    %432 = vector.broadcast %413 : vector<1x32xf32> to vector<4x32xf32>
    %433 = arith.mulf %431, %432 : vector<4x32xf32>
    %434 = vector.broadcast %415 : vector<1x32xf32> to vector<4x32xf32>
    %435 = arith.addf %433, %434 : vector<4x32xf32>
    %cst_227 = arith.constant dense<0.000000e+00> : vector<32xf32>
    %436 = vector.multi_reduction <add>, %435, %cst_227 [0] : vector<4x32xf32> to vector<32xf32>
    %437 = vector.shape_cast %436 : vector<32xf32> to vector<1x32xf32>
    %cst_228 = arith.constant 4.000000e+00 : f32
    %438 = vector.broadcast %cst_228 : f32 to vector<1x32xf32>
    %439 = arith.divf %437, %438 : vector<1x32xf32>
    %c0_229 = arith.constant 0 : index
    %c0_230 = arith.constant 0 : index
    %c0_231 = arith.constant 0 : index
    %440 = vector.load %arg25[%c0_229, %c0_230, %c0_231] : memref<1x1x32xf32, #tpu.memory_space<vmem>>, vector<1x1x32xf32>
    %441 = vector.shape_cast %440 : vector<1x1x32xf32> to vector<1x32xf32>
    %442 = vector.shape_cast %439 : vector<1x32xf32> to vector<1x1x32xf32>
    tpu.vector_store %arg25[%c0_229, %c0_230, %c0_231], %442 {strides = array<i32>} : memref<1x1x32xf32, #tpu.memory_space<vmem>>, vector<1x1x32xf32>,
    return
  }
  func.func @transform_0(%arg0: i32) -> (i32, i32, i32) {
    %c0_i32 = arith.constant 0 : i32
    %c0_i32_0 = arith.constant 0 : i32
    %c0_i32_1 = arith.constant 0 : i32
    return %arg0, %c0_i32, %c0_i32_0 : i32, i32, i32
  }
  func.func @transform_1(%arg0: i32) -> (i32, i32, i32) {
    %c0_i32 = arith.constant 0 : i32
    %c0_i32_0 = arith.constant 0 : i32
    %c0_i32_1 = arith.constant 0 : i32
    %c0_i32_2 = arith.constant 0 : i32
    return %c0_i32, %c0_i32_0, %c0_i32_1 : i32, i32, i32
  }
  func.func @transform_2(%arg0: i32) -> (i32, i32, i32) {
    %c0_i32 = arith.constant 0 : i32
    %c0_i32_0 = arith.constant 0 : i32
    %c0_i32_1 = arith.constant 0 : i32
    %c0_i32_2 = arith.constant 0 : i32
    return %c0_i32, %c0_i32_0, %c0_i32_1 : i32, i32, i32
  }
  func.func @transform_3(%arg0: i32) -> (i32, i32) {
    %c0_i32 = arith.constant 0 : i32
    %c0_i32_0 = arith.constant 0 : i32
    %c0_i32_1 = arith.constant 0 : i32
    return %c0_i32, %c0_i32_0 : i32, i32
  }
  func.func @transform_4(%arg0: i32) -> (i32, i32) {
    %c0_i32 = arith.constant 0 : i32
    %c0_i32_0 = arith.constant 0 : i32
    %c0_i32_1 = arith.constant 0 : i32
    return %c0_i32, %c0_i32_0 : i32, i32
  }
  func.func @transform_5(%arg0: i32) -> (i32, i32) {
    %c0_i32 = arith.constant 0 : i32
    %c0_i32_0 = arith.constant 0 : i32
    %c0_i32_1 = arith.constant 0 : i32
    return %c0_i32, %c0_i32_0 : i32, i32
  }
  func.func @transform_6(%arg0: i32) -> (i32, i32, i32) {
    %c0_i32 = arith.constant 0 : i32
    %c0_i32_0 = arith.constant 0 : i32
    %c0_i32_1 = arith.constant 0 : i32
    %c0_i32_2 = arith.constant 0 : i32
    return %c0_i32, %c0_i32_0, %c0_i32_1 : i32, i32, i32
  }
  func.func @transform_7(%arg0: i32) -> (i32, i32, i32) {
    %c0_i32 = arith.constant 0 : i32
    %c0_i32_0 = arith.constant 0 : i32
    %c0_i32_1 = arith.constant 0 : i32
    %c0_i32_2 = arith.constant 0 : i32
    return %c0_i32, %c0_i32_0, %c0_i32_1 : i32, i32, i32
  }
  func.func @transform_8(%arg0: i32) -> (i32, i32) {
    %c0_i32 = arith.constant 0 : i32
    %c0_i32_0 = arith.constant 0 : i32
    %c0_i32_1 = arith.constant 0 : i32
    return %c0_i32, %c0_i32_0 : i32, i32
  }
  func.func @transform_9(%arg0: i32) -> (i32, i32) {
    %c0_i32 = arith.constant 0 : i32
    %c0_i32_0 = arith.constant 0 : i32
    %c0_i32_1 = arith.constant 0 : i32
    return %c0_i32, %c0_i32_0 : i32, i32
  }
  func.func @transform_10(%arg0: i32) -> (i32, i32) {
    %c0_i32 = arith.constant 0 : i32
    %c0_i32_0 = arith.constant 0 : i32
    %c0_i32_1 = arith.constant 0 : i32
    return %c0_i32, %c0_i32_0 : i32, i32
  }
  func.func @transform_11(%arg0: i32) -> (i32, i32) {
    %c0_i32 = arith.constant 0 : i32
    %c0_i32_0 = arith.constant 0 : i32
    %c0_i32_1 = arith.constant 0 : i32
    return %c0_i32, %c0_i32_0 : i32, i32
  }
  func.func @transform_12(%arg0: i32) -> (i32, i32, i32) {
    %c0_i32 = arith.constant 0 : i32
    %c0_i32_0 = arith.constant 0 : i32
    %c0_i32_1 = arith.constant 0 : i32
    %c0_i32_2 = arith.constant 0 : i32
    return %c0_i32, %c0_i32_0, %c0_i32_1 : i32, i32, i32
  }
  func.func @transform_13(%arg0: i32) -> (i32, i32, i32) {
    %c0_i32 = arith.constant 0 : i32
    %c0_i32_0 = arith.constant 0 : i32
    %c0_i32_1 = arith.constant 0 : i32
    %c0_i32_2 = arith.constant 0 : i32
    return %c0_i32, %c0_i32_0, %c0_i32_1 : i32, i32, i32
  }
  func.func @transform_14(%arg0: i32) -> (i32, i32, i32) {
    %c0_i32 = arith.constant 0 : i32
    %c0_i32_0 = arith.constant 0 : i32
    %c0_i32_1 = arith.constant 0 : i32
    %c0_i32_2 = arith.constant 0 : i32
    return %c0_i32, %c0_i32_0, %c0_i32_1 : i32, i32, i32
  }
  func.func @transform_15(%arg0: i32) -> (i32, i32, i32) {
    %c0_i32 = arith.constant 0 : i32
    %c0_i32_0 = arith.constant 0 : i32
    %c0_i32_1 = arith.constant 0 : i32
    %c0_i32_2 = arith.constant 0 : i32
    return %c0_i32, %c0_i32_0, %c0_i32_1 : i32, i32, i32
  }
  func.func @transform_16(%arg0: i32) -> (i32, i32, i32) {
    %c0_i32 = arith.constant 0 : i32
    %c0_i32_0 = arith.constant 0 : i32
    %c0_i32_1 = arith.constant 0 : i32
    %c0_i32_2 = arith.constant 0 : i32
    return %c0_i32, %c0_i32_0, %c0_i32_1 : i32, i32, i32
  }
  func.func @transform_17(%arg0: i32) -> (i32, i32, i32) {
    %c0_i32 = arith.constant 0 : i32
    %c0_i32_0 = arith.constant 0 : i32
    %c0_i32_1 = arith.constant 0 : i32
    %c0_i32_2 = arith.constant 0 : i32
    return %c0_i32, %c0_i32_0, %c0_i32_1 : i32, i32, i32
  }
  func.func @transform_18(%arg0: i32) -> (i32, i32, i32) {
    %c0_i32 = arith.constant 0 : i32
    %c0_i32_0 = arith.constant 0 : i32
    %c0_i32_1 = arith.constant 0 : i32
    %c0_i32_2 = arith.constant 0 : i32
    return %c0_i32, %c0_i32_0, %c0_i32_1 : i32, i32, i32
  }
  func.func @transform_19(%arg0: i32) -> (i32, i32, i32) {
    %c0_i32 = arith.constant 0 : i32
    %c0_i32_0 = arith.constant 0 : i32
    %c0_i32_1 = arith.constant 0 : i32
    %c0_i32_2 = arith.constant 0 : i32
    return %c0_i32, %c0_i32_0, %c0_i32_1 : i32, i32, i32
  }
  func.func @transform_20(%arg0: i32) -> (i32, i32, i32) {
    %c0_i32 = arith.constant 0 : i32
    %c0_i32_0 = arith.constant 0 : i32
    %c0_i32_1 = arith.constant 0 : i32
    %c0_i32_2 = arith.constant 0 : i32
    return %c0_i32, %c0_i32_0, %c0_i32_1 : i32, i32, i32
  }
  func.func @transform_21(%arg0: i32) -> (i32, i32, i32) {
    %c0_i32 = arith.constant 0 : i32
    %c0_i32_0 = arith.constant 0 : i32
    %c0_i32_1 = arith.constant 0 : i32
    %c0_i32_2 = arith.constant 0 : i32
    return %c0_i32, %c0_i32_0, %c0_i32_1 : i32, i32, i32
  }
  func.func @transform_22(%arg0: i32) -> (i32, i32, i32) {
    %c0_i32 = arith.constant 0 : i32
    %c0_i32_0 = arith.constant 0 : i32
    %c0_i32_1 = arith.constant 0 : i32
    %c0_i32_2 = arith.constant 0 : i32
    return %c0_i32, %c0_i32_0, %c0_i32_1 : i32, i32, i32
  }
  func.func @transform_23(%arg0: i32) -> (i32, i32, i32) {
    %c0_i32 = arith.constant 0 : i32
    %c0_i32_0 = arith.constant 0 : i32
    %c0_i32_1 = arith.constant 0 : i32
    %c0_i32_2 = arith.constant 0 : i32
    return %c0_i32, %c0_i32_0, %c0_i32_1 : i32, i32, i32
  }
  func.func @transform_24(%arg0: i32) -> (i32, i32, i32) {
    %c0_i32 = arith.constant 0 : i32
    %c0_i32_0 = arith.constant 0 : i32
    %c0_i32_1 = arith.constant 0 : i32
    return %arg0, %c0_i32, %c0_i32_0 : i32, i32, i32
  }
}

</mosaic_0001>

<bundles_post_ra>
// kernel: tpu_custom_call.1
= control target key start
LH: loop header
LB: loop body
LE: loop exit
PB: predicated region body
PF: predicated region fallthrough
CT: control target
= control target key end

     0   :  { %s7085_s0 = inlined_call_operand.vmem [shape: f32[2,16,4], index: 0, kind: input, shape index: {}]   ;;  %s7086_s1 = inlined_call_operand.hbm [shape: f32[3,8,16], index: 1, kind: input, shape index: {}]   ;;  %s7087_s2 = inlined_call_operand.vmem [shape: f32[3,4,32], index: 2, kind: input, shape index: {}]   ;;  %s7088_s3 = inlined_call_operand.hbm [shape: f32[1,32], index: 3, kind: input, shape index: {}]   ;;  %s7089_s4 = inlined_call_operand.hbm [shape: f32[1,32], index: 4, kind: input, shape index: {}]   ;;  %s7090_s5 = inlined_call_operand.hbm [shape: f32[1,32], index: 5, kind: input, shape index: {}]   ;;  %s7091_s6 = inlined_call_operand.hbm [shape: f32[3,4,8], index: 6, kind: input, shape index: {}]   ;;  %s7092_s7 = inlined_call_operand.vmem [shape: f32[3,32,32], index: 7, kind: input, shape index: {}]   ;;  %s7093_s8 = inlined_call_operand.hbm [shape: f32[1,32], index: 8, kind: input, shape index: {}]   ;;  %s7094_s9 = inlined_call_operand.hbm [shape: f32[1,32], index: 9, kind: input, shape index: {}]   ;;  %s7095_s10 = inlined_call_operand.hbm [shape: f32[1,32], index: 10, kind: input, shape index: {}]   ;;  %s7096_s11 = inlined_call_operand.hbm [shape: f32[4,32], index: 11, kind: input, shape index: {}]   ;;  %s7097_s12 = inlined_call_operand.vmem [shape: f32[2,32,96], index: 12, kind: input, shape index: {}]   ;;  %s7098_s13 = inlined_call_operand.hbm [shape: f32[2,1,96], index: 13, kind: input, shape index: {}]   ;;  %s7099_s14 = inlined_call_operand.vmem [shape: f32[2,32,32], index: 14, kind: input, shape index: {}]   ;;  %s7100_s15 = inlined_call_operand.hbm [shape: f32[2,1,32], index: 15, kind: input, shape index: {}]   ;;  %s7101_s16 = inlined_call_operand.hbm [shape: f32[2,32,64], index: 16, kind: input, shape index: {}]   ;;  %s7102_s17 = inlined_call_operand.hbm [shape: f32[2,1,64], index: 17, kind: input, shape index: {}]   ;;  %s7103_s18 = inlined_call_operand.vmem [shape: f32[2,64,32], index: 18, kind: input, shape index: {}]   ;;  %s7104_s19 = inlined_call_operand.vmem [shape: f32[2,1,32], index: 19, kind: input, shape index: {}]   ;;  %s7105_s20 = inlined_call_operand.vmem [shape: f32[2,1,32], index: 20, kind: input, shape index: {}]   ;;  %s7106_s21 = inlined_call_operand.vmem [shape: f32[2,1,32], index: 21, kind: input, shape index: {}]   ;;  %s7107_s22 = inlined_call_operand.vmem [shape: f32[2,1,32], index: 22, kind: input, shape index: {}]   ;;  %s7108_s23 = inlined_call_operand.vmem [shape: f32[2,1,32], index: 23, kind: input, shape index: {}]   ;;  %s7109_s24 = inlined_call_operand.hbm [shape: f32[2,1,32], index: 24, kind: output, shape index: {}]  }
   0x1   :  { %7145 = sst [smem:[#allocation40_spill]] %s7085_s0 }
   0x2   :  { %7146 = sst [smem:[#allocation41_spill]] %s7086_s1 }
   0x3   :  { %7147 = sst [smem:[#allocation42_spill]] %s7087_s2 }
   0x4   :  { %7148 = sst [smem:[#allocation43_spill]] %s7088_s3 }
   0x5   :  { %7149 = sst [smem:[#allocation44_spill]] %s7089_s4 }
   0x6   :  { %7150 = sst [smem:[#allocation45_spill]] %s7090_s5 }
   0x7   :  { %7151 = sst [smem:[#allocation46_spill]] %s7091_s6 }
   0x8   :  { %7152 = sst [smem:[#allocation47_spill]] %s7092_s7 }
   0x9   :  { %7153 = sst [smem:[#allocation48_spill]] %s7093_s8 }
   0xa   :  { %7154 = sst [smem:[#allocation49_spill]] %s7095_s10 }
   0xb   :  { %7155 = sst [smem:[#allocation50_spill]] %s7098_s13 }
   0xc   :  { %7156 = sst [smem:[#allocation51_spill]] %s7101_s16 }
   0xd   :  { %7157 = sst [smem:[#allocation52_spill]] %s7104_s19 }
   0xe   :  { %7158 = sst [smem:[#allocation53_spill]] %s7107_s22 }
   0xf   :  { %7159 = sst [smem:[#allocation54_spill]] %s7108_s23 }
  0x10   :  { %7160 = sst [smem:[#allocation55_spill]] %s7109_s24 }
  0x11   :  { %29 = vsyncpa [#allocation3], 0 }
  0x12   :  { %30 = vsyncpa [#allocation6], 0 }
  0x13   :  { %31 = vsyncpa [#allocation9], 0 }
  0x14   :  { %32 = vsyncpa [#allocation12], 0 }
  0x15   :  { %33 = vsyncpa [#allocation15], 0 }
  0x16   :  { %34 = vsyncpa [#allocation18], 0 }
  0x17   :  { %35 = vsyncpa [#allocation21], 0 }
  0x18   :  { %36 = vsyncpa [#allocation4], 0 }
  0x19   :  { %38 = vsyncpa [#allocation4 + $0x1], 0  ;;  %s6213_s5 = smov 0   ;;  %s6215_s26 = smov 0  }
  0x1a   :  { %s6217_s27 = smov 0   ;;  %s6219_s28 = smov 0  }
  0x1b LB: > { %7161 = sst [smem:[#allocation32_spill]] %s6040_s5  ;;  %s6234_s6 = sadd.s32 4294967295, %s6052_s28   ;;  %s6052_s28 = sphi %s6219_s28, %s7221_s28   ;;  %s6048_s27 = sphi %s6217_s27, %s7224_s27   ;;  %s6044_s26 = sphi %s6215_s26, %s7223_s26   ;;  %s6040_s5 = sphi %s6213_s5, %s7222_s5  }
  0x1c   : > { %7162 = sst [smem:[#allocation33_spill]] %s6044_s26  ;;  %s4727_s2 = sadd.s32 4294967294, %s6052_s28  }
  0x1d   : > { %7163 = sst [smem:[#allocation34_spill]] %s6048_s27  ;;  %s6238_s29 = sadd.s32 1, %s6052_s28  }
  0x1e   : > { %7164 = sst [smem:[#allocation35_spill]] %s6052_s28  ;;  %s560_s0 = sadd.s32 1, %s6048_s27 }
  0x1f   : > { %7165 = sst [smem:[#allocation36_spill]] %s6238_s29  ;;  %s557_s7 = ssub.s32 %s6052_s28, %s6238_s29 }
  0x20   : > { %p570_p0 = scmp.ne.s32.totalorder %s6048_s27, %s6044_s26  ;;  %p558_p1 = scmp.eq.s32.totalorder %s557_s7, 0 }
  0x21   : > { %p571_p2 = scmp.eq.s32.totalorder %s6234_s6, 1  ;;  %p576_p3 = scmp.ne.s32.totalorder %s6044_s26, %s6040_s5 }
  0x22   : > { %p577_p4 = scmp.eq.s32.totalorder %s4727_s2, 1  ;;  %p4728_p7 = scmp.ge.s32.totalorder %s6052_s28, 1 }
  0x23   : > { %s6249_s30 = scalar_select %p558_p1, %s6048_s27, %s560_s0  }
  0x24   : > { %p6251_p5 = por %p571_p2, %p570_p0  ;;  %p6255_p6 = por %p577_p4, %p576_p3 }
  0x25   : > { %7166 = sst [smem:[#allocation37_spill]] %s6249_s30  ;;  %p584_p8 = scmp.lt.s32.totalorder %s6052_s28, 3 }
  0x26   : > { %s7167_s3 = scalar_select %p6251_p5, 1, 0 }
  0x27   : > { %s7169_s25 = scalar_select %p6255_p6, 1, 0 }
  0x28   : > { %7168 = sst [smem:[#allocation38_spill]] %s7167_s3  ;;  %p7127_p9 = scmp.eq.s32.totalorder %s6234_s6, 0 }
  0x29   : > { %7170 = sst [smem:[#allocation39_spill]] %s7169_s25  ;;  %p6262_p10 = pnand %p4728_p7, %p584_p8 }
  0x2a   : > { %s6054_s4 = smov [#allocation5]   ;;  %s6055_s2 = smov [#allocation8]  }
  0x2b   : > { %s7171_s8 = scalar_select %p6262_p10, 1, 0 }
  0x2c   : > { %s613_s1 = sshll.u32 %s6054_s4, 4  ;;  %p5414_p11 = pneg %p6262_p10  ;;  %s614_s1 = int_to_ptr.vmem [resolvable:$true] %s613_s1 }
  0x2d   : > { %s635_s0 = sshll.u32 %s6055_s2, 4  ;;  %s6056_s30 = smov [#allocation11]   ;;  %s6274_s0 = int_to_ptr.vmem [resolvable:$true] %s635_s0 }
  0x2e   : > { %p6270_p12 = pnand %p7127_p9, %p5414_p11  ;;  %s662_s27 = sshll.u32 %s6056_s30, 4  ;;  %s6276_s27 = int_to_ptr.vmem [resolvable:$true] %s662_s27 }
  0x2f   : > { %s7173_s4 = sld [smem:[#allocation43_spill]] }
  0x30   : > { %p6286_p0 = pneg %p6270_p12 }
  0x35   : > { %s5598_s5 = scalar_lea.hbm %s7173_s4, 16 }
  0x36   : > { %p5599_p13 = scmp.ne.s32.totalorder %s7173_s4, %s5598_s5  ;;  %p5605_p3 = scmp.lt.u32.totalorder %s5598_s5, %s7173_s4 }
  0x38   : > { %p5601_p1 = pnand %p6286_p0, %p5599_p13 }
  0x3a   : > { %p5602_p2 = pneg %p5601_p1 }
  0x3c   : > { %p5607_p4 = pnand %p5605_p3, %p5602_p2 }
  0x3e   : > { %5610 = shalt.err (!%p5607_p4)
}
  0x3f   : > { %s5611_s29 = scalar_lea.vmem %s614_s1, 16  ;;  %s5618_s24 = scalar_lea.vmem %s614_s1, 32 }
  0x40   : > { %p5612_p7 = scmp.ne.s32.totalorder %s614_s1, %s5611_s29  ;;  %p5619_p9 = scmp.lt.s32.totalorder %s614_s1, %s614_s1 }
  0x41   : > { %p5620_p6 = scmp.lt.s32.totalorder %s5618_s24, %s5611_s29 }
  0x42   : > { %p5614_p8 = pnand %p5612_p7, %p6286_p0 }
  0x43   : > { %p5621_p5 = por %p5620_p6, %p5619_p9 }
  0x44   : > { %p5615_p11 = pneg %p5614_p8 }
  0x46   : > { %p5622_p10 = pnand %p5621_p5, %p5615_p11 }
  0x48   : > { %5625 = shalt.err (!%p5622_p10)
}
  0x49   : > { %5420 = dma.hbm_to_vmem [thread:$0]  (!%p6270_p12), %s7173_s4, 16, %s614_s1, [#allocation6]  }
  0x4a   : > { %s7175_s30 = sld [smem:[#allocation45_spill]] }
  0x50   : > { %s5626_s26 = scalar_lea.hbm %s7175_s30, 16 }
  0x51   : > { %p5627_p13 = scmp.ne.s32.totalorder %s7175_s30, %s5626_s26  ;;  %p5633_p5 = scmp.lt.u32.totalorder %s5626_s26, %s7175_s30 }
  0x53   : > { %p5629_p1 = pnand %p5627_p13, %p6286_p0 }
  0x55   : > { %p5630_p6 = pneg %p5629_p1 }
  0x57   : > { %p5635_p9 = pnand %p5633_p5, %p5630_p6 }
  0x59   : > { %5638 = shalt.err (!%p5635_p9)
}
  0x5a   : > { %s5639_s1 = scalar_lea.vmem %s6274_s0, 16  ;;  %s5646_s22 = scalar_lea.vmem %s6274_s0, 32 }
  0x5b   : > { %p5640_p10 = scmp.ne.s32.totalorder %s6274_s0, %s5639_s1  ;;  %p5647_p4 = scmp.lt.s32.totalorder %s6274_s0, %s6274_s0 }
  0x5c   : > { %p5648_p7 = scmp.lt.s32.totalorder %s5646_s22, %s5639_s1 }
  0x5d   : > { %p5642_p2 = pnand %p5640_p10, %p6286_p0 }
  0x5e   : > { %p5649_p8 = por %p5648_p7, %p5647_p4 }
  0x5f   : > { %p5643_p3 = pneg %p5642_p2 }
  0x61   : > { %p5650_p11 = pnand %p5649_p8, %p5643_p3 }
  0x63   : > { %5653 = shalt.err (!%p5650_p11)
}
  0x64   : > { %5426 = dma.hbm_to_vmem [thread:$0]  (!%p6270_p12), %s7175_s30, 16, %s6274_s0, [#allocation9]  }
  0x65   : > { %s7176_s5 = sld [smem:[#allocation48_spill]] }
  0x6b   : > { %s7177_s3 = smov %s7176_s5  ;;  %s5654_s29 = scalar_lea.hbm %s7176_s5, 16 }
  0x6c   : > { %p5655_p13 = scmp.ne.s32.totalorder %s7177_s3, %s5654_s29  ;;  %p5661_p5 = scmp.lt.u32.totalorder %s5654_s29, %s7177_s3 }
  0x6e   : > { %p5657_p1 = pnand %p5655_p13, %p6286_p0 }
  0x70   : > { %p5658_p6 = pneg %p5657_p1 }
  0x72   : > { %p5663_p9 = pnand %p5661_p5, %p5658_p6 }
  0x74   : > { %5666 = shalt.err (!%p5663_p9)
}
  0x75   : > { %s5667_s0 = scalar_lea.vmem %s6276_s27, 16  ;;  %s5674_s4 = scalar_lea.vmem %s6276_s27, 32 }
  0x76   : > { %p5668_p10 = scmp.ne.s32.totalorder %s6276_s27, %s5667_s0  ;;  %p5675_p4 = scmp.lt.s32.totalorder %s6276_s27, %s6276_s27 }
  0x77   : > { %p5676_p7 = scmp.lt.s32.totalorder %s5674_s4, %s5667_s0 }
  0x78   : > { %p5670_p2 = pnand %p5668_p10, %p6286_p0 }
  0x79   : > { %p5677_p8 = por %p5676_p7, %p5675_p4 }
  0x7a   : > { %p5671_p3 = pneg %p5670_p2 }
  0x7c   : > { %p5678_p11 = pnand %p5677_p8, %p5671_p3 }
  0x7e   : > { %5681 = shalt.err (!%p5678_p11)
}
  0x7f   : > { %5432 = dma.hbm_to_vmem [thread:$0]  (!%p6270_p12), %s7177_s3, 16, %s6276_s27, [#allocation12]  }
  0x80   : > { %s6057_s28 = smov [#allocation14]   ;;  %s6058_s5 = smov [#allocation17]  }
  0x81   : > { %s684_s25 = sshll.u32 %s6057_s28, 4  ;;  %s708_s29 = sshll.u32 %s6058_s5, 4  ;;  %s685_s25 = int_to_ptr.vmem [resolvable:$true] %s684_s25  ;;  %s709_s29 = int_to_ptr.vmem [resolvable:$true] %s708_s29 }
  0x82   : > { %s7178_s10 = sld [smem:[#allocation49_spill]] }
  0x88   : > { %s5682_s22 = scalar_lea.hbm %s7178_s10, 16 }
  0x89   : > { %p5683_p13 = scmp.ne.s32.totalorder %s7178_s10, %s5682_s22  ;;  %p5689_p5 = scmp.lt.u32.totalorder %s5682_s22, %s7178_s10 }
  0x8b   : > { %p5685_p1 = pnand %p5683_p13, %p6286_p0 }
  0x8d   : > { %p5686_p6 = pneg %p5685_p1 }
  0x8f   : > { %p5691_p9 = pnand %p5689_p5, %p5686_p6 }
  0x91   : > { %5694 = shalt.err (!%p5691_p9)
}
  0x92   : > { %s5695_s27 = scalar_lea.vmem %s685_s25, 16  ;;  %s5702_s26 = scalar_lea.vmem %s685_s25, 32 }
  0x93   : > { %p5696_p10 = scmp.ne.s32.totalorder %s685_s25, %s5695_s27  ;;  %p5703_p4 = scmp.lt.s32.totalorder %s685_s25, %s685_s25 }
  0x94   : > { %p5704_p7 = scmp.lt.s32.totalorder %s5702_s26, %s5695_s27 }
  0x95   : > { %p5698_p2 = pnand %p5696_p10, %p6286_p0 }
  0x96   : > { %p5705_p8 = por %p5704_p7, %p5703_p4 }
  0x97   : > { %p5699_p3 = pneg %p5698_p2 }
  0x99   : > { %p5706_p11 = pnand %p5705_p8, %p5699_p3 }
  0x9b   : > { %5709 = shalt.err (!%p5706_p11)
}
  0x9c   : > { %5438 = dma.hbm_to_vmem [thread:$0]  (!%p6270_p12), %s7178_s10, 16, %s685_s25, [#allocation15]  }
  0x9d   : > { %s7179_s13 = sld [smem:[#allocation50_spill]] }
  0xa3   : > { %s5710_s1 = scalar_lea.hbm %s7179_s13, 32 }
  0xa4   : > { %p5711_p13 = scmp.ne.s32.totalorder %s7179_s13, %s5710_s1  ;;  %p5717_p5 = scmp.lt.u32.totalorder %s5710_s1, %s7179_s13 }
  0xa6   : > { %p5713_p1 = pnand %p5711_p13, %p6286_p0 }
  0xa8   : > { %p5714_p6 = pneg %p5713_p1 }
  0xaa   : > { %p5719_p9 = pnand %p5717_p5, %p5714_p6 }
  0xac   : > { %5722 = shalt.err (!%p5719_p9)
}
  0xad   : > { %s5723_s27 = scalar_lea.vmem %s709_s29, 32  ;;  %p5731_p4 = scmp.lt.s32.totalorder %s709_s29, %s709_s29 }
  0xae   : > { %p5724_p10 = scmp.ne.s32.totalorder %s709_s29, %s5723_s27  ;;  %p5732_p7 = scmp.lt.s32.totalorder %s5723_s27, %s5723_s27 }
  0xb0   : > { %p5726_p2 = pnand %p5724_p10, %p6286_p0  ;;  %p5733_p8 = por %p5732_p7, %p5731_p4 }
  0xb2   : > { %p5727_p3 = pneg %p5726_p2 }
  0xb4   : > { %p5734_p11 = pnand %p5733_p8, %p5727_p3 }
  0xb6   : > { %5737 = shalt.err (!%p5734_p11)
}
  0xb7   : > { %s7137_s25 = smov 16   ;;  %s7139_s26 = smov 1  }
  0xb8   : > { %5444 = dma.hbm_to_vmem [thread:$0]  (!%p6270_p12), %s7179_s13, 32, %s709_s29, [#allocation18], %s7137_s25, %s7137_s25, %s7139_s26  }
  0xb9   : > { %s6061_s30 = smov [#allocation20]   ;;  %s6062_s1 = smov [#allocation2]  }
  0xba   : > { %s737_s24 = sshll.u32 %s6061_s30, 4  ;;  %s596_s22 = sshll.u32 %s6062_s1, 4  ;;  %s738_s24 = int_to_ptr.vmem [resolvable:$true] %s737_s24  ;;  %s597_s22 = int_to_ptr.vmem [resolvable:$true] %s596_s22 }
  0xbb   : > { %s7180_s16 = sld [smem:[#allocation51_spill]] }
  0xc1   : > { %s5738_s23 = scalar_lea.hbm %s7180_s16, 1024 }
  0xc2   : > { %p5739_p13 = scmp.ne.s32.totalorder %s7180_s16, %s5738_s23  ;;  %p5745_p5 = scmp.lt.u32.totalorder %s5738_s23, %s7180_s16 }
  0xc4   : > { %p5741_p1 = pnand %p5739_p13, %p6286_p0 }
  0xc6   : > { %p5742_p6 = pneg %p5741_p1 }
  0xc8   : > { %p5747_p9 = pnand %p5745_p5, %p5742_p6 }
  0xca   : > { %5750 = shalt.err (!%p5747_p9)
}
  0xcb   : > { %s5751_s29 = scalar_lea.vmem %s738_s24, 1024  ;;  %p5759_p4 = scmp.lt.s32.totalorder %s738_s24, %s738_s24 }
  0xcc   : > { %p5752_p10 = scmp.ne.s32.totalorder %s738_s24, %s5751_s29  ;;  %p5760_p7 = scmp.lt.s32.totalorder %s5751_s29, %s5751_s29 }
  0xce   : > { %p5754_p2 = pnand %p5752_p10, %p6286_p0  ;;  %p5761_p8 = por %p5760_p7, %p5759_p4 }
  0xd0   : > { %p5755_p3 = pneg %p5754_p2 }
  0xd2   : > { %p5762_p11 = pnand %p5761_p8, %p5755_p3 }
  0xd4   : > { %5765 = shalt.err (!%p5762_p11)
}
  0xd5   : > { %s6063_s3 = smov 128   ;;  %s6064_s28 = smov 8  }
  0xd6   : > { %5450 = dma.hbm_to_vmem [thread:$0]  (!%p6270_p12), %s7180_s16, 1024, %s738_s24, [#allocation21], %s6063_s3, %s6063_s3, %s6064_s28  }
  0xd7   : > { %s7181_s1 = sld [smem:[#allocation41_spill]] }
  0xdd   : > { %s5766_s0 = scalar_lea.hbm %s7181_s1, 384 }
  0xde   : > { %p5767_p13 = scmp.ne.s32.totalorder %s7181_s1, %s5766_s0  ;;  %p5773_p5 = scmp.lt.u32.totalorder %s5766_s0, %s7181_s1 }
  0xe0   : > { %p5769_p1 = pnand %p5767_p13, %p6286_p0 }
  0xe2   : > { %p5770_p6 = pneg %p5769_p1 }
  0xe4   : > { %p5775_p9 = pnand %p5773_p5, %p5770_p6 }
  0xe6   : > { %5778 = shalt.err (!%p5775_p9)
}
  0xe7   : > { %s5779_s10 = scalar_lea.vmem %s597_s22, 384  ;;  %p5787_p4 = scmp.lt.s32.totalorder %s597_s22, %s597_s22 }
  0xe8   : > { %p5780_p10 = scmp.ne.s32.totalorder %s597_s22, %s5779_s10  ;;  %p5788_p7 = scmp.lt.s32.totalorder %s5779_s10, %s5779_s10 }
  0xea   : > { %p5782_p2 = pnand %p5780_p10, %p6286_p0  ;;  %p5789_p8 = por %p5788_p7, %p5787_p4 }
  0xec   : > { %p5783_p3 = pneg %p5782_p2 }
  0xee   : > { %p5790_p11 = pnand %p5789_p8, %p5783_p3 }
  0xf0   : > { %5793 = shalt.err (!%p5790_p11)
}
  0xf1   : > { %5417 = dma.hbm_to_vmem [thread:$0]  (!%p6270_p12), %s7181_s1, 384, %s597_s22, [#allocation3], %s6063_s3, %s6063_s3, %s6064_s28  }
  0xf2   : > { %s6065_s5 = smov [#allocation7]   ;;  %s6066_s0 = smov [#allocation10]  }
  0xf3   : > { %s624_s30 = sshll.u32 %s6065_s5, 4  ;;  %s645_s4 = sshll.u32 %s6066_s0, 4  ;;  %s625_s30 = int_to_ptr.vmem [resolvable:$true] %s624_s30  ;;  %s646_s4 = int_to_ptr.vmem [resolvable:$true] %s645_s4 }
  0xf4   : > { %s7182_s29 = sld [smem:[#allocation44_spill]] }
  0xfa   : > { %s5794_s25 = scalar_lea.hbm %s7182_s29, 16 }
  0xfb   : > { %p5795_p13 = scmp.ne.s32.totalorder %s7182_s29, %s5794_s25  ;;  %p5801_p5 = scmp.lt.u32.totalorder %s5794_s25, %s7182_s29 }
  0xfd   : > { %p5797_p1 = pnand %p5795_p13, %p6286_p0 }
  0xff   : > { %p5798_p6 = pneg %p5797_p1 }
 0x101   : > { %p5803_p9 = pnand %p5801_p5, %p5798_p6 }
 0x103   : > { %5806 = shalt.err (!%p5803_p9)
}
 0x104   : > { %s5807_s22 = scalar_lea.vmem %s625_s30, 16  ;;  %s5814_s3 = scalar_lea.vmem %s625_s30, 32 }
 0x105   : > { %p5808_p10 = scmp.ne.s32.totalorder %s625_s30, %s5807_s22  ;;  %p5815_p4 = scmp.lt.s32.totalorder %s625_s30, %s625_s30 }
 0x106   : > { %p5816_p7 = scmp.lt.s32.totalorder %s5814_s3, %s5807_s22 }
 0x107   : > { %p5810_p2 = pnand %p5808_p10, %p6286_p0 }
 0x108   : > { %p5817_p8 = por %p5816_p7, %p5815_p4 }
 0x109   : > { %p5811_p3 = pneg %p5810_p2 }
 0x10b   : > { %p5818_p11 = pnand %p5817_p8, %p5811_p3 }
 0x10d   : > { %5821 = shalt.err (!%p5818_p11)
}
 0x10e   : > { %5423 = dma.hbm_to_vmem [thread:$0]  (!%p6270_p12), %s7182_s29, 16, %s625_s30, [#allocation6]  }
 0x10f   : > { %s7183_s19 = sld [smem:[#allocation46_spill]] }
 0x115   : > { %s5822_s5 = scalar_lea.hbm %s7183_s19, 192 }
 0x116   : > { %p5823_p13 = scmp.ne.s32.totalorder %s7183_s19, %s5822_s5  ;;  %p5829_p5 = scmp.lt.u32.totalorder %s5822_s5, %s7183_s19 }
 0x118   : > { %p5825_p1 = pnand %p5823_p13, %p6286_p0 }
 0x11a   : > { %p5826_p6 = pneg %p5825_p1 }
 0x11c   : > { %p5831_p9 = pnand %p5829_p5, %p5826_p6 }
 0x11e   : > { %5834 = shalt.err (!%p5831_p9)
}
 0x11f   : > { %s5835_s24 = scalar_lea.vmem %s646_s4, 192  ;;  %p5843_p4 = scmp.lt.s32.totalorder %s646_s4, %s646_s4 }
 0x120   : > { %p5836_p10 = scmp.ne.s32.totalorder %s646_s4, %s5835_s24  ;;  %p5844_p7 = scmp.lt.s32.totalorder %s5835_s24, %s5835_s24 }
 0x122   : > { %p5838_p2 = pnand %p5836_p10, %p6286_p0  ;;  %p5845_p8 = por %p5844_p7, %p5843_p4 }
 0x124   : > { %p5839_p3 = pneg %p5838_p2 }
 0x126   : > { %p5846_p11 = pnand %p5845_p8, %p5839_p3 }
 0x128   : > { %5849 = shalt.err (!%p5846_p11)
}
 0x129   : > { %s6067_s30 = smov 64   ;;  %s6068_s22 = smov 4  }
 0x12a   : > { %5429 = dma.hbm_to_vmem [thread:$0]  (!%p6270_p12), %s7183_s19, 192, %s646_s4, [#allocation9], %s6067_s30, %s6067_s30, %s6068_s22  }
 0x12b   : > { %s6069_s28 = smov [#allocation13]   ;;  %s6070_s25 = smov [#allocation16]  }
 0x12c   : > { %s673_s13 = sshll.u32 %s6069_s28, 4  ;;  %s695_s5 = sshll.u32 %s6070_s25, 4  ;;  %s674_s13 = int_to_ptr.vmem [resolvable:$true] %s673_s13  ;;  %s696_s5 = int_to_ptr.vmem [resolvable:$true] %s695_s5 }
 0x12d   : > { %s5850_s27 = scalar_lea.hbm %s7094_s9, 16 }
 0x12e   : > { %p5851_p13 = scmp.ne.s32.totalorder %s7094_s9, %s5850_s27  ;;  %p5857_p5 = scmp.lt.u32.totalorder %s5850_s27, %s7094_s9 }
 0x130   : > { %p5853_p1 = pnand %p5851_p13, %p6286_p0 }
 0x132   : > { %p5854_p6 = pneg %p5853_p1 }
 0x134   : > { %p5859_p9 = pnand %p5857_p5, %p5854_p6 }
 0x136   : > { %5862 = shalt.err (!%p5859_p9)
}
 0x137   : > { %s5863_s4 = scalar_lea.vmem %s674_s13, 16  ;;  %s5870_s30 = scalar_lea.vmem %s674_s13, 32 }
 0x138   : > { %p5864_p10 = scmp.ne.s32.totalorder %s674_s13, %s5863_s4  ;;  %p5871_p4 = scmp.lt.s32.totalorder %s674_s13, %s674_s13 }
 0x139   : > { %p5872_p7 = scmp.lt.s32.totalorder %s5870_s30, %s5863_s4 }
 0x13a   : > { %p5866_p2 = pnand %p5864_p10, %p6286_p0 }
 0x13b   : > { %p5873_p8 = por %p5872_p7, %p5871_p4 }
 0x13c   : > { %p5867_p3 = pneg %p5866_p2 }
 0x13e   : > { %p5874_p11 = pnand %p5873_p8, %p5867_p3 }
 0x140   : > { %5877 = shalt.err (!%p5874_p11)
}
 0x141   : > { %5435 = dma.hbm_to_vmem [thread:$0]  (!%p6270_p12), %s7094_s9, 16, %s674_s13, [#allocation12]  }
 0x142   : > { %s5878_s26 = scalar_lea.hbm %s7096_s11, 64 }
 0x143   : > { %p5879_p13 = scmp.ne.s32.totalorder %s7096_s11, %s5878_s26  ;;  %p5885_p5 = scmp.lt.u32.totalorder %s5878_s26, %s7096_s11 }
 0x145   : > { %p5881_p1 = pnand %p5879_p13, %p6286_p0 }
 0x147   : > { %p5882_p6 = pneg %p5881_p1 }
 0x149   : > { %p5887_p9 = pnand %p5885_p5, %p5882_p6 }
 0x14b   : > { %5890 = shalt.err (!%p5887_p9)
}
 0x14c   : > { %s5891_s27 = scalar_lea.vmem %s696_s5, 64  ;;  %p5899_p4 = scmp.lt.s32.totalorder %s696_s5, %s696_s5 }
 0x14d   : > { %p5892_p10 = scmp.ne.s32.totalorder %s696_s5, %s5891_s27  ;;  %p5900_p7 = scmp.lt.s32.totalorder %s5891_s27, %s5891_s27 }
 0x14f   : > { %p5894_p2 = pnand %p5892_p10, %p6286_p0  ;;  %p5901_p8 = por %p5900_p7, %p5899_p4 }
 0x151   : > { %p5895_p3 = pneg %p5894_p2 }
 0x153   : > { %p5902_p11 = pnand %p5901_p8, %p5895_p3 }
 0x155   : > { %5905 = shalt.err (!%p5902_p11)
}
 0x156   : > { %5441 = dma.hbm_to_vmem [thread:$0]  (!%p6270_p12), %s7096_s11, 64, %s696_s5, [#allocation15]  }
 0x157   : > { %s6071_s24 = smov [#allocation19]   ;;  %s6072_s30 = smov [#allocation22]  }
 0x158   : > { %s724_s4 = sshll.u32 %s6071_s24, 4  ;;  %s750_s22 = sshll.u32 %s6072_s30, 4  ;;  %s725_s4 = int_to_ptr.vmem [resolvable:$true] %s724_s4  ;;  %s751_s22 = int_to_ptr.vmem [resolvable:$true] %s750_s22 }
 0x159   : > { %s5906_s1 = scalar_lea.hbm %s7100_s15, 32 }
 0x15a   : > { %p5907_p13 = scmp.ne.s32.totalorder %s7100_s15, %s5906_s1  ;;  %p5913_p5 = scmp.lt.u32.totalorder %s5906_s1, %s7100_s15 }
 0x15c   : > { %p5909_p1 = pnand %p5907_p13, %p6286_p0 }
 0x15e   : > { %p5910_p6 = pneg %p5909_p1 }
 0x160   : > { %p5915_p9 = pnand %p5913_p5, %p5910_p6 }
 0x162   : > { %5918 = shalt.err (!%p5915_p9)
}
 0x163   : > { %s5919_s5 = scalar_lea.vmem %s725_s4, 32  ;;  %p5927_p4 = scmp.lt.s32.totalorder %s725_s4, %s725_s4 }
 0x164   : > { %p5920_p10 = scmp.ne.s32.totalorder %s725_s4, %s5919_s5  ;;  %p5928_p7 = scmp.lt.s32.totalorder %s5919_s5, %s5919_s5 }
 0x166   : > { %p5922_p2 = pnand %p5920_p10, %p6286_p0  ;;  %p5929_p8 = por %p5928_p7, %p5927_p4 }
 0x168   : > { %p5923_p3 = pneg %p5922_p2 }
 0x16a   : > { %p5930_p11 = pnand %p5929_p8, %p5923_p3 }
 0x16c   : > { %5933 = shalt.err (!%p5930_p11)
}
 0x16d   : > { %s7184_s23 = smov 1   ;;  %s7185_s27 = smov 16  }
 0x16e   : > { %5447 = dma.hbm_to_vmem [thread:$0]  (!%p6270_p12), %s7100_s15, 32, %s725_s4, [#allocation18], %s7185_s27, %s7185_s27, %s7184_s23  }
 0x16f   : > { %s5934_s3 = scalar_lea.hbm %s7102_s17, 32 }
 0x170   : > { %p5935_p13 = scmp.ne.s32.totalorder %s7102_s17, %s5934_s3  ;;  %p5941_p5 = scmp.lt.u32.totalorder %s5934_s3, %s7102_s17 }
 0x172   : > { %p5937_p1 = pnand %p5935_p13, %p6286_p0 }
 0x174   : > { %p5938_p6 = pneg %p5937_p1 }
 0x176   : > { %p5943_p9 = pnand %p5941_p5, %p5938_p6 }
 0x178   : > { %5946 = shalt.err (!%p5943_p9)
}
 0x179   : > { %s5947_s25 = scalar_lea.vmem %s751_s22, 32  ;;  %p5955_p4 = scmp.lt.s32.totalorder %s751_s22, %s751_s22 }
 0x17a   : > { %p5948_p10 = scmp.ne.s32.totalorder %s751_s22, %s5947_s25  ;;  %p5956_p7 = scmp.lt.s32.totalorder %s5947_s25, %s5947_s25 }
 0x17c   : > { %p5950_p2 = pnand %p5948_p10, %p6286_p0  ;;  %p5957_p8 = por %p5956_p7, %p5955_p4 }
 0x17e   : > { %p5951_p3 = pneg %p5950_p2 }
 0x180   : > { %p5958_p11 = pnand %p5957_p8, %p5951_p3 }
 0x182   : > { %5961 = shalt.err (!%p5958_p11)
}
 0x183   : > { %5453 = dma.hbm_to_vmem [thread:$0]  (!%p6270_p12), %s7102_s17, 32, %s751_s22, [#allocation21], %s7185_s27, %s7185_s27, %s7184_s23  }
 0x184   : > { %p7186_p13 = scmp.ne.s32.totalorder %s7171_s8, 0 }
 0x185   : > { %p7187_p0 = scmp.eq.s32.totalorder (!%p7186_p13), %s6234_s6, 0 }
 0x186   : > { %792 = sbr.rel (%p7186_p13) target bundleno = 10301 (0x283d), region = 116 }
 0x18d   : > { %6007 = dma.done.wait (%p7187_p0), [#allocation3], 384   ;;  %p7188_p1 = pmov %p7187_p0 }
 0x18e   : > { %p7189_p6 = pmov %p7187_p0 }
 0x18f   : > { %6009 = vsyncadd (%p7188_p1), [#allocation3], 4294966912 }
 0x190   : > { %6011 = dma.done.wait (%p7189_p6), [#allocation6], 32   ;;  %p7190_p5 = pmov %p7187_p0 }
 0x191   : > { %p7191_p9 = pmov %p7187_p0 }
 0x192   : > { %6013 = vsyncadd (%p7190_p5), [#allocation6], 4294967264 }
 0x193   : > { %6015 = dma.done.wait (%p7191_p9), [#allocation9], 208   ;;  %p7192_p12 = pmov %p7187_p0 }
 0x194   : > { %p7193_p10 = pmov %p7187_p0 }
 0x195   : > { %6017 = vsyncadd (%p7192_p12), [#allocation9], 4294967088 }
 0x196   : > { %6019 = dma.done.wait (%p7193_p10), [#allocation12], 32   ;;  %p7194_p2 = pmov %p7187_p0 }
 0x197   : > { %p7195_p3 = pmov %p7187_p0 }
 0x198   : > { %6021 = vsyncadd (%p7194_p2), [#allocation12], 4294967264 }
 0x199   : > { %6023 = dma.done.wait (%p7195_p3), [#allocation15], 80   ;;  %p7196_p4 = pmov %p7187_p0 }
 0x19a   : > { %p7197_p7 = pmov %p7187_p0 }
 0x19b   : > { %6025 = vsyncadd (%p7196_p4), [#allocation15], 4294967216 }
 0x19c   : > { %6027 = dma.done.wait (%p7197_p7), [#allocation18], 64   ;;  %p7198_p8 = pmov %p7187_p0 }
 0x19d   : > { %p7199_p11 = pmov %p7187_p0 }
 0x19e   : > { %6029 = vsyncadd (%p7198_p8), [#allocation18], 4294967232 }
 0x19f   : > { %6031 = dma.done.wait (%p7199_p11), [#allocation21], 1056   ;;  %p7200_p13 = pmov %p7187_p0 }
 0x1a0   : > { %p905_p0 = scmp.lt.s32.totalorder %s6234_s6, 1  ;;  %v6073_v0 = vmov 0.0|0.0   ;;  %vm6074_vm0 = vmmov 0   ;;  %v6075_v1 = vmov 0.0   ;;  %s7201_s5 = sld [smem:[#allocation40_spill]]  ;;  %v912_v5 = vld [vmem:[#allocation2] sm:$0xff] }
 0x1a1   : > { %6033 = vsyncadd (%p7200_p13), [#allocation21], 4294966240  ;;  %5285 = vmatprep.subr.bf16.mxu1 %v6073_v0  ;;  %5003 = vmatprep.mubr.msk.f32.mxu1 %vm6074_vm0, %v6075_v1  ;;  %vm913_vm1 = vcmask 130048   ;;  %v989_v6 = vld [vmem:[#allocation2 + $0x8] sm:$0xff]  ;;  %s7202_s10 = sld [smem:[#allocation42_spill]]  ;;  %vm1069_vm2 = vcmask 1043456  }
 0x1a2   : > { %s906_s8 = scalar_select %p905_p0, %s6234_s6, 1  ;;  %5013 = vmatprep.subr.mxu0 %v6075_v1  ;;  %5015 = vmatprep.mubr.msk.f32.mxu0 %vm6074_vm0, %v6075_v1  ;;  %vm1065_vm3 = vcmask 31744   ;;  %v1220_v13 = vld [vmem:[#allocation2 + $0x10] sm:$0xff]  ;;  %v4770_v23 = vld [vmem:[#allocation5] ss:$0 sm:$0xff]  ;;  %vm1383_vm4 = vcmask 261120  }
 0x1a3   : > { %v4771_v37 = vld [vmem:[#allocation7] ss:$0 sm:$0xff]  ;;  %v4772_v39 = vld [vmem:[#allocation8] ss:$0 sm:$0xff]  ;;  %s7203_s28 = sld [smem:[#allocation47_spill]]  ;;  %vm1415_vm5 = vcmask 64512  }
 0x1a4   : > { %s4876_s7 = sshll.u32 %s906_s8, 4  ;;  %v1494_v47 = vld [vmem:[#allocation10 + $0x4] sm:$0xf]  ;;  %v1414_v48 = vld [vmem:[#allocation10] sm:$0xf]  ;;  %vm1883_vm6 = vcmask 257024  }
 0x1a5   : > { %s6076_s16 = smov 96   ;;  %s6077_s1 = smov 88   ;;  %vm2082_vm7 = vcmask 27648   ;;  %vm3109_vm8 = vcmask 523264   ;;  %vm4531_vm9 = vcmask 253952  }
 0x1a6   : > { %s909_s23 = scalar_lea.vmem %s7201_s5, %s4876_s7  ;;  %s6078_s26 = smov 64  }
 0x1a7   : > { %v910_v2 = vld [vmem:[%s909_s23] sm:$0xff]  ;;  %v911_v3 = vld [vmem:[%s909_s23 + $0x8] sm:$0xff]  ;;  %s6080_s8 = smov 56   ;;  %s6081_s7 = smov 112  }
 0x1a8   : > { %v5286_v4 = vpack.c.bf16 %v911_v3, %v910_v2  ;;  %v987_v7 = vld [vmem:[%s7202_s10] sm:$0xf]  ;;  %v4761_v8 = vld [vmem:[%s7202_s10 + $0x4] sm:$0xf]  ;;  %v4767_v14 = vld [vmem:[%s7202_s10 + $0x8] sm:$0xf] }
 0x1a9   : > { %5014 = vmatpush3.msk.msra.mxu0 %vm1069_vm2, %v4761_v8  ;;  %s7204_s25 = smov %s7203_s28  ;;  %v4775_v41 = vld [vmem:[%s7203_s28 + $0x20] sm:$0xff]  ;;  %v1720_v2 = vld [vmem:[#allocation10 + $0x8] sm:$0xf]  ;;  %s6079_s28 = smov 120  }
 0x1aa   : > { %5287 = vmatpush3.bf16.msra.mxu1 %v5286_v4  ;;  %5291 = vmatprep.subr.bf16.mxu0 %v6073_v0  ;;  %v4776_v43 = vld [vmem:[%s7204_s25 + $0x28] sm:$0xff]  ;;  %v1489_v44 = vld [vmem:[%s7204_s25] sm:$0xff]  ;;  %v4777_v51 = vld [vmem:[%s7204_s25 + $0x30] sm:$0xff]  ;;  %s6082_s2 = smov 80   ;;  %s7144_s23 = smov 72  }
 0x1ab   : > { %5288 = vmatprep.subr.bf16.mxu1 %v6073_v0  ;;  %v1490_v45 = vld [vmem:[%s7204_s25 + $0x8] sm:$0xff]  ;;  %v5295_v49 = vpack.c.bf16 %v4776_v43, %v4775_v41  ;;  %v4778_v52 = vld [vmem:[%s7204_s25 + $0x38] sm:$0xff]  ;;  %v1491_v54 = vld [vmem:[%s7204_s25 + $0x10] sm:$0xff]  ;;  %s7143_s27 = smov 104   ;;  %s6085_s13 = smov 48  }
 0x1ac   : > { %v5301_v50 = vpack.c.bf16 %v1490_v45, %v1489_v44  ;;  %v5298_v53 = vpack.c.bf16 %v4778_v52, %v4777_v51  ;;  %v1492_v55 = vld [vmem:[%s7204_s25 + $0x18] sm:$0xff]  ;;  %v4782_v57 = vld [vmem:[%s7204_s25 + $0x40] sm:$0xff]  ;;  %v4783_v58 = vld [vmem:[%s7204_s25 + $0x48] sm:$0xff]  ;;  %s7142_s3 = smov 40   ;;  %s7207_s24 = sld [smem:[#allocation53_spill]] }
 0x1ad   : > { %5004 = vmatmul.mubr.msk.f32.vlgmr.msra.gmra.mrb[0].mxu1 %vm913_vm1, %v912_v5  ;;  %v5304_v56 = vpack.c.bf16 %v1492_v55, %v1491_v54  ;;  %v5307_v59 = vpack.c.bf16 %v4783_v58, %v4782_v57  ;;  %v4784_v3 = vld [vmem:[%s7204_s25 + $0x50] sm:$0xff]  ;;  %s7211_s0 = smov 40   ;;  %s7213_s5 = sld [smem:[#allocation38_spill]] }
 0x1ae   : > { %5290 = vmatpush3.bf16.msra.mxu1 %v5286_v4  ;;  %5010 = vmatprep.mubr.msk.f32.mxu1 %vm6074_vm0, %v6075_v1  ;;  %s4873_s30 = sshll.u32 %s6234_s6, 4  ;;  %s6087_s6 = smov [#allocation23]  }
 0x1af   : > { %5018 = vmatprep.subr.mxu1 %v6075_v1 }
 0x1b1   : > { %5011 = vmatmul.mubr.msk.f32.vlgmr.msra.gmra.mrb[2].mxu1 %vm913_vm1, %v989_v6 }
 0x1b2   : > { %5020 = vmatprep.mubr.msk.f32.mxu1 %vm6074_vm0, %v6075_v1  ;;  %5019 = vmatpush3.msk.msra.mxu1 %vm1069_vm2, %v987_v7 }
 0x1b3   : > { %5030 = vmatprep.subr.mxu1 %v6075_v1  ;;  %p7216_p6 = scmp.ne.s32.totalorder %s7213_s5, 0 }
 0x280   : > { %v983_v9 = vpop.f32.mrb[0].mxu1 }
 0x281   : > { %v5005_v10 = vpop.f32.mrb[1].mxu1  ;;  %5021 = vmatmul.mubr.msk.f32.vlgmr.msra.gmra.mrb[4].mxu1 %vm1065_vm3, %v983_v9 }
 0x282   : > { %5032 = vmatprep.mubr.msk.f32.mxu1 %vm6074_vm0, %v6075_v1  ;;  %5031 = vmatpush3.msk.msra.mxu1 %vm1069_vm2, %v4767_v14  ;;  %v4787_v14 = vld [vmem:[#allocation11] ss:$0 sm:$0xff] }
 0x283   : > { %5040 = vmatprep.subr.mxu1 %v6075_v1 }
 0x284   : > { %v1059_v11 = vpop.f32.mrb[2].mxu1 }
 0x285   : > { %v5012_v12 = vpop.f32.mrb[3].mxu1  ;;  %5016 = vmatmul.mubr.msk.f32.vlgmr.msra.gmra.mrb[0].mxu0 %vm1065_vm3, %v1059_v11 }
 0x286   : > { %5293 = vmatpush3.bf16.msra.mxu0 %v5286_v4  ;;  %5027 = vmatprep.mubr.msk.f32.mxu0 %vm6074_vm0, %v6075_v1  ;;  %v4785_v4 = vld [vmem:[%s7204_s25 + $0x58] sm:$0xff] }
 0x287   : > { %5035 = vmatprep.subr.mxu0 %v6075_v1  ;;  %v5310_v5 = vpack.c.bf16 %v4785_v4, %v4784_v3 }
 0x289   : > { %5028 = vmatmul.mubr.msk.f32.vlgmr.msra.gmra.mrb[2].mxu0 %vm913_vm1, %v1220_v13 }
 0x28a   : > { %5037 = vmatprep.mubr.msk.f32.mxu0 %vm6074_vm0, %v6075_v1 }
 0x354   : > { %v1215_v15 = vpop.f32.mrb[4].mxu1 }
 0x355   : > { %v5022_v16 = vpop.f32.mrb[5].mxu1 }
 0x358   : > { %v1139_v17 = vpop.f32.mrb[0].mxu0 }
 0x359   : > { %v1216_v18 = vadd.f32 %v1215_v15, %v1139_v17  ;;  %v5017_v19 = vpop.f32.mrb[1].mxu0 }
 0x35c   : > { %v1290_v20 = vpop.f32.mrb[2].mxu0 }
 0x35d   : > { %v5029_v21 = vpop.f32.mrb[3].mxu0  ;;  %5033 = vmatmul.mubr.msk.f32.vlgmr.msra.gmra.mrb[6].mxu1 %vm1065_vm3, %v1290_v20 }
 0x35e   : > { %5042 = vmatprep.mubr.msk.f32.mxu1 %vm6074_vm0, %v6075_v1 }
 0x430   : > { %v1368_v22 = vpop.f32.mrb[6].mxu1 }
 0x431   : > { %v1372_v24 = vadd.f32 %v1368_v22, %v1216_v18  ;;  %v5034_v25 = vpop.f32.mrb[7].mxu1 }
 0x432   : > { %v1915_v25 = vld [vmem:[%s7097_s12 + $0x8] sm:$0xff] }
 0x433   : > { %v1380_v26 = vadd.f32 %v4770_v23, %v1372_v24  ;;  %v1914_v24 = vld [vmem:[%s7097_s12] sm:$0xff] }
 0x435   : > { %v1384_v27 = vsel %vm1383_vm4, %v1380_v26, 0.0 }
 0x436   : > { %1385 = vadd.xlane.f32.xlu0 %v1384_v27  ;;  %v1916_v27 = vld [vmem:[%s7097_s12 + $0x10] sm:$0xff] }
 0x4c3   : > { %v1386_v28 = vpop.xlane.xlu0 %1385 }
 0x4c4   : > { %v1388_v29 = vmul.f32 0.03125, %v1386_v28  ;;  %v1917_v28 = vld [vmem:[%s7097_s12 + $0x18] sm:$0xff] }
 0x4c6   : > { %v1389_v30 = vsub.f32 %v1380_v26, %v1388_v29  ;;  %v5313_v26 = vpack.c.bf16 %v1915_v25, %v1914_v24  ;;  %v5316_v29 = vpack.c.bf16 %v1917_v28, %v1916_v27 }
 0x4c8   : > { %v1390_v31 = vmul.f32 %v1389_v30, %v1389_v30 }
 0x4ca   : > { %v1391_v32 = vsel %vm1383_vm4, %v1390_v31, 0.0 }
 0x4cb   : > { %1392 = vadd.xlane.f32.xlu0 %v1391_v32 }
 0x558   : > { %v1393_v33 = vpop.xlane.xlu0 %1392 }
 0x559   : > { %v1395_v34 = vmul.f32 0.032258064, %v1393_v33 }
 0x55b   : > { %v1396_v35 = vadd.f32 1e-05, %v1395_v34  ;;  %v4788_v34 = vld [vmem:[#allocation13] ss:$0 sm:$0xff] }
 0x55d   : > { %5550 = vrsqrt.f32 %v1396_v35 }
 0x567   : > { %v5551_v36 = vpop.eup %5550 }
 0x568   : > { %v1398_v38 = vmul.f32 %v5551_v36, %v1389_v30  ;;  %v4789_v36 = vld [vmem:[#allocation14] ss:$0 sm:$0xff] }
 0x56a   : > { %v1405_v40 = vmul.f32 %v4771_v37, %v1398_v38 }
 0x56c   : > { %v1412_v42 = vadd.f32 %v4772_v39, %v1405_v40  ;;  %v1912_v39 = vld [vmem:[#allocation16] sm:$0xf] }
 0x56e   : > { %v1413_v46 = vmax.f32 %v1412_v42, 0.0  ;;  %v4790_v42 = vld [vmem:[#allocation17] ss:$0 sm:$0xff] }
 0x570   : > { %5036 = vmatpush3.msra.mxu0 %v1413_v46  ;;  %5041 = vmatpush3.msra.mxu1 %v1413_v46 }
 0x571   : > { %5043 = vmatmul.mubr.msk.f32.vlgmr.msra.gmra.mrb[8].mxu1 %vm1415_vm5, %v1494_v47  ;;  %5038 = vmatmul.mubr.msk.f32.vlgmr.msra.gmra.mrb[4].mxu0 %vm1415_vm5, %v1414_v48 }
 0x572   : > { %5294 = vmatprep.subr.bf16.mxu0 %v6073_v0  ;;  %5300 = vmatprep.subr.bf16.mxu1 %v6073_v0 }
 0x573   : > { %5296 = vmatpush3.bf16.msra.mxu0 %v5295_v49  ;;  %5302 = vmatpush3.bf16.msra.mxu1 %v5301_v50 }
 0x574   : > { %5297 = vmatprep.subr.bf16.mxu0 %v6073_v0  ;;  %5303 = vmatprep.subr.bf16.mxu1 %v6073_v0 }
 0x575   : > { %5053 = vmatprep.mubr.msk.f32.mxu0 %vm6074_vm0, %v6075_v1  ;;  %5064 = vmatprep.mubr.msk.f32.mxu1 %vm6074_vm0, %v6075_v1 }
 0x577   : > { %5299 = vmatpush3.bf16.msra.mxu0 %v5298_v53  ;;  %5305 = vmatpush3.bf16.msra.mxu1 %v5304_v56 }
 0x578   : > { %5067 = vmatprep.subr.mxu0 %v6075_v1  ;;  %5306 = vmatprep.subr.bf16.mxu1 %v6073_v0 }
 0x644   : > { %v1564_v60 = vpop.f32.mrb[8].mxu1  ;;  %v1485_v61 = vpop.f32.mrb[4].mxu0 }
 0x645   : > { %5054 = vmatmul.mubr.msk.f32.vlgmr.msra.gmra.mrb[6].mxu0 %vm1383_vm4, %v1564_v60  ;;  %v5044_v62 = vpop.f32.mrb[9].mxu1  ;;  %5065 = vmatmul.mubr.msk.f32.vlgmr.msra.gmra.mrb[10].mxu1 %vm1383_vm4, %v1485_v61  ;;  %v5039_v63 = vpop.f32.mrb[5].mxu0 }
 0x646   : > { %5068 = vmatpush3.msra.mxu0 %v1413_v46  ;;  %5069 = vmatprep.mubr.msk.f32.mxu0 %vm6074_vm0, %v6075_v1  ;;  %v1998_v62 = vld [vmem:[%s7099_s14] sm:$0xff] }
 0x647   : > { %5308 = vmatpush3.bf16.msra.mxu1 %v5307_v59  ;;  %5080 = vmatprep.mubr.msk.f32.mxu1 %vm6074_vm0, %v6075_v1 }
 0x648   : > { %5309 = vmatprep.subr.bf16.mxu1 %v6073_v0  ;;  %5312 = vmatprep.subr.bf16.mxu0 %v6073_v0 }
 0x649   : > { %5070 = vmatmul.mubr.msk.f32.vlgmr.msra.gmra.mrb[8].mxu0 %vm1415_vm5, %v1720_v2 }
 0x64a   : > { %5091 = vmatprep.mubr.msk.f32.mxu0 %vm6074_vm0, %v6075_v1  ;;  %5314 = vmatpush3.bf16.msra.mxu0 %v5313_v26 }
 0x64b   : > { %5311 = vmatpush3.bf16.msra.mxu1 %v5310_v5  ;;  %5315 = vmatprep.subr.bf16.mxu0 %v6073_v0 }
 0x64c   : > { %5094 = vmatprep.subr.mxu1 %v6075_v1 }
 0x64e   : > { %5317 = vmatpush3.bf16.msra.mxu0 %v5316_v29 }
 0x64f   : > { %5099 = vmatprep.subr.mxu0 %v6075_v1 }
 0x718   : > { %v1642_v6 = vpop.f32.mrb[6].mxu0  ;;  %v1715_v7 = vpop.f32.mrb[10].mxu1 }
 0x719   : > { %v5055_v8 = vpop.f32.mrb[7].mxu0  ;;  %v1716_v9 = vadd.f32 %v1715_v7, %v1642_v6  ;;  %v5066_v10 = vpop.f32.mrb[11].mxu1 }
 0x71c   : > { %v1790_v11 = vpop.f32.mrb[8].mxu0 }
 0x71d   : > { %5081 = vmatmul.mubr.msk.f32.vlgmr.msra.gmra.mrb[12].mxu1 %vm1383_vm4, %v1790_v11  ;;  %v5071_v12 = vpop.f32.mrb[9].mxu0 }
 0x71e   : > { %5096 = vmatprep.mubr.msk.f32.mxu1 %vm6074_vm0, %v6075_v1 }
 0x7f0   : > { %v1868_v13 = vpop.f32.mrb[12].mxu1 }
 0x7f1   : > { %v1872_v15 = vadd.f32 %v1868_v13, %v1716_v9  ;;  %v5082_v16 = vpop.f32.mrb[13].mxu1 }
 0x7f3   : > { %v1880_v17 = vadd.f32 %v4787_v14, %v1872_v15 }
 0x7f5   : > { %v1884_v18 = vsel %vm1883_vm6, %v1880_v17, 0.0 }
 0x7f6   : > { %1885 = vadd.xlane.f32.xlu1 %v1884_v18 }
 0x883   : > { %v1886_v19 = vpop.xlane.xlu1 %1885 }
 0x884   : > { %v1887_v20 = vmul.f32 0.03125, %v1886_v19  ;;  %v1999_v19 = vld [vmem:[%s7099_s14 + $0x8] sm:$0xff] }
 0x886   : > { %v1888_v21 = vsub.f32 %v1880_v17, %v1887_v20 }
 0x888   : > { %v1889_v22 = vmul.f32 %v1888_v21, %v1888_v21 }
 0x88a   : > { %v1890_v23 = vsel %vm1883_vm6, %v1889_v22, 0.0 }
 0x88b   : > { %1891 = vadd.xlane.f32.xlu1 %v1890_v23 }
 0x918   : > { %v1892_v30 = vpop.xlane.xlu1 %1891 }
 0x919   : > { %v1893_v31 = vmul.f32 0.032258064, %v1892_v30  ;;  %v4797_v30 = vld [vmem:[#allocation19] ss:$0 sm:$0xff] }
 0x91b   : > { %v1894_v32 = vadd.f32 1e-05, %v1893_v31 }
 0x91d   : > { %5552 = vrsqrt.f32 %v1894_v32 }
 0x927   : > { %v5553_v33 = vpop.eup %5552 }
 0x928   : > { %v1896_v35 = vmul.f32 %v5553_v33, %v1888_v21 }
 0x92a   : > { %v1903_v37 = vmul.f32 %v4788_v34, %v1896_v35 }
 0x92c   : > { %v1910_v38 = vadd.f32 %v4789_v36, %v1903_v37 }
 0x92e   : > { %v1911_v40 = vmax.f32 %v1910_v38, 0.0 }
 0x930   : > { %v6697_v41 = vadd.f32 %v1912_v39, %v1911_v40 }
 0x932   : > { %5092 = vmatmul.mubr.msk.f32.vlgmr.msra.gmra.mrb[10].mxu0 %vm1383_vm4, %v6697_v41 }
 0x933   : > { %5101 = vmatprep.mubr.msk.f32.mxu0 %vm6074_vm0, %v6075_v1 }
 0xa05   : > { %v1994_v43 = vpop.f32.mrb[10].mxu0 }
 0xa06   : > { %v6703_v44 = vadd.f32 %v4790_v42, %v1994_v43  ;;  %v5093_v45 = vpop.f32.mrb[11].mxu0  ;;  %v2000_v42 = vld [vmem:[%s7099_s14 + $0x10] sm:$0xff] }
 0xa08   : > { %2005 = vrot.lane.b32.xlu0 %v6703_v44, %s6076_s16  ;;  %v6711_v47 = vmul.f32 0.35355338, %v6703_v44 }
 0xa0c   : > { %2253 = vrot.lane.b32.xlu0 %v6703_v44, %s6077_s1 }
 0xa7a   : > { %v2006_v46 = vpop.permute.xlu0 %2005 }
 0xa7b   : > { %5095 = vmatpush3.xpose.msk.msra.mxu1 %vm1415_vm5, %v2006_v46 }
 0xa7c   : > { %5104 = vmatprep.subr.mxu1 %v6075_v1 }
 0xa7e   : > { %5097 = vmatmul.mubr.msk.f32.vlgmr.msra.gmra.mrb[14].mxu1 %vm1415_vm5, %v6711_v47  ;;  %v2254_v60 = vpop.permute.xlu0 %2253 }
 0xa7f   : > { %5106 = vmatprep.mubr.msk.f32.mxu1 %vm6074_vm0, %v6075_v1  ;;  %5105 = vmatpush3.msra.mxu1 %v1998_v62 }
 0xa80   : > { %5114 = vmatprep.subr.mxu1 %v6075_v1 }
 0xb51   : > { %v2078_v48 = vpop.f32.mrb[14].mxu1 }
 0xb52   : > { %v5098_v49 = vpop.f32.mrb[15].mxu1  ;;  %v2083_v50 = vsel %vm2082_vm7, %v2078_v48, -inf }
 0xb53   : > { %2084 = vmax.xlane.f32.xlu1 %v2083_v50 }
 0xb64   : > { %2094 = vrot.lane.b32.xlu1 %v6703_v44, %s6078_s26 }
 0xbe0   : > { %v2085_v51 = vpop.xlane.xlu1 %2084 }
 0xbe1   : > { %v2086_v52 = vsub.f32 %v2078_v48, %v2085_v51 }
 0xbe3   : > { %v2087_v53 = vmul.f32 1.442695, %v2086_v52 }
 0xbe4   : > { %v2095_v54 = vpop.permute.xlu1 %2094 }
 0xbe5   : > { %5554 = vpow2.f32 %v2087_v53  ;;  %5100 = vmatpush3.msk.msra.mxu0 %vm1069_vm2, %v2095_v54 }
 0xbe6   : > { %5109 = vmatprep.subr.mxu0 %v6075_v1 }
 0xbef   : > { %v5555_v55 = vpop.eup %5554 }
 0xbf0   : > { %v2089_v56 = vsel %vm2082_vm7, %v5555_v55, 0.0 }
 0xbf1   : > { %2090 = vadd.xlane.f32.xlu1 %v2089_v56 }
 0xc02   : > { %2251 = vrot.lane.b32.xlu1 %v6711_v47, %s6079_s28 }
 0xc7e   : > { %v2091_v57 = vpop.xlane.xlu1 %2090 }
 0xc7f   : > { %5556 = vrcp.f32 %v2091_v57 }
 0xc82   : > { %v2252_v61 = vpop.permute.xlu1 %2251 }
 0xc89   : > { %v5557_v58 = vpop.eup %5556 }
 0xc8a   : > { %v2093_v59 = vmul.f32 %v5557_v58, %v5555_v55 }
 0xc8c   : > { %5102 = vmatmul.mubr.msk.f32.vlgmr.msra.gmra.mrb[12].mxu0 %vm1065_vm3, %v2093_v59 }
 0xc8d   : > { %5110 = vmatpush3.xpose.msk.msra.mxu0 %vm1415_vm5, %v2254_v60  ;;  %5111 = vmatprep.mubr.msk.f32.mxu0 %vm6074_vm0, %v6075_v1  ;;  %v2001_v60 = vld [vmem:[%s7099_s14 + $0x18] sm:$0xff] }
 0xc8e   : > { %5119 = vmatprep.subr.mxu0 %v6075_v1 }
 0xc90   : > { %5112 = vmatmul.mubr.msk.f32.vlgmr.msra.gmra.mrb[14].mxu0 %vm1415_vm5, %v2252_v61 }
 0xc91   : > { %5121 = vmatprep.mubr.msk.f32.mxu0 %vm6074_vm0, %v6075_v1  ;;  %5120 = vmatpush3.msra.mxu0 %v1999_v19 }
 0xc92   : > { %5129 = vmatprep.subr.mxu0 %v6075_v1 }
 0xd5f   : > { %v2167_v63 = vpop.f32.mrb[12].mxu0 }
 0xd60   : > { %v5103_v2 = vpop.f32.mrb[13].mxu0  ;;  %5107 = vmatmul.mubr.msk.f32.vlgmr.msra.gmra.mrb[16].mxu1 %vm1415_vm5, %v2167_v63 }
 0xd61   : > { %5116 = vmatprep.mubr.msk.f32.mxu1 %vm6074_vm0, %v6075_v1 }
 0xd63   : > { %v2325_v3 = vpop.f32.mrb[14].mxu0 }
 0xd64   : > { %v5113_v4 = vpop.f32.mrb[15].mxu0  ;;  %v2329_v5 = vsel %vm2082_vm7, %v2325_v3, -inf }
 0xd65   : > { %2330 = vmax.xlane.f32.xlu0 %v2329_v5 }
 0xd7b   : > { %2340 = vrot.lane.b32.xlu0 %v6703_v44, %s6080_s8 }
 0xd7f   : > { %2491 = vrot.lane.b32.xlu0 %v6711_v47, %s6081_s7 }
 0xdf2   : > { %v2331_v6 = vpop.xlane.xlu0 %2330 }
 0xdf3   : > { %v2332_v7 = vsub.f32 %v2325_v3, %v2331_v6 }
 0xdf5   : > { %v2333_v8 = vmul.f32 1.442695, %v2332_v7 }
 0xdf6   : > { %v2341_v9 = vpop.permute.xlu0 %2340 }
 0xdf7   : > { %5558 = vpow2.f32 %v2333_v8  ;;  %5115 = vmatpush3.msk.msra.mxu1 %vm1069_vm2, %v2341_v9 }
 0xdf8   : > { %5124 = vmatprep.subr.mxu1 %v6075_v1 }
 0xdfa   : > { %v2492_v18 = vpop.permute.xlu0 %2491 }
 0xe01   : > { %v5559_v10 = vpop.eup %5558 }
 0xe02   : > { %v2335_v11 = vsel %vm2082_vm7, %v5559_v10, 0.0 }
 0xe03   : > { %2336 = vadd.xlane.f32.xlu1 %v2335_v11  ;;  %v3001_v11 = vld [vmem:[#allocation20] sm:$0xff] }
 0xe14   : > { %2493 = vrot.lane.b32.xlu1 %v6703_v44, %s6082_s2 }
 0xe33   : > { %v2240_v12 = vpop.f32.mrb[16].mxu1 }
 0xe34   : > { %v5108_v13 = vpop.f32.mrb[17].mxu1  ;;  %v2250_v31 = vadd.f32 %v4797_v30, %v2240_v12  ;;  %v3002_v12 = vld [vmem:[#allocation20 + $0x8] sm:$0xff] }
 0xe35   : > { %v5319_v13 = vpack.c.bf16 %v3002_v12, %v3001_v11 }
 0xe90   : > { %v2337_v14 = vpop.xlane.xlu1 %2336 }
 0xe91   : > { %5560 = vrcp.f32 %v2337_v14  ;;  %v3003_v14 = vld [vmem:[#allocation20 + $0x10] sm:$0xff] }
 0xe94   : > { %v2494_v17 = vpop.permute.xlu1 %2493 }
 0xe9b   : > { %v5561_v15 = vpop.eup %5560 }
 0xe9c   : > { %v2339_v16 = vmul.f32 %v5561_v15, %v5559_v10  ;;  %v3004_v15 = vld [vmem:[#allocation20 + $0x18] sm:$0xff] }
 0xe9e   : > { %5117 = vmatmul.mubr.msk.f32.vlgmr.msra.gmra.mrb[18].mxu1 %vm1065_vm3, %v2339_v16  ;;  %v5322_v16 = vpack.c.bf16 %v3004_v15, %v3003_v14  ;;  %v4825_v15 = vld [vmem:[#allocation17 + $0x1] ss:$0 sm:$0xff] }
 0xe9f   : > { %5125 = vmatpush3.xpose.msk.msra.mxu1 %vm1415_vm5, %v2494_v17  ;;  %5126 = vmatprep.mubr.msk.f32.mxu1 %vm6074_vm0, %v6075_v1 }
 0xea0   : > { %5134 = vmatprep.subr.mxu1 %v6075_v1 }
 0xea2   : > { %5127 = vmatmul.mubr.msk.f32.vlgmr.msra.gmra.mrb[20].mxu1 %vm1415_vm5, %v2492_v18 }
 0xea3   : > { %5136 = vmatprep.mubr.msk.f32.mxu1 %vm6074_vm0, %v6075_v1  ;;  %5135 = vmatpush3.msra.mxu1 %v2000_v42 }
 0xea4   : > { %5144 = vmatprep.subr.mxu1 %v6075_v1 }
 0xf71   : > { %v2413_v20 = vpop.f32.mrb[18].mxu1 }
 0xf72   : > { %v5118_v21 = vpop.f32.mrb[19].mxu1  ;;  %5122 = vmatmul.mubr.msk.f32.vlgmr.msra.gmra.mrb[16].mxu0 %vm1415_vm5, %v2413_v20  ;;  %v4813_v20 = vld [vmem:[%s7105_s20] ss:$0 sm:$0xff] }
 0xf73   : > { %5131 = vmatprep.mubr.msk.f32.mxu0 %vm6074_vm0, %v6075_v1 }
 0xf75   : > { %v2565_v22 = vpop.f32.mrb[20].mxu1 }
 0xf76   : > { %v5128_v23 = vpop.f32.mrb[21].mxu1  ;;  %v2569_v24 = vsel %vm2082_vm7, %v2565_v22, -inf }
 0xf77   : > { %2570 = vmax.xlane.f32.xlu1 %v2569_v24 }
 0xf88   : > { %2733 = vrot.lane.b32.xlu1 %v6703_v44, %s7144_s23  ;;  %s7208_s23 = sld [smem:[#allocation54_spill]] }
 0xf8c   : > { %2731 = vrot.lane.b32.xlu1 %v6711_v47, %s7143_s27  ;;  %s7205_s27 = sld [smem:[#allocation52_spill]] }
 0xf8e   : > { %v4820_v12 = vld [vmem:[%s7208_s23] ss:$0 sm:$0xff] }
0x1004   : > { %v2571_v25 = vpop.xlane.xlu1 %2570 }
0x1005   : > { %v2572_v26 = vsub.f32 %v2565_v22, %v2571_v25  ;;  %v4814_v22 = vld [vmem:[%s7106_s21] ss:$0 sm:$0xff] }
0x1006   : > { %v3094_v25 = vld [vmem:[%s7103_s18] sm:$0xff] }
0x1007   : > { %v2573_v27 = vmul.f32 1.442695, %v2572_v26  ;;  %v3095_v26 = vld [vmem:[%s7103_s18 + $0x8] sm:$0xff] }
0x1008   : > { %v2734_v38 = vpop.permute.xlu1 %2733 }
0x1009   : > { %5562 = vpow2.f32 %v2573_v27  ;;  %v5325_v27 = vpack.c.bf16 %v3095_v26, %v3094_v25 }
0x100c   : > { %v2732_v40 = vpop.permute.xlu1 %2731 }
0x1013   : > { %v5563_v28 = vpop.eup %5562 }
0x1014   : > { %v2575_v29 = vsel %vm2082_vm7, %v5563_v28, 0.0 }
0x1015   : > { %2576 = vadd.xlane.f32.xlu0 %v2575_v29  ;;  %v3097_v29 = vld [vmem:[%s7103_s18 + $0x18] sm:$0xff] }
0x102b   : > { %2580 = vrot.lane.b32.xlu0 %v6703_v44, %s6085_s13 }
0x1045   : > { %v2486_v32 = vpop.f32.mrb[16].mxu0 }
0x1046   : > { %v2490_v33 = vadd.f32 %v2486_v32, %v2250_v31  ;;  %v5123_v34 = vpop.f32.mrb[17].mxu0  ;;  %v3098_v31 = vld [vmem:[%s7103_s18 + $0x20] sm:$0xff]  ;;  %v3099_v32 = vld [vmem:[%s7103_s18 + $0x28] sm:$0xff] }
0x1047   : > { %v3100_v34 = vld [vmem:[%s7103_s18 + $0x30] sm:$0xff] }
0x10a2   : > { %v2577_v35 = vpop.xlane.xlu0 %2576 }
0x10a3   : > { %5564 = vrcp.f32 %v2577_v35  ;;  %v3101_v35 = vld [vmem:[%s7103_s18 + $0x38] sm:$0xff] }
0x10a6   : > { %v2581_v36 = vpop.permute.xlu0 %2580 }
0x10a7   : > { %5130 = vmatpush3.msk.msra.mxu0 %vm1069_vm2, %v2581_v36  ;;  %v5334_v36 = vpack.c.bf16 %v3101_v35, %v3100_v34 }
0x10a8   : > { %5139 = vmatprep.subr.mxu0 %v6075_v1 }
0x10ad   : > { %v5565_v37 = vpop.eup %5564 }
0x10ae   : > { %v2579_v39 = vmul.f32 %v5565_v37, %v5563_v28  ;;  %v3096_v28 = vld [vmem:[%s7103_s18 + $0x10] sm:$0xff]  ;;  %v4815_v37 = vld [vmem:[#allocation22] ss:$0 sm:$0xff] }
0x10af   : > { %v5328_v30 = vpack.c.bf16 %v3097_v29, %v3096_v28  ;;  %v4827_v29 = vld [vmem:[%s7099_s14 + $0x20] sm:$0xff] }
0x10b0   : > { %5132 = vmatmul.mubr.msk.f32.vlgmr.msra.gmra.mrb[18].mxu0 %vm1065_vm3, %v2579_v39 }
0x10b1   : > { %5140 = vmatpush3.xpose.msk.msra.mxu0 %vm1415_vm5, %v2734_v38  ;;  %5141 = vmatprep.mubr.msk.f32.mxu0 %vm6074_vm0, %v6075_v1 }
0x10b2   : > { %5149 = vmatprep.subr.mxu0 %v6075_v1 }
0x10b4   : > { %5142 = vmatmul.mubr.msk.f32.vlgmr.msra.gmra.mrb[20].mxu0 %vm1415_vm5, %v2732_v40 }
0x10b5   : > { %5151 = vmatprep.mubr.msk.f32.mxu0 %vm6074_vm0, %v6075_v1  ;;  %5150 = vmatpush3.msra.mxu0 %v2001_v60 }
0x10b6   : > { %5324 = vmatprep.subr.bf16.mxu0 %v6073_v0 }
0x1183   : > { %v2653_v43 = vpop.f32.mrb[18].mxu0 }
0x1184   : > { %v5133_v45 = vpop.f32.mrb[19].mxu0  ;;  %5137 = vmatmul.mubr.msk.f32.vlgmr.msra.gmra.mrb[22].mxu1 %vm1415_vm5, %v2653_v43 }
0x1185   : > { %5146 = vmatprep.mubr.msk.f32.mxu1 %vm6074_vm0, %v6075_v1 }
0x1187   : > { %v2805_v46 = vpop.f32.mrb[20].mxu0 }
0x1188   : > { %v5143_v47 = vpop.f32.mrb[21].mxu0  ;;  %v2809_v48 = vsel %vm2082_vm7, %v2805_v46, -inf }
0x1189   : > { %2810 = vmax.xlane.f32.xlu0 %v2809_v48 }
0x119f   : > { %2820 = vrot.lane.b32.xlu0 %v6703_v44, %s7142_s3  ;;  %s7206_s3 = smov %s7205_s27 }
0x1216   : > { %v2811_v49 = vpop.xlane.xlu0 %2810 }
0x1217   : > { %v2812_v50 = vsub.f32 %v2805_v46, %v2811_v49 }
0x1219   : > { %v2813_v51 = vmul.f32 1.442695, %v2812_v50 }
0x121a   : > { %v2821_v52 = vpop.permute.xlu0 %2820 }
0x121b   : > { %5566 = vpow2.f32 %v2813_v51  ;;  %5145 = vmatpush3.msk.msra.mxu1 %vm1069_vm2, %v2821_v52  ;;  %v4817_v52 = vld [vmem:[%s7205_s27] ss:$0 sm:$0xff] }
0x121c   : > { %5318 = vmatprep.subr.bf16.mxu1 %v6073_v0 }
0x1225   : > { %v5567_v53 = vpop.eup %5566 }
0x1226   : > { %v2815_v54 = vsel %vm2082_vm7, %v5567_v53, 0.0 }
0x1227   : > { %2816 = vadd.xlane.f32.xlu1 %v2815_v54 }
0x1257   : > { %v2726_v55 = vpop.f32.mrb[22].mxu1 }
0x1258   : > { %v2730_v56 = vadd.f32 %v2726_v55, %v2490_v33  ;;  %v5138_v57 = vpop.f32.mrb[23].mxu1  ;;  %v5331_v33 = vpack.c.bf16 %v3099_v32, %v3098_v31 }
0x12b4   : > { %v2817_v58 = vpop.xlane.xlu1 %2816 }
0x12b5   : > { %5568 = vrcp.f32 %v2817_v58 }
0x12bf   : > { %v5569_v59 = vpop.eup %5568 }
0x12c0   : > { %v2819_v44 = vmul.f32 %v5569_v59, %v5567_v53 }
0x12c2   : > { %5147 = vmatmul.mubr.msk.f32.vlgmr.msra.gmra.mrb[24].mxu1 %vm1065_vm3, %v2819_v44 }
0x12c3   : > { %5162 = vmatprep.mubr.msk.f32.mxu1 %vm6074_vm0, %v6075_v1  ;;  %5320 = vmatpush3.bf16.msra.mxu1 %v5319_v13 }
0x12c4   : > { %5321 = vmatprep.subr.bf16.mxu1 %v6073_v0 }
0x12c7   : > { %5323 = vmatpush3.bf16.msra.mxu1 %v5322_v16 }
0x12c8   : > { %5336 = vmatprep.subr.bf16.mxu1 %v6073_v0 }
0x1395   : > { %v2893_v61 = vpop.f32.mrb[24].mxu1 }
0x1396   : > { %v5148_v62 = vpop.f32.mrb[25].mxu1  ;;  %5152 = vmatmul.mubr.msk.f32.vlgmr.msra.gmra.mrb[22].mxu0 %vm1415_vm5, %v2893_v61 }
0x1397   : > { %5181 = vmatprep.mubr.msk.f32.mxu0 %vm6074_vm0, %v6075_v1  ;;  %5326 = vmatpush3.bf16.msra.mxu0 %v5325_v27  ;;  %v4821_v62 = vld [vmem:[%s7097_s12 + $0x20] sm:$0xff] }
0x1398   : > { %5327 = vmatprep.subr.bf16.mxu0 %v6073_v0 }
0x139b   : > { %5329 = vmatpush3.bf16.msra.mxu0 %v5328_v30 }
0x139c   : > { %5330 = vmatprep.subr.bf16.mxu0 %v6073_v0 }
0x139f   : > { %5332 = vmatpush3.bf16.msra.mxu0 %v5331_v33 }
0x13a0   : > { %5333 = vmatprep.subr.bf16.mxu0 %v6073_v0 }
0x13a3   : > { %5335 = vmatpush3.bf16.msra.mxu0 %v5334_v36 }
0x13a4   : > { %5200 = vmatprep.subr.mxu0 %v6075_v1 }
0x1469   : > { %v2966_v63 = vpop.f32.mrb[22].mxu0 }
0x146a   : > { %v2970_v2 = vadd.f32 %v2966_v63, %v2730_v56  ;;  %v5153_v3 = vpop.f32.mrb[23].mxu0  ;;  %v4822_v63 = vld [vmem:[%s7097_s12 + $0x28] sm:$0xff] }
0x146b   : > { %v4823_v3 = vld [vmem:[%s7097_s12 + $0x30] sm:$0xff] }
0x146c   : > { %v2971_v4 = vadd.f32 %v2970_v2, %v6697_v41  ;;  %v5337_v2 = vpack.c.bf16 %v4822_v63, %v4821_v62 }
0x146e   : > { %v2974_v5 = vsel %vm1883_vm6, %v2971_v4, 0.0 }
0x146f   : > { %2975 = vadd.xlane.f32.xlu1 %v2974_v5 }
0x14fc   : > { %v2976_v6 = vpop.xlane.xlu1 %2975 }
0x14fd   : > { %v2977_v7 = vmul.f32 0.03125, %v2976_v6 }
0x14ff   : > { %v2978_v8 = vsub.f32 %v2971_v4, %v2977_v7  ;;  %v4824_v4 = vld [vmem:[%s7097_s12 + $0x38] sm:$0xff] }
0x1500   : > { %v5340_v5 = vpack.c.bf16 %v4824_v4, %v4823_v3  ;;  %v4836_v4 = vld [vmem:[#allocation19 + $0x1] ss:$0 sm:$0xff] }
0x1501   : > { %v2979_v9 = vmul.f32 %v2978_v8, %v2978_v8 }
0x1503   : > { %v2980_v10 = vsel %vm1883_vm6, %v2979_v9, 0.0 }
0x1504   : > { %2981 = vadd.xlane.f32.xlu1 %v2980_v10  ;;  %v4819_v10 = vld [vmem:[%s7207_s24] ss:$0 sm:$0xff] }
0x1591   : > { %v2982_v41 = vpop.xlane.xlu1 %2981 }
0x1592   : > { %v2983_v17 = vmul.f32 0.03125, %v2982_v41 }
0x1594   : > { %v2984_v18 = vadd.f32 1e-12, %v2983_v17 }
0x1596   : > { %5570 = vrsqrt.f32 %v2984_v18 }
0x15a0   : > { %v5571_v19 = vpop.eup %5570 }
0x15a1   : > { %v2986_v21 = vmul.f32 %v5571_v19, %v2978_v8 }
0x15a3   : > { %v2993_v23 = vmul.f32 %v4813_v20, %v2986_v21 }
0x15a5   : > { %v3000_v24 = vadd.f32 %v4814_v22, %v2993_v23 }
0x15a7   : > { %5163 = vmatmul.mubr.msk.f32.vlgmr.msra.gmra.mrb[26].mxu1 %vm1383_vm4, %v3000_v24 }
0x15a8   : > { %5192 = vmatprep.mubr.msk.f32.mxu1 %vm6074_vm0, %v6075_v1  ;;  %5338 = vmatpush3.bf16.msra.mxu1 %v5337_v2 }
0x15a9   : > { %5339 = vmatprep.subr.bf16.mxu1 %v6073_v0 }
0x15ac   : > { %5341 = vmatpush3.bf16.msra.mxu1 %v5340_v5 }
0x15ad   : > { %5195 = vmatprep.subr.mxu1 %v6075_v1 }
0x167a   : > { %v3081_v38 = vpop.f32.mrb[26].mxu1 }
0x167b   : > { %v3082_v39 = vadd.f32 %v4815_v37, %v3081_v38  ;;  %v5164_v40 = vpop.f32.mrb[27].mxu1 }
0x167d   : > { %v3085_v42 = vmul.f32 %v3082_v39, %v3082_v39 }
0x167f   : > { %v3086_v43 = vmul.f32 %v3085_v42, %v3082_v39 }
0x1681   : > { %v3087_v45 = vmul.f32 0.044715, %v3086_v43 }
0x1683   : > { %v3088_v46 = vadd.f32 %v3087_v45, %v3082_v39 }
0x1685   : > { %v3089_v47 = vmul.f32 0.7978846, %v3088_v46 }
0x1687   : > { %5572 = vtanh.f32 %v3089_v47 }
0x1691   : > { %v5573_v48 = vpop.eup %5572 }
0x1692   : > { %v3091_v49 = vadd.f32 1.0, %v5573_v48 }
0x1694   : > { %v3092_v50 = vmul.f32 0.5, %v3091_v49 }
0x1696   : > { %v3093_v51 = vmul.f32 %v3092_v50, %v3082_v39 }
0x1698   : > { %5182 = vmatmul.mubr.msk.f32.vlgmr.msra.gmra.mrb[24].mxu0 %vm3109_vm8, %v3093_v51 }
0x1699   : > { %5202 = vmatprep.mubr.msk.f32.mxu0 %vm6074_vm0, %v6075_v1 }
0x176b   : > { %v3179_v53 = vpop.f32.mrb[24].mxu0 }
0x176c   : > { %v3180_v54 = vadd.f32 %v4817_v52, %v3179_v53  ;;  %v5183_v55 = vpop.f32.mrb[25].mxu0 }
0x176d   : > { %v4828_v55 = vld [vmem:[%s7099_s14 + $0x28] sm:$0xff] }
0x176e   : > { %v3183_v56 = vadd.f32 %v3180_v54, %v3000_v24 }
0x1770   : > { %v3186_v57 = vsel %vm1883_vm6, %v3183_v56, 0.0 }
0x1771   : > { %3187 = vadd.xlane.f32.xlu1 %v3186_v57 }
0x17fe   : > { %v3188_v58 = vpop.xlane.xlu1 %3187 }
0x17ff   : > { %v3189_v59 = vmul.f32 0.03125, %v3188_v58 }
0x1801   : > { %v3190_v44 = vsub.f32 %v3183_v56, %v3189_v59 }
0x1803   : > { %v3191_v60 = vmul.f32 %v3190_v44, %v3190_v44 }
0x1805   : > { %v3192_v61 = vsel %vm1883_vm6, %v3191_v60, 0.0 }
0x1806   : > { %3193 = vadd.xlane.f32.xlu1 %v3192_v61 }
0x1893   : > { %v3194_v6 = vpop.xlane.xlu1 %3193 }
0x1894   : > { %v3195_v7 = vmul.f32 0.03125, %v3194_v6 }
0x1896   : > { %v3196_v8 = vadd.f32 1e-12, %v3195_v7 }
0x1898   : > { %5574 = vrsqrt.f32 %v3196_v8 }
0x18a2   : > { %v5575_v9 = vpop.eup %5574 }
0x18a3   : > { %v3198_v11 = vmul.f32 %v5575_v9, %v3190_v44 }
0x18a5   : > { %v3205_v13 = vmul.f32 %v4819_v10, %v3198_v11 }
0x18a7   : > { %v6877_v14 = vadd.f32 %v4820_v12, %v3205_v13 }
0x18a9   : > { %5193 = vmatmul.mubr.msk.f32.vlgmr.msra.gmra.mrb[28].mxu1 %vm1383_vm4, %v6877_v14 }
0x18aa   : > { %5197 = vmatprep.mubr.msk.f32.mxu1 %vm6074_vm0, %v6075_v1 }
0x197c   : > { %v3295_v16 = vpop.f32.mrb[28].mxu1 }
0x197d   : > { %v6883_v41 = vadd.f32 %v4825_v15, %v3295_v16  ;;  %v5194_v17 = vpop.f32.mrb[29].mxu1  ;;  %v4829_v15 = vld [vmem:[%s7099_s14 + $0x30] sm:$0xff] }
0x197f   : > { %3308 = vrot.lane.b32.xlu0 %v6883_v41, %s6076_s16  ;;  %v6889_v19 = vmul.f32 0.35355338, %v6883_v41 }
0x19f1   : > { %v3309_v18 = vpop.permute.xlu0 %3308 }
0x19f2   : > { %5196 = vmatpush3.xpose.msk.msra.mxu1 %vm1415_vm5, %v3309_v18 }
0x19f3   : > { %5205 = vmatprep.subr.mxu1 %v6075_v1 }
0x19f5   : > { %5198 = vmatmul.mubr.msk.f32.vlgmr.msra.gmra.mrb[30].mxu1 %vm1415_vm5, %v6889_v19 }
0x19f6   : > { %5207 = vmatprep.mubr.msk.f32.mxu1 %vm6074_vm0, %v6075_v1  ;;  %5206 = vmatpush3.msra.mxu1 %v4827_v29 }
0x19f7   : > { %5215 = vmatprep.subr.mxu1 %v6075_v1 }
0x1ac8   : > { %v3381_v20 = vpop.f32.mrb[30].mxu1 }
0x1ac9   : > { %v5199_v21 = vpop.f32.mrb[31].mxu1  ;;  %v3385_v22 = vsel %vm2082_vm7, %v3381_v20, -inf }
0x1aca   : > { %3386 = vmax.xlane.f32.xlu1 %v3385_v22 }
0x1adb   : > { %3396 = vrot.lane.b32.xlu1 %v6883_v41, %s6078_s26 }
0x1adf   : > { %3555 = vrot.lane.b32.xlu1 %v6883_v41, %s6077_s1 }
0x1ae3   : > { %3553 = vrot.lane.b32.xlu1 %v6889_v19, %s6079_s28  ;;  %s7214_s28 = sld [smem:[#allocation55_spill]] }
0x1b57   : > { %v3387_v23 = vpop.xlane.xlu1 %3386 }
0x1b58   : > { %v3388_v24 = vsub.f32 %v3381_v20, %v3387_v23 }
0x1b5a   : > { %v3389_v25 = vmul.f32 1.442695, %v3388_v24 }
0x1b5b   : > { %v3397_v26 = vpop.permute.xlu1 %3396 }
0x1b5c   : > { %5576 = vpow2.f32 %v3389_v25  ;;  %5201 = vmatpush3.msk.msra.mxu0 %vm1069_vm2, %v3397_v26 }
0x1b5d   : > { %5210 = vmatprep.subr.mxu0 %v6075_v1 }
0x1b5f   : > { %v3556_v32 = vpop.permute.xlu1 %3555 }
0x1b63   : > { %v3554_v34 = vpop.permute.xlu1 %3553 }
0x1b66   : > { %v5577_v27 = vpop.eup %5576 }
0x1b67   : > { %v3391_v28 = vsel %vm2082_vm7, %v5577_v27, 0.0 }
0x1b68   : > { %3392 = vadd.xlane.f32.xlu0 %v3391_v28 }
0x1b7e   : > { %3642 = vrot.lane.b32.xlu0 %v6883_v41, %s6080_s8  ;;  %s7209_s8 = smov 72  }
0x1b82   : > { %3795 = vrot.lane.b32.xlu0 %v6883_v41, %s6082_s2  ;;  %s7043_s2 = scalar_lea.hbm %s7214_s28, %s4873_s30 }
0x1bf5   : > { %v3393_v30 = vpop.xlane.xlu0 %3392 }
0x1bf6   : > { %5578 = vrcp.f32 %v3393_v30 }
0x1bf9   : > { %v3643_v36 = vpop.permute.xlu0 %3642 }
0x1bfd   : > { %v3796_v50 = vpop.permute.xlu0 %3795 }
0x1c00   : > { %v5579_v31 = vpop.eup %5578 }
0x1c01   : > { %v3395_v33 = vmul.f32 %v5579_v31, %v5577_v27 }
0x1c03   : > { %5203 = vmatmul.mubr.msk.f32.vlgmr.msra.gmra.mrb[26].mxu0 %vm1065_vm3, %v3395_v33 }
0x1c04   : > { %5211 = vmatpush3.xpose.msk.msra.mxu0 %vm1415_vm5, %v3556_v32  ;;  %5212 = vmatprep.mubr.msk.f32.mxu0 %vm6074_vm0, %v6075_v1 }
0x1c05   : > { %5220 = vmatprep.subr.mxu0 %v6075_v1 }
0x1c07   : > { %5213 = vmatmul.mubr.msk.f32.vlgmr.msra.gmra.mrb[28].mxu0 %vm1415_vm5, %v3554_v34 }
0x1c08   : > { %5222 = vmatprep.mubr.msk.f32.mxu0 %vm6074_vm0, %v6075_v1  ;;  %5221 = vmatpush3.msra.mxu0 %v4828_v55  ;;  %v4854_v55 = vld [vmem:[%s7105_s20 + $0x1] ss:$0 sm:$0xff] }
0x1c09   : > { %5230 = vmatprep.subr.mxu0 %v6075_v1 }
0x1cd6   : > { %v3469_v35 = vpop.f32.mrb[26].mxu0 }
0x1cd7   : > { %v5204_v37 = vpop.f32.mrb[27].mxu0  ;;  %5208 = vmatmul.mubr.msk.f32.vlgmr.msra.gmra.mrb[32].mxu1 %vm1415_vm5, %v3469_v35 }
0x1cd8   : > { %5216 = vmatpush3.msk.msra.mxu1 %vm1069_vm2, %v3643_v36  ;;  %5217 = vmatprep.mubr.msk.f32.mxu1 %vm6074_vm0, %v6075_v1 }
0x1cd9   : > { %5225 = vmatprep.subr.mxu1 %v6075_v1 }
0x1cda   : > { %v3627_v38 = vpop.f32.mrb[28].mxu0 }
0x1cdb   : > { %v5214_v39 = vpop.f32.mrb[29].mxu0  ;;  %v3631_v40 = vsel %vm2082_vm7, %v3627_v38, -inf }
0x1cdc   : > { %3632 = vmax.xlane.f32.xlu1 %v3631_v40 }
0x1d69   : > { %v3633_v42 = vpop.xlane.xlu1 %3632 }
0x1d6a   : > { %v3634_v43 = vsub.f32 %v3627_v38, %v3633_v42 }
0x1d6c   : > { %v3635_v45 = vmul.f32 1.442695, %v3634_v43 }
0x1d6e   : > { %5580 = vpow2.f32 %v3635_v45 }
0x1d78   : > { %v5581_v46 = vpop.eup %5580 }
0x1d79   : > { %v3637_v47 = vsel %vm2082_vm7, %v5581_v46, 0.0 }
0x1d7a   : > { %3638 = vadd.xlane.f32.xlu0 %v3637_v47  ;;  %v4306_v47 = vld [vmem:[#allocation20 + $0x20] sm:$0xff] }
0x1d90   : > { %3793 = vrot.lane.b32.xlu0 %v6889_v19, %s6081_s7  ;;  %s7210_s7 = smov 104  }
0x1daa   : > { %v3542_v48 = vpop.f32.mrb[32].mxu1 }
0x1dab   : > { %v5209_v49 = vpop.f32.mrb[33].mxu1  ;;  %v3552_v5 = vadd.f32 %v4836_v4, %v3542_v48  ;;  %v4307_v48 = vld [vmem:[#allocation20 + $0x28] sm:$0xff]  ;;  %v4863_v4 = vld [vmem:[%s7103_s18 + $0x68] sm:$0xff] }
0x1dac   : > { %v5343_v49 = vpack.c.bf16 %v4307_v48, %v4306_v47 }
0x1e07   : > { %v3639_v51 = vpop.xlane.xlu0 %3638 }
0x1e08   : > { %5582 = vrcp.f32 %v3639_v51 }
0x1e0b   : > { %v3794_v54 = vpop.permute.xlu0 %3793 }
0x1e12   : > { %v5583_v52 = vpop.eup %5582 }
0x1e13   : > { %v3641_v53 = vmul.f32 %v5583_v52, %v5581_v46 }
0x1e15   : > { %5218 = vmatmul.mubr.msk.f32.vlgmr.msra.gmra.mrb[34].mxu1 %vm1065_vm3, %v3641_v53 }
0x1e16   : > { %5226 = vmatpush3.xpose.msk.msra.mxu1 %vm1415_vm5, %v3796_v50  ;;  %5227 = vmatprep.mubr.msk.f32.mxu1 %vm6074_vm0, %v6075_v1  ;;  %v4309_v50 = vld [vmem:[#allocation20 + $0x38] sm:$0xff] }
0x1e17   : > { %5235 = vmatprep.subr.mxu1 %v6075_v1 }
0x1e19   : > { %5228 = vmatmul.mubr.msk.f32.vlgmr.msra.gmra.mrb[36].mxu1 %vm1415_vm5, %v3794_v54 }
0x1e1a   : > { %5237 = vmatprep.mubr.msk.f32.mxu1 %vm6074_vm0, %v6075_v1  ;;  %5236 = vmatpush3.msra.mxu1 %v4829_v15 }
0x1e1b   : > { %5245 = vmatprep.subr.mxu1 %v6075_v1 }
0x1ee8   : > { %v3715_v56 = vpop.f32.mrb[34].mxu1 }
0x1ee9   : > { %v5219_v57 = vpop.f32.mrb[35].mxu1  ;;  %5223 = vmatmul.mubr.msk.f32.vlgmr.msra.gmra.mrb[30].mxu0 %vm1415_vm5, %v3715_v56 }
0x1eea   : > { %5232 = vmatprep.mubr.msk.f32.mxu0 %vm6074_vm0, %v6075_v1  ;;  %v4855_v57 = vld [vmem:[%s7106_s21 + $0x1] ss:$0 sm:$0xff] }
0x1eec   : > { %v3867_v58 = vpop.f32.mrb[36].mxu1 }
0x1eed   : > { %v5229_v59 = vpop.f32.mrb[37].mxu1  ;;  %v3871_v44 = vsel %vm2082_vm7, %v3867_v58, -inf }
0x1eee   : > { %3872 = vmax.xlane.f32.xlu1 %v3871_v44  ;;  %v4858_v44 = vld [vmem:[%s7103_s18 + $0x40] sm:$0xff] }
0x1eff   : > { %3882 = vrot.lane.b32.xlu1 %v6883_v41, %s6085_s13 }
0x1f03   : > { %4035 = vrot.lane.b32.xlu1 %v6883_v41, %s7209_s8  ;;  %s7215_s8 = smov %s7214_s28 }
0x1f07   : > { %4033 = vrot.lane.b32.xlu1 %v6889_v19, %s7210_s7  ;;  %s7212_s7 = sld [smem:[#allocation33_spill]] }
0x1f0d   : > { %s903_s22 = sand.u32 1, %s7212_s7  }
0x1f0e   : > { %s904_s4 = scalar_lea.vmem [#allocation23], %s903_s22  ;;  %s4534_s7 = scalar_lea.sflag [#allocation4], %s903_s22 }
0x1f0f   : > { %s4546_s16 = sshll.u32 %s904_s4, 4  ;;  %s7045_s16 = int_to_ptr.vmem [resolvable:$true] %s4546_s16 }
0x1f10   : > { %s5962_s13 = scalar_lea.vmem %s7045_s16, 16 }
0x1f11   : > { %p5963_p1 = scmp.ne.s32.totalorder %s7045_s16, %s5962_s13 }
0x1f13   : > { %p5964_p5 = pnand %p5963_p1, %p7216_p6 }
0x1f15   : > { %p5965_p9 = pneg %p5964_p5 }
0x1f7b   : > { %v3873_v60 = vpop.xlane.xlu1 %3872 }
0x1f7c   : > { %v3874_v61 = vsub.f32 %v3867_v58, %v3873_v60  ;;  %v4859_v60 = vld [vmem:[%s7103_s18 + $0x48] sm:$0xff] }
0x1f7e   : > { %v3875_v62 = vmul.f32 1.442695, %v3874_v61  ;;  %v5349_v61 = vpack.c.bf16 %v4859_v60, %v4858_v44 }
0x1f7f   : > { %v3883_v63 = vpop.permute.xlu1 %3882 }
0x1f80   : > { %5584 = vpow2.f32 %v3875_v62  ;;  %5231 = vmatpush3.msk.msra.mxu0 %vm1069_vm2, %v3883_v63  ;;  %v4860_v62 = vld [vmem:[%s7103_s18 + $0x50] sm:$0xff]  ;;  %v4861_v63 = vld [vmem:[%s7103_s18 + $0x58] sm:$0xff] }
0x1f81   : > { %5240 = vmatprep.subr.mxu0 %v6075_v1 }
0x1f83   : > { %v4036_v11 = vpop.permute.xlu1 %4035 }
0x1f87   : > { %v4034_v13 = vpop.permute.xlu1 %4033 }
0x1f8a   : > { %v5585_v2 = vpop.eup %5584 }
0x1f8b   : > { %v3877_v3 = vsel %vm2082_vm7, %v5585_v2, 0.0 }
0x1f8c   : > { %3878 = vadd.xlane.f32.xlu0 %v3877_v3  ;;  %v4862_v3 = vld [vmem:[%s7103_s18 + $0x60] sm:$0xff] }
0x1fbc   : > { %v3788_v6 = vpop.f32.mrb[30].mxu0 }
0x1fbd   : > { %v3792_v7 = vadd.f32 %v3788_v6, %v3552_v5  ;;  %v5224_v8 = vpop.f32.mrb[31].mxu0  ;;  %v5355_v5 = vpack.c.bf16 %v4863_v4, %v4862_v3  ;;  %v4864_v6 = vld [vmem:[%s7103_s18 + $0x70] sm:$0xff] }
0x2019   : > { %v3879_v9 = vpop.xlane.xlu0 %3878 }
0x201a   : > { %5586 = vrcp.f32 %v3879_v9  ;;  %v4856_v9 = vld [vmem:[#allocation22 + $0x1] ss:$0 sm:$0xff] }
0x2024   : > { %v5587_v10 = vpop.eup %5586 }
0x2025   : > { %v3881_v12 = vmul.f32 %v5587_v10, %v5585_v2  ;;  %v5352_v2 = vpack.c.bf16 %v4861_v63, %v4860_v62 }
0x2027   : > { %5233 = vmatmul.mubr.msk.f32.vlgmr.msra.gmra.mrb[32].mxu0 %vm1065_vm3, %v3881_v12 }
0x2028   : > { %5241 = vmatpush3.xpose.msk.msra.mxu0 %vm1415_vm5, %v4036_v11  ;;  %5242 = vmatprep.mubr.msk.f32.mxu0 %vm6074_vm0, %v6075_v1 }
0x2029   : > { %5250 = vmatprep.subr.mxu0 %v6075_v1 }
0x202b   : > { %5243 = vmatmul.mubr.msk.f32.vlgmr.msra.gmra.mrb[34].mxu0 %vm1415_vm5, %v4034_v13 }
0x202c   : > { %5252 = vmatprep.mubr.msk.f32.mxu0 %vm6074_vm0, %v6075_v1 }
0x20fa   : > { %v3955_v16 = vpop.f32.mrb[32].mxu0 }
0x20fb   : > { %v5234_v17 = vpop.f32.mrb[33].mxu0  ;;  %5238 = vmatmul.mubr.msk.f32.vlgmr.msra.gmra.mrb[38].mxu1 %vm1415_vm5, %v3955_v16 }
0x20fc   : > { %5247 = vmatprep.mubr.msk.f32.mxu1 %vm6074_vm0, %v6075_v1 }
0x20fe   : > { %v4107_v18 = vpop.f32.mrb[34].mxu0 }
0x20ff   : > { %v5244_v19 = vpop.f32.mrb[35].mxu0  ;;  %v4111_v20 = vsel %vm2082_vm7, %v4107_v18, -inf }
0x2100   : > { %4112 = vmax.xlane.f32.xlu1 %v4111_v20 }
0x218d   : > { %v4113_v21 = vpop.xlane.xlu1 %4112 }
0x218e   : > { %v4114_v22 = vsub.f32 %v4107_v18, %v4113_v21 }
0x2190   : > { %v4115_v23 = vmul.f32 1.442695, %v4114_v22  ;;  %v4867_v22 = vld [vmem:[%s7206_s3 + $0x1] ss:$0 sm:$0xff] }
0x2192   : > { %5588 = vpow2.f32 %v4115_v23 }
0x219c   : > { %v5589_v24 = vpop.eup %5588 }
0x219d   : > { %v4117_v25 = vsel %vm2082_vm7, %v5589_v24, 0.0 }
0x219e   : > { %4118 = vadd.xlane.f32.xlu0 %v4117_v25 }
0x21b4   : > { %4122 = vrot.lane.b32.xlu0 %v6883_v41, %s7211_s0  ;;  %v4830_v41 = vld [vmem:[%s7099_s14 + $0x38] sm:$0xff]  ;;  %s5966_s0 = sshll.u32 %s6087_s6, 4  ;;  %s5967_s0 = int_to_ptr.vmem [resolvable:$false] %s5966_s0 }
0x21b5   : > { %5251 = vmatpush3.msra.mxu0 %v4830_v41  ;;  %s5968_s27 = scalar_lea.vmem %s5967_s0, 32  ;;  %p5969_p12 = scmp.lt.s32.totalorder %s7045_s16, %s5967_s0 }
0x21b6   : > { %5348 = vmatprep.subr.bf16.mxu0 %v6073_v0  ;;  %p5970_p10 = scmp.lt.s32.totalorder %s5968_s27, %s5962_s13 }
0x21b8   : > { %p5971_p2 = por %p5970_p10, %p5969_p12 }
0x21ba   : > { %p5972_p3 = pnand %p5971_p2, %p5965_p9 }
0x21ce   : > { %v4028_v26 = vpop.f32.mrb[38].mxu1 }
0x21cf   : > { %v4032_v27 = vadd.f32 %v4028_v26, %v3792_v7  ;;  %v5239_v28 = vpop.f32.mrb[39].mxu1  ;;  %v4865_v7 = vld [vmem:[%s7103_s18 + $0x78] sm:$0xff] }
0x21d0   : > { %v5358_v8 = vpack.c.bf16 %v4865_v7, %v4864_v6 }
0x222b   : > { %v4119_v29 = vpop.xlane.xlu0 %4118 }
0x222c   : > { %5590 = vrcp.f32 %v4119_v29 }
0x222f   : > { %v4123_v30 = vpop.permute.xlu0 %4122 }
0x2230   : > { %5246 = vmatpush3.msk.msra.mxu1 %vm1069_vm2, %v4123_v30 }
0x2231   : > { %5342 = vmatprep.subr.bf16.mxu1 %v6073_v0 }
0x2236   : > { %v5591_v31 = vpop.eup %5590 }
0x2237   : > { %v4121_v32 = vmul.f32 %v5591_v31, %v5589_v24 }
0x2239   : > { %5248 = vmatmul.mubr.msk.f32.vlgmr.msra.gmra.mrb[40].mxu1 %vm1065_vm3, %v4121_v32 }
0x223a   : > { %5263 = vmatprep.mubr.msk.f32.mxu1 %vm6074_vm0, %v6075_v1  ;;  %5344 = vmatpush3.bf16.msra.mxu1 %v5343_v49 }
0x223b   : > { %5345 = vmatprep.subr.bf16.mxu1 %v6073_v0 }
0x230c   : > { %v4195_v33 = vpop.f32.mrb[40].mxu1 }
0x230d   : > { %v5249_v34 = vpop.f32.mrb[41].mxu1  ;;  %5253 = vmatmul.mubr.msk.f32.vlgmr.msra.gmra.mrb[36].mxu0 %vm1415_vm5, %v4195_v33 }
0x230e   : > { %5282 = vmatprep.mubr.msk.f32.mxu0 %vm6074_vm0, %v6075_v1  ;;  %v4308_v1 = vld [vmem:[#allocation20 + $0x30] sm:$0xff]  ;;  %5350 = vmatpush3.bf16.msra.mxu0 %v5349_v61 }
0x230f   : > { %v5346_v51 = vpack.c.bf16 %v4309_v50, %v4308_v1  ;;  %5351 = vmatprep.subr.bf16.mxu0 %v6073_v0 }
0x2311   : > { %5347 = vmatpush3.bf16.msra.mxu1 %v5346_v51 }
0x2312   : > { %5353 = vmatpush3.bf16.msra.mxu0 %v5352_v2 }
0x2313   : > { %5354 = vmatprep.subr.bf16.mxu0 %v6073_v0 }
0x2316   : > { %5356 = vmatpush3.bf16.msra.mxu0 %v5355_v5 }
0x2317   : > { %5357 = vmatprep.subr.bf16.mxu0 %v6073_v0 }
0x231a   : > { %5359 = vmatpush3.bf16.msra.mxu0 %v5358_v8 }
0x23e0   : > { %v4268_v35 = vpop.f32.mrb[36].mxu0 }
0x23e1   : > { %v4272_v36 = vadd.f32 %v4268_v35, %v4032_v27  ;;  %v5254_v37 = vpop.f32.mrb[37].mxu0 }
0x23e3   : > { %v4273_v38 = vadd.f32 %v4272_v36, %v6877_v14  ;;  %v4871_v36 = vld [vmem:[%s7207_s24 + $0x1] ss:$0 sm:$0xff] }
0x23e5   : > { %v4278_v39 = vsel %vm1883_vm6, %v4273_v38, 0.0 }
0x23e6   : > { %4279 = vadd.xlane.f32.xlu0 %v4278_v39 }
0x2473   : > { %v4280_v40 = vpop.xlane.xlu0 %4279 }
0x2474   : > { %v4281_v42 = vmul.f32 0.03125, %v4280_v40 }
0x2476   : > { %v4282_v43 = vsub.f32 %v4273_v38, %v4281_v42  ;;  %v4872_v38 = vld [vmem:[%s7208_s23 + $0x1] ss:$0 sm:$0xff] }
0x2478   : > { %v4283_v45 = vmul.f32 %v4282_v43, %v4282_v43 }
0x247a   : > { %v4284_v46 = vsel %vm1883_vm6, %v4283_v45, 0.0 }
0x247b   : > { %4285 = vadd.xlane.f32.xlu1 %v4284_v46 }
0x2508   : > { %v4286_v14 = vpop.xlane.xlu1 %4285 }
0x2509   : > { %v4287_v52 = vmul.f32 0.03125, %v4286_v14 }
0x250b   : > { %v4288_v53 = vadd.f32 1e-12, %v4287_v52 }
0x250d   : > { %5592 = vrsqrt.f32 %v4288_v53 }
0x2517   : > { %v5593_v54 = vpop.eup %5592 }
0x2518   : > { %v4290_v56 = vmul.f32 %v5593_v54, %v4282_v43 }
0x251a   : > { %v4297_v58 = vmul.f32 %v4854_v55, %v4290_v56 }
0x251c   : > { %v4304_v59 = vadd.f32 %v4855_v57, %v4297_v58 }
0x251e   : > { %5264 = vmatmul.mubr.msk.f32.vlgmr.msra.gmra.mrb[42].mxu1 %vm1383_vm4, %v4304_v59 }
0x25f1   : > { %v4387_v10 = vpop.f32.mrb[42].mxu1 }
0x25f2   : > { %v4388_v11 = vadd.f32 %v4856_v9, %v4387_v10  ;;  %v5265_v12 = vpop.f32.mrb[43].mxu1 }
0x25f4   : > { %v4391_v13 = vmul.f32 %v4388_v11, %v4388_v11 }
0x25f6   : > { %v4392_v15 = vmul.f32 %v4391_v13, %v4388_v11 }
0x25f8   : > { %v4393_v16 = vmul.f32 0.044715, %v4392_v15 }
0x25fa   : > { %v4394_v17 = vadd.f32 %v4393_v16, %v4388_v11 }
0x25fc   : > { %v4395_v18 = vmul.f32 0.7978846, %v4394_v17 }
0x25fe   : > { %5594 = vtanh.f32 %v4395_v18 }
0x2608   : > { %v5595_v0 = vpop.eup %5594 }
0x2609   : > { %v4397_v19 = vadd.f32 1.0, %v5595_v0 }
0x260b   : > { %v4398_v20 = vmul.f32 0.5, %v4397_v19 }
0x260d   : > { %v4399_v21 = vmul.f32 %v4398_v20, %v4388_v11 }
0x260f   : > { %5283 = vmatmul.mubr.msk.f32.vlgmr.msra.gmra.mrb[38].mxu0 %vm3109_vm8, %v4399_v21 }
0x26e2   : > { %v4486_v23 = vpop.f32.mrb[38].mxu0 }
0x26e3   : > { %v4487_v24 = vadd.f32 %v4867_v22, %v4486_v23  ;;  %v5284_v25 = vpop.f32.mrb[39].mxu0 }
0x26e5   : > { %v4490_v26 = vadd.f32 %v4487_v24, %v4304_v59 }
0x26e7   : > { %v4495_v27 = vsel %vm1883_vm6, %v4490_v26, 0.0 }
0x26e8   : > { %4496 = vadd.xlane.f32.xlu1 %v4495_v27 }
0x2775   : > { %v4497_v28 = vpop.xlane.xlu1 %4496 }
0x2776   : > { %v4498_v29 = vmul.f32 0.03125, %v4497_v28 }
0x2778   : > { %v4499_v30 = vsub.f32 %v4490_v26, %v4498_v29 }
0x277a   : > { %v4500_v31 = vmul.f32 %v4499_v30, %v4499_v30 }
0x277c   : > { %v4501_v32 = vsel %vm1883_vm6, %v4500_v31, 0.0 }
0x277d   : > { %4502 = vadd.xlane.f32.xlu1 %v4501_v32 }
0x280a   : > { %v4503_v41 = vpop.xlane.xlu1 %4502 }
0x280b   : > { %v4504_v33 = vmul.f32 0.03125, %v4503_v41 }
0x280d   : > { %v4505_v34 = vadd.f32 1e-12, %v4504_v33 }
0x280f   : > { %5596 = vrsqrt.f32 %v4505_v34 }
0x2819   : > { %v5597_v35 = vpop.eup %5596 }
0x281a   : > { %v4507_v37 = vmul.f32 %v5597_v35, %v4499_v30 }
0x281c   : > { %v4514_v39 = vmul.f32 %v4871_v36, %v4507_v37 }
0x281e   : > { %v4521_v40 = vadd.f32 %v4872_v38, %v4514_v39 }
0x2820   : > { %v4522_v42 = vsel %vm1883_vm6, %v4521_v40, 0.0 }
0x2821   : > { %v4523_v43 = vrot.slane %v4522_v42, 4 }
0x2823   : > { %v4524_v45 = vadd.f32 %v4523_v43, %v4522_v42 }
0x2825   : > { %v4525_v46 = vrot.slane %v4524_v45, 2 }
0x2827   : > { %v4526_v47 = vadd.f32 %v4525_v46, %v4524_v45 }
0x2829   : > { %v4527_v48 = vrot.slane %v4526_v47, 1 }
0x282b   : > { %v4528_v49 = vadd.f32 %v4527_v48, %v4526_v47 }
0x282d   : > { %v4530_v1 = vmul.f32 0.25, %v4528_v49 }
0x282f   : > { %4532 = vst.msk [vmem:[%s904_s4] sm:$0x1] %vm4531_vm9, %v4530_v1 }
0x2830   : > { %5975 = shalt.err (!%p5972_p3)
}
0x2831   : > { %s5976_s22 = scalar_lea.hbm %s7043_s2, 16  ;;  %s5980_s1 = scalar_lea.hbm %s7215_s8, 32 }
0x2832   : > { %p5977_p4 = scmp.ne.s32.totalorder %s7043_s2, %s5976_s22  ;;  %p5981_p11 = scmp.lt.u32.totalorder %s7043_s2, %s7215_s8 }
0x2833   : > { %p5982_p13 = scmp.lt.u32.totalorder %s5980_s1, %s5976_s22  ;;  %p5984_p1 = scmp.lt.u32.totalorder %s5976_s22, %s7043_s2 }
0x2834   : > { %p5978_p7 = pnand %p5977_p4, %p7216_p6 }
0x2835   : > { %p5983_p0 = por %p5982_p13, %p5981_p11 }
0x2836   : > { %p5979_p8 = pneg %p5978_p7 }
0x2837   : > { %p5985_p5 = por %p5984_p1, %p5983_p0 }
0x2839   : > { %p5986_p9 = pnand %p5985_p5, %p5979_p8 }
0x283b   : > { %5989 = shalt.err (!%p5986_p9)
}
0x283c   : > { %5412 = dma.vmem_to_hbm [thread:$0]  (%p7216_p6), %s7045_s16, 16, %s7043_s2, %s4534_s7  }
0x283d PF: > { %s7217_s13 = sld [smem:[#allocation35_spill]]  ;;  %s7218_s6 = sld [smem:[#allocation32_spill]] }
0x283e   : > { %s7219_s0 = sld [smem:[#allocation39_spill]] }
0x2843   : > { %p5484_p12 = scmp.ge.s32.totalorder %s7217_s13, 2  ;;  %s4558_s27 = sand.u32 1, %s7218_s6  }
0x2844   : > { %p7220_p10 = scmp.ne.s32.totalorder %s7219_s0, 0  ;;  %s4559_s30 = scalar_lea.sflag [#allocation4], %s4558_s27 }
0x2846   : > { %p5455_p2 = pnand %p5484_p12, %p7220_p10 }
0x2848   : > { %6035 = dma.done.wait (!%p5455_p2), %s4559_s30, 16  }
0x2849   : > { %6037 = vsyncadd (!%p5455_p2), %s4559_s30, 4294967280  ;;  %s7221_s28 = sld [smem:[#allocation36_spill]]  ;;  %s7222_s5 = sld [smem:[#allocation33_spill]] }
0x284a   : > { %s7223_s26 = sld [smem:[#allocation34_spill]]  ;;  %s7224_s27 = sld [smem:[#allocation37_spill]] }
0x284f   : > { %p41_p3 = scmp.ge.s32.totalorder %s7221_s28, 4  }
0x2851   :  { %43 = sbr.rel (!%p41_p3) target bundleno = 27 (0x1b), region = 224 }
0x2858   :  { %4563 = vsyncpa [#allocation3], 1 }
0x2859   :  { %4565 = vsyncpa [#allocation3 + $0x1], 1 }
0x285a   :  { %4566 = vsyncpa [#allocation6], 1 }
0x285b   :  { %4567 = vsyncpa [#allocation9], 1 }
0x285c   :  { %4568 = vsyncpa [#allocation12], 1 }
0x285d   :  { %4569 = vsyncpa [#allocation15], 1 }
0x285e   :  { %4570 = vsyncpa [#allocation18], 1 }
0x285f   :  { %4571 = vsyncpa [#allocation21], 1 }
0x2860   :  { %4572 = vsyncpa [#allocation4], 1 }
0x2861   :  { %4574 = vsyncpa [#allocation4 + $0x1], 1 }

</bundles_post_ra>
